<compile_context>
chip_gen: v5e
topology: v5e:2x2
jax: 0.10.0
libtpu: 0.0.40
codegen_flags: <defaults>
</compile_context>

<pallas_src>
import jax
import jax.numpy as jnp
from jax.experimental import pallas as pl
from jax.experimental.pallas import tpu as pltpu  # noqa: F401  (kept for TPU-specific params if needed)

# ---- model hyper-parameters (small, consistent with the module) ----
NUM_HEAD = 4
HIDDEN = 32
FFN_HIDDEN = 64
NUM_BLOCKS = 2
BATCH = 2
SEQ = 8
HEAD_DIM = HIDDEN // NUM_HEAD
LN_EPS = 1e-5


def _layernorm(x, gamma, beta):
    mean = jnp.mean(x, axis=-1, keepdims=True)
    var = jnp.mean((x - mean) ** 2, axis=-1, keepdims=True)
    return (x - mean) * jax.lax.rsqrt(var + LN_EPS) * gamma + beta


def bert_encoder_kernel(x_ref, bias_ref,
                        w_qkv_ref, b_qkv_ref, w_out_ref, b_out_ref,
                        g1_ref, be1_ref, w1_ref, b1_ref, w2_ref, b2_ref,
                        g2_ref, be2_ref,
                        o_ref):
    """Fused multi-layer BERT encoder. No grid: all operands fully resident in VMEM.

    Weight refs are stacked over layers (leading dim = NUM_BLOCKS) and already
    transposed to (in, out); the softmax scale is folded into the Q columns.
    """
    B, S, H = BATCH, SEQ, HIDDEN
    T = B * S

    x = x_ref[...].astype(jnp.float32).reshape(T, H)          # (B*S, H)
    bias = bias_ref[...].astype(jnp.float32)                   # (B, 1, S) key-padding bias

    for layer in range(NUM_BLOCKS):                            # static unroll over layers
        # ---- fused QKV projection for the whole batch ----
        qkv = jnp.dot(x, w_qkv_ref[layer],
                      preferred_element_type=jnp.float32) + b_qkv_ref[layer]   # (T, 3H)

        # ---- multi-head self attention (heads batched in one einsum) ----
        attn_rows = []
        for b in range(B):                                     # static unroll over batch
            qkv_b = qkv[b * S:(b + 1) * S, :]                  # (S, 3H)
            q = jnp.transpose(qkv_b[:, 0:H].reshape(S, NUM_HEAD, HEAD_DIM), (1, 0, 2))
            k = jnp.transpose(qkv_b[:, H:2 * H].reshape(S, NUM_HEAD, HEAD_DIM), (1, 0, 2))
            v = jnp.transpose(qkv_b[:, 2 * H:3 * H].reshape(S, NUM_HEAD, HEAD_DIM), (1, 0, 2))
            # scores: scale already folded into Q projection weights.
            s = jnp.einsum('nqd,nkd->nqk', q, k,
                           preferred_element_type=jnp.float32)                 # (NH, S, S)
            s = s + bias[b]                                    # (1, S) broadcast over keys
            s = s - jnp.max(s, axis=-1, keepdims=True)
            p = jnp.exp(s)
            p = p * pl.reciprocal(jnp.sum(p, axis=-1, keepdims=True), approx=True)
            o = jnp.einsum('nqk,nkd->nqd', p, v,
                           preferred_element_type=jnp.float32)                 # (NH, S, HD)
            attn_rows.append(jnp.transpose(o, (1, 0, 2)).reshape(S, H))        # (S, H)
        attn = jnp.concatenate(attn_rows, axis=0)              # (T, H)

        # ---- output projection ----
        attn = jnp.dot(attn, w_out_ref[layer],
                       preferred_element_type=jnp.float32) + b_out_ref[layer]

        # ---- AddNorm 1 ----
        y = _layernorm(x + attn, g1_ref[layer], be1_ref[layer])

        # ---- FFN ----
        h1 = jnp.dot(y, w1_ref[layer],
                     preferred_element_type=jnp.float32) + b1_ref[layer]
        h1 = jnp.maximum(h1, 0.0)
        h2 = jnp.dot(h1, w2_ref[layer],
                     preferred_element_type=jnp.float32) + b2_ref[layer]

        # ---- AddNorm 2 ----
        x = _layernorm(y + h2, g2_ref[layer], be2_ref[layer])

    # single store of the final activation
    o_ref[...] = x.reshape(B, S, H).astype(o_ref.dtype)


def prepare_params(all_params):
    """Stack per-layer PyTorch-layout params into layer-major, pre-transposed tensors.

    Also folds the 1/sqrt(head_dim) softmax scale into the Q projection (first HIDDEN
    output columns of the fused in-proj) so the kernel needs no per-step scale multiply.
    """
    scale = 1.0 / (HEAD_DIM ** 0.5)
    qkv_col_scale = jnp.concatenate([
        jnp.full((HIDDEN,), scale, jnp.float32),
        jnp.ones((2 * HIDDEN,), jnp.float32),
    ])[None, :]                                                # (1, 3H)

    def stack(fn):
        return jnp.stack([fn(p) for p in all_params], axis=0)

    return (
        stack(lambda p: p["w_in"].T * qkv_col_scale),          # (L, H, 3H)
        stack(lambda p: p["b_in"] * qkv_col_scale),            # (L, 1, 3H)
        stack(lambda p: p["w_out"].T),                         # (L, H, H)
        stack(lambda p: p["b_out"]),                           # (L, 1, H)
        stack(lambda p: p["g1"]),                              # (L, 1, H)
        stack(lambda p: p["be1"]),                             # (L, 1, H)
        stack(lambda p: p["w1"].T),                            # (L, H, FFN)
        stack(lambda p: p["b1"]),                              # (L, 1, FFN)
        stack(lambda p: p["w2"].T),                            # (L, FFN, H)
        stack(lambda p: p["b2"]),                              # (L, 1, H)
        stack(lambda p: p["g2"]),                              # (L, 1, H)
        stack(lambda p: p["be2"]),                             # (L, 1, H)
    )


@jax.jit
def bert_encoder(x, mask_bool, stacked_params):
    """x: (B, S, H) f32; mask_bool: (B, S) bool (True = padded key)."""
    bias = jnp.where(mask_bool, jnp.float32(-1e30), jnp.float32(0.0))[:, None, :]  # (B,1,S)
    return pl.pallas_call(
        bert_encoder_kernel,
        out_shape=jax.ShapeDtypeStruct(x.shape, x.dtype),
        # No grid / BlockSpecs: every operand is tiny and lives fully in VMEM,
        # the whole multi-layer forward runs in one kernel invocation.
    )(x, bias, *stacked_params)


# ---------------- pure-JAX reference (for correctness check) ----------------
def _ref_block(x, mask_bool, p):
    B, S, H = x.shape
    qkv = jnp.einsum("bsh,oh->bso", x, p["w_in"]) + p["b_in"][0]        # (B,S,3H)
    q, k, v = jnp.split(qkv, 3, axis=-1)

    def heads(t):
        return t.reshape(B, S, NUM_HEAD, HEAD_DIM).transpose(0, 2, 1, 3)

    q, k, v = heads(q), heads(k), heads(v)
    scores = jnp.einsum("bnqd,bnkd->bnqk", q, k) / (HEAD_DIM ** 0.5)
    bias = jnp.where(mask_bool, -1e30, 0.0)[:, None, None, :]
    scores = scores + bias
    pattn = jax.nn.softmax(scores, axis=-1)
    a = jnp.einsum("bnqk,bnkd->bnqd", pattn, v).transpose(0, 2, 1, 3).reshape(B, S, H)
    a = jnp.einsum("bsh,oh->bso", a, p["w_out"]) + p["b_out"][0]

    def ln(t, g, b):
        m = t.mean(-1, keepdims=True)
        vv = ((t - m) ** 2).mean(-1, keepdims=True)
        return (t - m) / jnp.sqrt(vv + LN_EPS) * g[0] + b[0]

    y = ln(x + a, p["g1"], p["be1"])
    h1 = jnp.maximum(jnp.einsum("bsh,fh->bsf", y, p["w1"]) + p["b1"][0], 0.0)
    h2 = jnp.einsum("bsf,hf->bsh", h1, p["w2"]) + p["b2"][0]
    return ln(y + h2, p["g2"], p["be2"])


def _ref_encoder(x, mask_bool, all_params):
    for p in all_params:
        x = _ref_block(x, mask_bool, p)
    return x


# ---------------- deterministic parameter init ----------------
def init_params(key, num_blocks):
    all_params = []
    for i in range(num_blocks):
        ks = jax.random.split(jax.random.fold_in(key, i), 6)
        p = {
            "w_in":  0.05 * jax.random.normal(ks[0], (3 * HIDDEN, HIDDEN), jnp.float32),
            "b_in":  0.01 * jax.random.normal(ks[1], (1, 3 * HIDDEN), jnp.float32),
            "w_out": 0.05 * jax.random.normal(ks[2], (HIDDEN, HIDDEN), jnp.float32),
            "b_out": 0.01 * jax.random.normal(ks[3], (1, HIDDEN), jnp.float32),
            "g1":    jnp.ones((1, HIDDEN), jnp.float32),
            "be1":   jnp.zeros((1, HIDDEN), jnp.float32),
            "w1":    0.05 * jax.random.normal(ks[4], (FFN_HIDDEN, HIDDEN), jnp.float32),
            "b1":    jnp.zeros((1, FFN_HIDDEN), jnp.float32),
            "w2":    0.05 * jax.random.normal(ks[5], (HIDDEN, FFN_HIDDEN), jnp.float32),
            "b2":    jnp.zeros((1, HIDDEN), jnp.float32),
            "g2":    jnp.ones((1, HIDDEN), jnp.float32),
            "be2":   jnp.zeros((1, HIDDEN), jnp.float32),
        }
        all_params.append(p)
    return all_params


if __name__ == "__main__":
    key = jax.random.PRNGKey(0)
    kx, kp = jax.random.split(key)

    x = jax.random.normal(kx, (BATCH, SEQ, HIDDEN), jnp.float32)
    # key_padding_mask: True = padded position (ignored as attention key).
    lengths = jnp.array([SEQ, SEQ - 2])
    mask_bool = jnp.arange(SEQ)[None, :] >= lengths[:, None]       # (B, S) bool

    params = init_params(kp, NUM_BLOCKS)
    stacked = prepare_params(params)

    out = bert_encoder(x, mask_bool, stacked)
    out = jax.block_until_ready(out)

    ref = _ref_encoder(x, mask_bool, params)
    assert out.shape == (BATCH, SEQ, HIDDEN)
    # tolerance slightly looser than pure-f32 because of the approx (EUP) reciprocal
    # used for the softmax denominator.
    assert jnp.allclose(out, ref, atol=2e-3, rtol=2e-3), "mismatch vs JAX reference"

    print("KERNEL_OK")
</pallas_src>

<mosaic_0001>
module attributes {stable_mosaic.version = 11 : i64} {
  func.func @bert_encoder_kernel(%arg0: memref<2x8x32xf32, #tpu.memory_space<vmem>>, %arg1: memref<2x1x8xf32, #tpu.memory_space<vmem>>, %arg2: memref<2x32x96xf32, #tpu.memory_space<vmem>>, %arg3: memref<2x1x96xf32, #tpu.memory_space<vmem>>, %arg4: memref<2x32x32xf32, #tpu.memory_space<vmem>>, %arg5: memref<2x1x32xf32, #tpu.memory_space<vmem>>, %arg6: memref<2x1x32xf32, #tpu.memory_space<vmem>>, %arg7: memref<2x1x32xf32, #tpu.memory_space<vmem>>, %arg8: memref<2x32x64xf32, #tpu.memory_space<vmem>>, %arg9: memref<2x1x64xf32, #tpu.memory_space<vmem>>, %arg10: memref<2x64x32xf32, #tpu.memory_space<vmem>>, %arg11: memref<2x1x32xf32, #tpu.memory_space<vmem>>, %arg12: memref<2x1x32xf32, #tpu.memory_space<vmem>>, %arg13: memref<2x1x32xf32, #tpu.memory_space<vmem>>, %arg14: memref<2x8x32xf32, #tpu.memory_space<vmem>>) attributes {dimension_semantics = [], scalar_prefetch = 0 : i64, scratch_operands = 0 : i64, tpu.core_type = #tpu.core_type<tc>} {
    %c0 = arith.constant 0 : index
    %c0_0 = arith.constant 0 : index
    %c0_1 = arith.constant 0 : index
    %0 = vector.load %arg0[%c0, %c0_0, %c0_1] : memref<2x8x32xf32, #tpu.memory_space<vmem>>, vector<2x8x32xf32>
    %1 = vector.shape_cast %0 : vector<2x8x32xf32> to vector<16x32xf32>
    %c0_2 = arith.constant 0 : index
    %c0_3 = arith.constant 0 : index
    %c0_4 = arith.constant 0 : index
    %2 = vector.load %arg1[%c0_2, %c0_3, %c0_4] : memref<2x1x8xf32, #tpu.memory_space<vmem>>, vector<2x1x8xf32>
    %c0_5 = arith.constant 0 : index
    %c0_6 = arith.constant 0 : index
    %c0_7 = arith.constant 0 : index
    %3 = vector.load %arg2[%c0_5, %c0_6, %c0_7] : memref<2x32x96xf32, #tpu.memory_space<vmem>>, vector<1x32x96xf32>
    %4 = vector.shape_cast %3 : vector<1x32x96xf32> to vector<32x96xf32>
    %cst = arith.constant dense<0.000000e+00> : vector<16x96xf32>
    %5 = tpu.matmul %1, %4, %cst {dimension_numbers = #tpu.dot_dimension_numbers<[1], [0], [0], [1], [0, 0, 1, 1], [], []>} : vector<16x32xf32>, vector<32x96xf32>, vector<16x96xf32> -> vector<16x96xf32>
    %c0_8 = arith.constant 0 : index
    %c0_9 = arith.constant 0 : index
    %c0_10 = arith.constant 0 : index
    %6 = vector.load %arg3[%c0_8, %c0_9, %c0_10] : memref<2x1x96xf32, #tpu.memory_space<vmem>>, vector<1x1x96xf32>
    %7 = vector.shape_cast %6 : vector<1x1x96xf32> to vector<1x96xf32>
    %8 = vector.broadcast %7 : vector<1x96xf32> to vector<16x96xf32>
    %9 = arith.addf %5, %8 : vector<16x96xf32>
    %10 = vector.extract_strided_slice %9 {offsets = [0, 0], sizes = [8, 96], strides = [1, 1]} : vector<16x96xf32> to vector<8x96xf32>
    %11 = vector.extract_strided_slice %10 {offsets = [0, 0], sizes = [8, 32], strides = [1, 1]} : vector<8x96xf32> to vector<8x32xf32>
    %12 = vector.shape_cast %11 : vector<8x32xf32> to vector<8x4x8xf32>
    %13 = tpu.transpose %12, [1, 0, 2] : vector<8x4x8xf32> -> vector<4x8x8xf32>
    %14 = vector.extract_strided_slice %10 {offsets = [0, 32], sizes = [8, 32], strides = [1, 1]} : vector<8x96xf32> to vector<8x32xf32>
    %15 = vector.shape_cast %14 : vector<8x32xf32> to vector<8x4x8xf32>
    %16 = tpu.transpose %15, [1, 0, 2] : vector<8x4x8xf32> -> vector<4x8x8xf32>
    %17 = vector.extract_strided_slice %10 {offsets = [0, 64], sizes = [8, 32], strides = [1, 1]} : vector<8x96xf32> to vector<8x32xf32>
    %18 = vector.shape_cast %17 : vector<8x32xf32> to vector<8x4x8xf32>
    %19 = tpu.transpose %18, [1, 0, 2] : vector<8x4x8xf32> -> vector<4x8x8xf32>
    "tpu.trace_start"() <{level = 10 : i32, message = "nqd,nkd->nqk"}> : () -> ()
    %cst_11 = arith.constant dense<0.000000e+00> : vector<4x8x8xf32>
    %20 = tpu.matmul %13, %16, %cst_11 {dimension_numbers = #tpu.dot_dimension_numbers<[2], [2], [1], [1], [0, 0, 0, 1, 1, 1], [0], [0]>} : vector<4x8x8xf32>, vector<4x8x8xf32>, vector<4x8x8xf32> -> vector<4x8x8xf32>
    "tpu.trace_stop"() : () -> ()
    %21 = vector.extract_strided_slice %2 {offsets = [0, 0, 0], sizes = [1, 1, 8], strides = [1, 1, 1]} : vector<2x1x8xf32> to vector<1x1x8xf32>
    %22 = vector.shape_cast %21 : vector<1x1x8xf32> to vector<1x8xf32>
    %23 = vector.shape_cast %22 : vector<1x8xf32> to vector<1x1x8xf32>
    %24 = vector.broadcast %23 : vector<1x1x8xf32> to vector<4x8x8xf32>
    %25 = arith.addf %20, %24 : vector<4x8x8xf32>
    %cst_12 = arith.constant dense<0xFF800000> : vector<4x8xf32>
    %26 = vector.multi_reduction <maximumf>, %25, %cst_12 [2] : vector<4x8x8xf32> to vector<4x8xf32>
    %27 = vector.shape_cast %26 : vector<4x8xf32> to vector<4x8x1xf32>
    %28 = vector.broadcast %27 : vector<4x8x1xf32> to vector<4x8x8xf32>
    %29 = arith.subf %25, %28 : vector<4x8x8xf32>
    %30 = math.exp %29 : vector<4x8x8xf32>
    %cst_13 = arith.constant dense<0.000000e+00> : vector<4x8xf32>
    %31 = vector.multi_reduction <add>, %30, %cst_13 [2] : vector<4x8x8xf32> to vector<4x8xf32>
    %32 = vector.shape_cast %31 : vector<4x8xf32> to vector<4x8x1xf32>
    %33 = tpu.reciprocal %32 {approx = true} : vector<4x8x1xf32> -> vector<4x8x1xf32>
    %34 = vector.broadcast %33 : vector<4x8x1xf32> to vector<4x8x8xf32>
    %35 = arith.mulf %30, %34 : vector<4x8x8xf32>
    "tpu.trace_start"() <{level = 10 : i32, message = "nqk,nkd->nqd"}> : () -> ()
    %cst_14 = arith.constant dense<0.000000e+00> : vector<4x8x8xf32>
    %36 = tpu.matmul %35, %19, %cst_14 {dimension_numbers = #tpu.dot_dimension_numbers<[2], [1], [1], [2], [0, 0, 0, 1, 1, 2], [0], [0]>} : vector<4x8x8xf32>, vector<4x8x8xf32>, vector<4x8x8xf32> -> vector<4x8x8xf32>
    "tpu.trace_stop"() : () -> ()
    %37 = tpu.transpose %36, [1, 0, 2] : vector<4x8x8xf32> -> vector<8x4x8xf32>
    %38 = vector.shape_cast %37 : vector<8x4x8xf32> to vector<8x32xf32>
    %39 = vector.extract_strided_slice %9 {offsets = [8, 0], sizes = [8, 96], strides = [1, 1]} : vector<16x96xf32> to vector<8x96xf32>
    %40 = vector.extract_strided_slice %39 {offsets = [0, 0], sizes = [8, 32], strides = [1, 1]} : vector<8x96xf32> to vector<8x32xf32>
    %41 = vector.shape_cast %40 : vector<8x32xf32> to vector<8x4x8xf32>
    %42 = tpu.transpose %41, [1, 0, 2] : vector<8x4x8xf32> -> vector<4x8x8xf32>
    %43 = vector.extract_strided_slice %39 {offsets = [0, 32], sizes = [8, 32], strides = [1, 1]} : vector<8x96xf32> to vector<8x32xf32>
    %44 = vector.shape_cast %43 : vector<8x32xf32> to vector<8x4x8xf32>
    %45 = tpu.transpose %44, [1, 0, 2] : vector<8x4x8xf32> -> vector<4x8x8xf32>
    %46 = vector.extract_strided_slice %39 {offsets = [0, 64], sizes = [8, 32], strides = [1, 1]} : vector<8x96xf32> to vector<8x32xf32>
    %47 = vector.shape_cast %46 : vector<8x32xf32> to vector<8x4x8xf32>
    %48 = tpu.transpose %47, [1, 0, 2] : vector<8x4x8xf32> -> vector<4x8x8xf32>
    "tpu.trace_start"() <{level = 10 : i32, message = "nqd,nkd->nqk"}> : () -> ()
    %cst_15 = arith.constant dense<0.000000e+00> : vector<4x8x8xf32>
    %49 = tpu.matmul %42, %45, %cst_15 {dimension_numbers = #tpu.dot_dimension_numbers<[2], [2], [1], [1], [0, 0, 0, 1, 1, 1], [0], [0]>} : vector<4x8x8xf32>, vector<4x8x8xf32>, vector<4x8x8xf32> -> vector<4x8x8xf32>
    "tpu.trace_stop"() : () -> ()
    %50 = vector.extract_strided_slice %2 {offsets = [1, 0, 0], sizes = [1, 1, 8], strides = [1, 1, 1]} : vector<2x1x8xf32> to vector<1x1x8xf32>
    %51 = vector.shape_cast %50 : vector<1x1x8xf32> to vector<1x8xf32>
    %52 = vector.shape_cast %51 : vector<1x8xf32> to vector<1x1x8xf32>
    %53 = vector.broadcast %52 : vector<1x1x8xf32> to vector<4x8x8xf32>
    %54 = arith.addf %49, %53 : vector<4x8x8xf32>
    %cst_16 = arith.constant dense<0xFF800000> : vector<4x8xf32>
    %55 = vector.multi_reduction <maximumf>, %54, %cst_16 [2] : vector<4x8x8xf32> to vector<4x8xf32>
    %56 = vector.shape_cast %55 : vector<4x8xf32> to vector<4x8x1xf32>
    %57 = vector.broadcast %56 : vector<4x8x1xf32> to vector<4x8x8xf32>
    %58 = arith.subf %54, %57 : vector<4x8x8xf32>
    %59 = math.exp %58 : vector<4x8x8xf32>
    %cst_17 = arith.constant dense<0.000000e+00> : vector<4x8xf32>
    %60 = vector.multi_reduction <add>, %59, %cst_17 [2] : vector<4x8x8xf32> to vector<4x8xf32>
    %61 = vector.shape_cast %60 : vector<4x8xf32> to vector<4x8x1xf32>
    %62 = tpu.reciprocal %61 {approx = true} : vector<4x8x1xf32> -> vector<4x8x1xf32>
    %63 = vector.broadcast %62 : vector<4x8x1xf32> to vector<4x8x8xf32>
    %64 = arith.mulf %59, %63 : vector<4x8x8xf32>
    "tpu.trace_start"() <{level = 10 : i32, message = "nqk,nkd->nqd"}> : () -> ()
    %cst_18 = arith.constant dense<0.000000e+00> : vector<4x8x8xf32>
    %65 = tpu.matmul %64, %48, %cst_18 {dimension_numbers = #tpu.dot_dimension_numbers<[2], [1], [1], [2], [0, 0, 0, 1, 1, 2], [0], [0]>} : vector<4x8x8xf32>, vector<4x8x8xf32>, vector<4x8x8xf32> -> vector<4x8x8xf32>
    "tpu.trace_stop"() : () -> ()
    %66 = tpu.transpose %65, [1, 0, 2] : vector<4x8x8xf32> -> vector<8x4x8xf32>
    %67 = vector.shape_cast %66 : vector<8x4x8xf32> to vector<8x32xf32>
    %68 = tpu.concatenate %38, %67 in 0 : vector<8x32xf32>, vector<8x32xf32> -> vector<16x32xf32>
    %c0_19 = arith.constant 0 : index
    %c0_20 = arith.constant 0 : index
    %c0_21 = arith.constant 0 : index
    %69 = vector.load %arg4[%c0_19, %c0_20, %c0_21] : memref<2x32x32xf32, #tpu.memory_space<vmem>>, vector<1x32x32xf32>
    %70 = vector.shape_cast %69 : vector<1x32x32xf32> to vector<32x32xf32>
    %cst_22 = arith.constant dense<0.000000e+00> : vector<16x32xf32>
    %71 = tpu.matmul %68, %70, %cst_22 {dimension_numbers = #tpu.dot_dimension_numbers<[1], [0], [0], [1], [0, 0, 1, 1], [], []>} : vector<16x32xf32>, vector<32x32xf32>, vector<16x32xf32> -> vector<16x32xf32>
    %c0_23 = arith.constant 0 : index
    %c0_24 = arith.constant 0 : index
    %c0_25 = arith.constant 0 : index
    %72 = vector.load %arg5[%c0_23, %c0_24, %c0_25] : memref<2x1x32xf32, #tpu.memory_space<vmem>>, vector<1x1x32xf32>
    %73 = vector.shape_cast %72 : vector<1x1x32xf32> to vector<1x32xf32>
    %74 = vector.broadcast %73 : vector<1x32xf32> to vector<16x32xf32>
    %75 = arith.addf %71, %74 : vector<16x32xf32>
    %76 = arith.addf %1, %75 : vector<16x32xf32>
    %c0_26 = arith.constant 0 : index
    %c0_27 = arith.constant 0 : index
    %c0_28 = arith.constant 0 : index
    %77 = vector.load %arg6[%c0_26, %c0_27, %c0_28] : memref<2x1x32xf32, #tpu.memory_space<vmem>>, vector<1x1x32xf32>
    %78 = vector.shape_cast %77 : vector<1x1x32xf32> to vector<1x32xf32>
    %c0_29 = arith.constant 0 : index
    %c0_30 = arith.constant 0 : index
    %c0_31 = arith.constant 0 : index
    %79 = vector.load %arg7[%c0_29, %c0_30, %c0_31] : memref<2x1x32xf32, #tpu.memory_space<vmem>>, vector<1x1x32xf32>
    %80 = vector.shape_cast %79 : vector<1x1x32xf32> to vector<1x32xf32>
    %cst_32 = arith.constant dense<0.000000e+00> : vector<16xf32>
    %81 = vector.multi_reduction <add>, %76, %cst_32 [1] : vector<16x32xf32> to vector<16xf32>
    %82 = vector.shape_cast %81 : vector<16xf32> to vector<16x1xf32>
    %cst_33 = arith.constant 3.200000e+01 : f32
    %83 = vector.broadcast %cst_33 : f32 to vector<16x1xf32>
    %84 = arith.divf %82, %83 : vector<16x1xf32>
    %85 = vector.broadcast %84 : vector<16x1xf32> to vector<16x32xf32>
    %86 = arith.subf %76, %85 : vector<16x32xf32>
    %87 = arith.mulf %86, %86 : vector<16x32xf32>
    %cst_34 = arith.constant dense<0.000000e+00> : vector<16xf32>
    %88 = vector.multi_reduction <add>, %87, %cst_34 [1] : vector<16x32xf32> to vector<16xf32>
    %89 = vector.shape_cast %88 : vector<16xf32> to vector<16x1xf32>
    %cst_35 = arith.constant 3.200000e+01 : f32
    %90 = vector.broadcast %cst_35 : f32 to vector<16x1xf32>
    %91 = arith.divf %89, %90 : vector<16x1xf32>
    %92 = vector.broadcast %84 : vector<16x1xf32> to vector<16x32xf32>
    %93 = arith.subf %76, %92 : vector<16x32xf32>
    %cst_36 = arith.constant 9.99999974E-6 : f32
    %94 = vector.broadcast %cst_36 : f32 to vector<16x1xf32>
    %95 = arith.addf %91, %94 : vector<16x1xf32>
    %96 = math.rsqrt %95 : vector<16x1xf32>
    %97 = vector.broadcast %96 : vector<16x1xf32> to vector<16x32xf32>
    %98 = arith.mulf %93, %97 : vector<16x32xf32>
    %99 = vector.broadcast %78 : vector<1x32xf32> to vector<16x32xf32>
    %100 = arith.mulf %98, %99 : vector<16x32xf32>
    %101 = vector.broadcast %80 : vector<1x32xf32> to vector<16x32xf32>
    %102 = arith.addf %100, %101 : vector<16x32xf32>
    %c0_37 = arith.constant 0 : index
    %c0_38 = arith.constant 0 : index
    %c0_39 = arith.constant 0 : index
    %103 = vector.load %arg8[%c0_37, %c0_38, %c0_39] : memref<2x32x64xf32, #tpu.memory_space<vmem>>, vector<1x32x64xf32>
    %104 = vector.shape_cast %103 : vector<1x32x64xf32> to vector<32x64xf32>
    %cst_40 = arith.constant dense<0.000000e+00> : vector<16x64xf32>
    %105 = tpu.matmul %102, %104, %cst_40 {dimension_numbers = #tpu.dot_dimension_numbers<[1], [0], [0], [1], [0, 0, 1, 1], [], []>} : vector<16x32xf32>, vector<32x64xf32>, vector<16x64xf32> -> vector<16x64xf32>
    %c0_41 = arith.constant 0 : index
    %c0_42 = arith.constant 0 : index
    %c0_43 = arith.constant 0 : index
    %106 = vector.load %arg9[%c0_41, %c0_42, %c0_43] : memref<2x1x64xf32, #tpu.memory_space<vmem>>, vector<1x1x64xf32>
    %107 = vector.shape_cast %106 : vector<1x1x64xf32> to vector<1x64xf32>
    %108 = vector.broadcast %107 : vector<1x64xf32> to vector<16x64xf32>
    %109 = arith.addf %105, %108 : vector<16x64xf32>
    %cst_44 = arith.constant 0.000000e+00 : f32
    %110 = vector.broadcast %cst_44 : f32 to vector<16x64xf32>
    %111 = arith.maximumf %109, %110 : vector<16x64xf32>
    %c0_45 = arith.constant 0 : index
    %c0_46 = arith.constant 0 : index
    %c0_47 = arith.constant 0 : index
    %112 = vector.load %arg10[%c0_45, %c0_46, %c0_47] : memref<2x64x32xf32, #tpu.memory_space<vmem>>, vector<1x64x32xf32>
    %113 = vector.shape_cast %112 : vector<1x64x32xf32> to vector<64x32xf32>
    %cst_48 = arith.constant dense<0.000000e+00> : vector<16x32xf32>
    %114 = tpu.matmul %111, %113, %cst_48 {dimension_numbers = #tpu.dot_dimension_numbers<[1], [0], [0], [1], [0, 0, 1, 1], [], []>} : vector<16x64xf32>, vector<64x32xf32>, vector<16x32xf32> -> vector<16x32xf32>
    %c0_49 = arith.constant 0 : index
    %c0_50 = arith.constant 0 : index
    %c0_51 = arith.constant 0 : index
    %115 = vector.load %arg11[%c0_49, %c0_50, %c0_51] : memref<2x1x32xf32, #tpu.memory_space<vmem>>, vector<1x1x32xf32>
    %116 = vector.shape_cast %115 : vector<1x1x32xf32> to vector<1x32xf32>
    %117 = vector.broadcast %116 : vector<1x32xf32> to vector<16x32xf32>
    %118 = arith.addf %114, %117 : vector<16x32xf32>
    %119 = arith.addf %102, %118 : vector<16x32xf32>
    %c0_52 = arith.constant 0 : index
    %c0_53 = arith.constant 0 : index
    %c0_54 = arith.constant 0 : index
    %120 = vector.load %arg12[%c0_52, %c0_53, %c0_54] : memref<2x1x32xf32, #tpu.memory_space<vmem>>, vector<1x1x32xf32>
    %121 = vector.shape_cast %120 : vector<1x1x32xf32> to vector<1x32xf32>
    %c0_55 = arith.constant 0 : index
    %c0_56 = arith.constant 0 : index
    %c0_57 = arith.constant 0 : index
    %122 = vector.load %arg13[%c0_55, %c0_56, %c0_57] : memref<2x1x32xf32, #tpu.memory_space<vmem>>, vector<1x1x32xf32>
    %123 = vector.shape_cast %122 : vector<1x1x32xf32> to vector<1x32xf32>
    %cst_58 = arith.constant dense<0.000000e+00> : vector<16xf32>
    %124 = vector.multi_reduction <add>, %119, %cst_58 [1] : vector<16x32xf32> to vector<16xf32>
    %125 = vector.shape_cast %124 : vector<16xf32> to vector<16x1xf32>
    %cst_59 = arith.constant 3.200000e+01 : f32
    %126 = vector.broadcast %cst_59 : f32 to vector<16x1xf32>
    %127 = arith.divf %125, %126 : vector<16x1xf32>
    %128 = vector.broadcast %127 : vector<16x1xf32> to vector<16x32xf32>
    %129 = arith.subf %119, %128 : vector<16x32xf32>
    %130 = arith.mulf %129, %129 : vector<16x32xf32>
    %cst_60 = arith.constant dense<0.000000e+00> : vector<16xf32>
    %131 = vector.multi_reduction <add>, %130, %cst_60 [1] : vector<16x32xf32> to vector<16xf32>
    %132 = vector.shape_cast %131 : vector<16xf32> to vector<16x1xf32>
    %cst_61 = arith.constant 3.200000e+01 : f32
    %133 = vector.broadcast %cst_61 : f32 to vector<16x1xf32>
    %134 = arith.divf %132, %133 : vector<16x1xf32>
    %135 = vector.broadcast %127 : vector<16x1xf32> to vector<16x32xf32>
    %136 = arith.subf %119, %135 : vector<16x32xf32>
    %cst_62 = arith.constant 9.99999974E-6 : f32
    %137 = vector.broadcast %cst_62 : f32 to vector<16x1xf32>
    %138 = arith.addf %134, %137 : vector<16x1xf32>
    %139 = math.rsqrt %138 : vector<16x1xf32>
    %140 = vector.broadcast %139 : vector<16x1xf32> to vector<16x32xf32>
    %141 = arith.mulf %136, %140 : vector<16x32xf32>
    %142 = vector.broadcast %121 : vector<1x32xf32> to vector<16x32xf32>
    %143 = arith.mulf %141, %142 : vector<16x32xf32>
    %144 = vector.broadcast %123 : vector<1x32xf32> to vector<16x32xf32>
    %145 = arith.addf %143, %144 : vector<16x32xf32>
    %c1 = arith.constant 1 : index
    %c0_63 = arith.constant 0 : index
    %c0_64 = arith.constant 0 : index
    %146 = vector.load %arg2[%c1, %c0_63, %c0_64] : memref<2x32x96xf32, #tpu.memory_space<vmem>>, vector<1x32x96xf32>
    %147 = vector.shape_cast %146 : vector<1x32x96xf32> to vector<32x96xf32>
    %cst_65 = arith.constant dense<0.000000e+00> : vector<16x96xf32>
    %148 = tpu.matmul %145, %147, %cst_65 {dimension_numbers = #tpu.dot_dimension_numbers<[1], [0], [0], [1], [0, 0, 1, 1], [], []>} : vector<16x32xf32>, vector<32x96xf32>, vector<16x96xf32> -> vector<16x96xf32>
    %c1_66 = arith.constant 1 : index
    %c0_67 = arith.constant 0 : index
    %c0_68 = arith.constant 0 : index
    %149 = vector.load %arg3[%c1_66, %c0_67, %c0_68] : memref<2x1x96xf32, #tpu.memory_space<vmem>>, vector<1x1x96xf32>
    %150 = vector.shape_cast %149 : vector<1x1x96xf32> to vector<1x96xf32>
    %151 = vector.broadcast %150 : vector<1x96xf32> to vector<16x96xf32>
    %152 = arith.addf %148, %151 : vector<16x96xf32>
    %153 = vector.extract_strided_slice %152 {offsets = [0, 0], sizes = [8, 96], strides = [1, 1]} : vector<16x96xf32> to vector<8x96xf32>
    %154 = vector.extract_strided_slice %153 {offsets = [0, 0], sizes = [8, 32], strides = [1, 1]} : vector<8x96xf32> to vector<8x32xf32>
    %155 = vector.shape_cast %154 : vector<8x32xf32> to vector<8x4x8xf32>
    %156 = tpu.transpose %155, [1, 0, 2] : vector<8x4x8xf32> -> vector<4x8x8xf32>
    %157 = vector.extract_strided_slice %153 {offsets = [0, 32], sizes = [8, 32], strides = [1, 1]} : vector<8x96xf32> to vector<8x32xf32>
    %158 = vector.shape_cast %157 : vector<8x32xf32> to vector<8x4x8xf32>
    %159 = tpu.transpose %158, [1, 0, 2] : vector<8x4x8xf32> -> vector<4x8x8xf32>
    %160 = vector.extract_strided_slice %153 {offsets = [0, 64], sizes = [8, 32], strides = [1, 1]} : vector<8x96xf32> to vector<8x32xf32>
    %161 = vector.shape_cast %160 : vector<8x32xf32> to vector<8x4x8xf32>
    %162 = tpu.transpose %161, [1, 0, 2] : vector<8x4x8xf32> -> vector<4x8x8xf32>
    "tpu.trace_start"() <{level = 10 : i32, message = "nqd,nkd->nqk"}> : () -> ()
    %cst_69 = arith.constant dense<0.000000e+00> : vector<4x8x8xf32>
    %163 = tpu.matmul %156, %159, %cst_69 {dimension_numbers = #tpu.dot_dimension_numbers<[2], [2], [1], [1], [0, 0, 0, 1, 1, 1], [0], [0]>} : vector<4x8x8xf32>, vector<4x8x8xf32>, vector<4x8x8xf32> -> vector<4x8x8xf32>
    "tpu.trace_stop"() : () -> ()
    %164 = vector.extract_strided_slice %2 {offsets = [0, 0, 0], sizes = [1, 1, 8], strides = [1, 1, 1]} : vector<2x1x8xf32> to vector<1x1x8xf32>
    %165 = vector.shape_cast %164 : vector<1x1x8xf32> to vector<1x8xf32>
    %166 = vector.shape_cast %165 : vector<1x8xf32> to vector<1x1x8xf32>
    %167 = vector.broadcast %166 : vector<1x1x8xf32> to vector<4x8x8xf32>
    %168 = arith.addf %163, %167 : vector<4x8x8xf32>
    %cst_70 = arith.constant dense<0xFF800000> : vector<4x8xf32>
    %169 = vector.multi_reduction <maximumf>, %168, %cst_70 [2] : vector<4x8x8xf32> to vector<4x8xf32>
    %170 = vector.shape_cast %169 : vector<4x8xf32> to vector<4x8x1xf32>
    %171 = vector.broadcast %170 : vector<4x8x1xf32> to vector<4x8x8xf32>
    %172 = arith.subf %168, %171 : vector<4x8x8xf32>
    %173 = math.exp %172 : vector<4x8x8xf32>
    %cst_71 = arith.constant dense<0.000000e+00> : vector<4x8xf32>
    %174 = vector.multi_reduction <add>, %173, %cst_71 [2] : vector<4x8x8xf32> to vector<4x8xf32>
    %175 = vector.shape_cast %174 : vector<4x8xf32> to vector<4x8x1xf32>
    %176 = tpu.reciprocal %175 {approx = true} : vector<4x8x1xf32> -> vector<4x8x1xf32>
    %177 = vector.broadcast %176 : vector<4x8x1xf32> to vector<4x8x8xf32>
    %178 = arith.mulf %173, %177 : vector<4x8x8xf32>
    "tpu.trace_start"() <{level = 10 : i32, message = "nqk,nkd->nqd"}> : () -> ()
    %cst_72 = arith.constant dense<0.000000e+00> : vector<4x8x8xf32>
    %179 = tpu.matmul %178, %162, %cst_72 {dimension_numbers = #tpu.dot_dimension_numbers<[2], [1], [1], [2], [0, 0, 0, 1, 1, 2], [0], [0]>} : vector<4x8x8xf32>, vector<4x8x8xf32>, vector<4x8x8xf32> -> vector<4x8x8xf32>
    "tpu.trace_stop"() : () -> ()
    %180 = tpu.transpose %179, [1, 0, 2] : vector<4x8x8xf32> -> vector<8x4x8xf32>
    %181 = vector.shape_cast %180 : vector<8x4x8xf32> to vector<8x32xf32>
    %182 = vector.extract_strided_slice %152 {offsets = [8, 0], sizes = [8, 96], strides = [1, 1]} : vector<16x96xf32> to vector<8x96xf32>
    %183 = vector.extract_strided_slice %182 {offsets = [0, 0], sizes = [8, 32], strides = [1, 1]} : vector<8x96xf32> to vector<8x32xf32>
    %184 = vector.shape_cast %183 : vector<8x32xf32> to vector<8x4x8xf32>
    %185 = tpu.transpose %184, [1, 0, 2] : vector<8x4x8xf32> -> vector<4x8x8xf32>
    %186 = vector.extract_strided_slice %182 {offsets = [0, 32], sizes = [8, 32], strides = [1, 1]} : vector<8x96xf32> to vector<8x32xf32>
    %187 = vector.shape_cast %186 : vector<8x32xf32> to vector<8x4x8xf32>
    %188 = tpu.transpose %187, [1, 0, 2] : vector<8x4x8xf32> -> vector<4x8x8xf32>
    %189 = vector.extract_strided_slice %182 {offsets = [0, 64], sizes = [8, 32], strides = [1, 1]} : vector<8x96xf32> to vector<8x32xf32>
    %190 = vector.shape_cast %189 : vector<8x32xf32> to vector<8x4x8xf32>
    %191 = tpu.transpose %190, [1, 0, 2] : vector<8x4x8xf32> -> vector<4x8x8xf32>
    "tpu.trace_start"() <{level = 10 : i32, message = "nqd,nkd->nqk"}> : () -> ()
    %cst_73 = arith.constant dense<0.000000e+00> : vector<4x8x8xf32>
    %192 = tpu.matmul %185, %188, %cst_73 {dimension_numbers = #tpu.dot_dimension_numbers<[2], [2], [1], [1], [0, 0, 0, 1, 1, 1], [0], [0]>} : vector<4x8x8xf32>, vector<4x8x8xf32>, vector<4x8x8xf32> -> vector<4x8x8xf32>
    "tpu.trace_stop"() : () -> ()
    %193 = vector.extract_strided_slice %2 {offsets = [1, 0, 0], sizes = [1, 1, 8], strides = [1, 1, 1]} : vector<2x1x8xf32> to vector<1x1x8xf32>
    %194 = vector.shape_cast %193 : vector<1x1x8xf32> to vector<1x8xf32>
    %195 = vector.shape_cast %194 : vector<1x8xf32> to vector<1x1x8xf32>
    %196 = vector.broadcast %195 : vector<1x1x8xf32> to vector<4x8x8xf32>
    %197 = arith.addf %192, %196 : vector<4x8x8xf32>
    %cst_74 = arith.constant dense<0xFF800000> : vector<4x8xf32>
    %198 = vector.multi_reduction <maximumf>, %197, %cst_74 [2] : vector<4x8x8xf32> to vector<4x8xf32>
    %199 = vector.shape_cast %198 : vector<4x8xf32> to vector<4x8x1xf32>
    %200 = vector.broadcast %199 : vector<4x8x1xf32> to vector<4x8x8xf32>
    %201 = arith.subf %197, %200 : vector<4x8x8xf32>
    %202 = math.exp %201 : vector<4x8x8xf32>
    %cst_75 = arith.constant dense<0.000000e+00> : vector<4x8xf32>
    %203 = vector.multi_reduction <add>, %202, %cst_75 [2] : vector<4x8x8xf32> to vector<4x8xf32>
    %204 = vector.shape_cast %203 : vector<4x8xf32> to vector<4x8x1xf32>
    %205 = tpu.reciprocal %204 {approx = true} : vector<4x8x1xf32> -> vector<4x8x1xf32>
    %206 = vector.broadcast %205 : vector<4x8x1xf32> to vector<4x8x8xf32>
    %207 = arith.mulf %202, %206 : vector<4x8x8xf32>
    "tpu.trace_start"() <{level = 10 : i32, message = "nqk,nkd->nqd"}> : () -> ()
    %cst_76 = arith.constant dense<0.000000e+00> : vector<4x8x8xf32>
    %208 = tpu.matmul %207, %191, %cst_76 {dimension_numbers = #tpu.dot_dimension_numbers<[2], [1], [1], [2], [0, 0, 0, 1, 1, 2], [0], [0]>} : vector<4x8x8xf32>, vector<4x8x8xf32>, vector<4x8x8xf32> -> vector<4x8x8xf32>
    "tpu.trace_stop"() : () -> ()
    %209 = tpu.transpose %208, [1, 0, 2] : vector<4x8x8xf32> -> vector<8x4x8xf32>
    %210 = vector.shape_cast %209 : vector<8x4x8xf32> to vector<8x32xf32>
    %211 = tpu.concatenate %181, %210 in 0 : vector<8x32xf32>, vector<8x32xf32> -> vector<16x32xf32>
    %c1_77 = arith.constant 1 : index
    %c0_78 = arith.constant 0 : index
    %c0_79 = arith.constant 0 : index
    %212 = vector.load %arg4[%c1_77, %c0_78, %c0_79] : memref<2x32x32xf32, #tpu.memory_space<vmem>>, vector<1x32x32xf32>
    %213 = vector.shape_cast %212 : vector<1x32x32xf32> to vector<32x32xf32>
    %cst_80 = arith.constant dense<0.000000e+00> : vector<16x32xf32>
    %214 = tpu.matmul %211, %213, %cst_80 {dimension_numbers = #tpu.dot_dimension_numbers<[1], [0], [0], [1], [0, 0, 1, 1], [], []>} : vector<16x32xf32>, vector<32x32xf32>, vector<16x32xf32> -> vector<16x32xf32>
    %c1_81 = arith.constant 1 : index
    %c0_82 = arith.constant 0 : index
    %c0_83 = arith.constant 0 : index
    %215 = vector.load %arg5[%c1_81, %c0_82, %c0_83] : memref<2x1x32xf32, #tpu.memory_space<vmem>>, vector<1x1x32xf32>
    %216 = vector.shape_cast %215 : vector<1x1x32xf32> to vector<1x32xf32>
    %217 = vector.broadcast %216 : vector<1x32xf32> to vector<16x32xf32>
    %218 = arith.addf %214, %217 : vector<16x32xf32>
    %219 = arith.addf %145, %218 : vector<16x32xf32>
    %c1_84 = arith.constant 1 : index
    %c0_85 = arith.constant 0 : index
    %c0_86 = arith.constant 0 : index
    %220 = vector.load %arg6[%c1_84, %c0_85, %c0_86] : memref<2x1x32xf32, #tpu.memory_space<vmem>>, vector<1x1x32xf32>
    %221 = vector.shape_cast %220 : vector<1x1x32xf32> to vector<1x32xf32>
    %c1_87 = arith.constant 1 : index
    %c0_88 = arith.constant 0 : index
    %c0_89 = arith.constant 0 : index
    %222 = vector.load %arg7[%c1_87, %c0_88, %c0_89] : memref<2x1x32xf32, #tpu.memory_space<vmem>>, vector<1x1x32xf32>
    %223 = vector.shape_cast %222 : vector<1x1x32xf32> to vector<1x32xf32>
    %cst_90 = arith.constant dense<0.000000e+00> : vector<16xf32>
    %224 = vector.multi_reduction <add>, %219, %cst_90 [1] : vector<16x32xf32> to vector<16xf32>
    %225 = vector.shape_cast %224 : vector<16xf32> to vector<16x1xf32>
    %cst_91 = arith.constant 3.200000e+01 : f32
    %226 = vector.broadcast %cst_91 : f32 to vector<16x1xf32>
    %227 = arith.divf %225, %226 : vector<16x1xf32>
    %228 = vector.broadcast %227 : vector<16x1xf32> to vector<16x32xf32>
    %229 = arith.subf %219, %228 : vector<16x32xf32>
    %230 = arith.mulf %229, %229 : vector<16x32xf32>
    %cst_92 = arith.constant dense<0.000000e+00> : vector<16xf32>
    %231 = vector.multi_reduction <add>, %230, %cst_92 [1] : vector<16x32xf32> to vector<16xf32>
    %232 = vector.shape_cast %231 : vector<16xf32> to vector<16x1xf32>
    %cst_93 = arith.constant 3.200000e+01 : f32
    %233 = vector.broadcast %cst_93 : f32 to vector<16x1xf32>
    %234 = arith.divf %232, %233 : vector<16x1xf32>
    %235 = vector.broadcast %227 : vector<16x1xf32> to vector<16x32xf32>
    %236 = arith.subf %219, %235 : vector<16x32xf32>
    %cst_94 = arith.constant 9.99999974E-6 : f32
    %237 = vector.broadcast %cst_94 : f32 to vector<16x1xf32>
    %238 = arith.addf %234, %237 : vector<16x1xf32>
    %239 = math.rsqrt %238 : vector<16x1xf32>
    %240 = vector.broadcast %239 : vector<16x1xf32> to vector<16x32xf32>
    %241 = arith.mulf %236, %240 : vector<16x32xf32>
    %242 = vector.broadcast %221 : vector<1x32xf32> to vector<16x32xf32>
    %243 = arith.mulf %241, %242 : vector<16x32xf32>
    %244 = vector.broadcast %223 : vector<1x32xf32> to vector<16x32xf32>
    %245 = arith.addf %243, %244 : vector<16x32xf32>
    %c1_95 = arith.constant 1 : index
    %c0_96 = arith.constant 0 : index
    %c0_97 = arith.constant 0 : index
    %246 = vector.load %arg8[%c1_95, %c0_96, %c0_97] : memref<2x32x64xf32, #tpu.memory_space<vmem>>, vector<1x32x64xf32>
    %247 = vector.shape_cast %246 : vector<1x32x64xf32> to vector<32x64xf32>
    %cst_98 = arith.constant dense<0.000000e+00> : vector<16x64xf32>
    %248 = tpu.matmul %245, %247, %cst_98 {dimension_numbers = #tpu.dot_dimension_numbers<[1], [0], [0], [1], [0, 0, 1, 1], [], []>} : vector<16x32xf32>, vector<32x64xf32>, vector<16x64xf32> -> vector<16x64xf32>
    %c1_99 = arith.constant 1 : index
    %c0_100 = arith.constant 0 : index
    %c0_101 = arith.constant 0 : index
    %249 = vector.load %arg9[%c1_99, %c0_100, %c0_101] : memref<2x1x64xf32, #tpu.memory_space<vmem>>, vector<1x1x64xf32>
    %250 = vector.shape_cast %249 : vector<1x1x64xf32> to vector<1x64xf32>
    %251 = vector.broadcast %250 : vector<1x64xf32> to vector<16x64xf32>
    %252 = arith.addf %248, %251 : vector<16x64xf32>
    %cst_102 = arith.constant 0.000000e+00 : f32
    %253 = vector.broadcast %cst_102 : f32 to vector<16x64xf32>
    %254 = arith.maximumf %252, %253 : vector<16x64xf32>
    %c1_103 = arith.constant 1 : index
    %c0_104 = arith.constant 0 : index
    %c0_105 = arith.constant 0 : index
    %255 = vector.load %arg10[%c1_103, %c0_104, %c0_105] : memref<2x64x32xf32, #tpu.memory_space<vmem>>, vector<1x64x32xf32>
    %256 = vector.shape_cast %255 : vector<1x64x32xf32> to vector<64x32xf32>
    %cst_106 = arith.constant dense<0.000000e+00> : vector<16x32xf32>
    %257 = tpu.matmul %254, %256, %cst_106 {dimension_numbers = #tpu.dot_dimension_numbers<[1], [0], [0], [1], [0, 0, 1, 1], [], []>} : vector<16x64xf32>, vector<64x32xf32>, vector<16x32xf32> -> vector<16x32xf32>
    %c1_107 = arith.constant 1 : index
    %c0_108 = arith.constant 0 : index
    %c0_109 = arith.constant 0 : index
    %258 = vector.load %arg11[%c1_107, %c0_108, %c0_109] : memref<2x1x32xf32, #tpu.memory_space<vmem>>, vector<1x1x32xf32>
    %259 = vector.shape_cast %258 : vector<1x1x32xf32> to vector<1x32xf32>
    %260 = vector.broadcast %259 : vector<1x32xf32> to vector<16x32xf32>
    %261 = arith.addf %257, %260 : vector<16x32xf32>
    %262 = arith.addf %245, %261 : vector<16x32xf32>
    %c1_110 = arith.constant 1 : index
    %c0_111 = arith.constant 0 : index
    %c0_112 = arith.constant 0 : index
    %263 = vector.load %arg12[%c1_110, %c0_111, %c0_112] : memref<2x1x32xf32, #tpu.memory_space<vmem>>, vector<1x1x32xf32>
    %264 = vector.shape_cast %263 : vector<1x1x32xf32> to vector<1x32xf32>
    %c1_113 = arith.constant 1 : index
    %c0_114 = arith.constant 0 : index
    %c0_115 = arith.constant 0 : index
    %265 = vector.load %arg13[%c1_113, %c0_114, %c0_115] : memref<2x1x32xf32, #tpu.memory_space<vmem>>, vector<1x1x32xf32>
    %266 = vector.shape_cast %265 : vector<1x1x32xf32> to vector<1x32xf32>
    %cst_116 = arith.constant dense<0.000000e+00> : vector<16xf32>
    %267 = vector.multi_reduction <add>, %262, %cst_116 [1] : vector<16x32xf32> to vector<16xf32>
    %268 = vector.shape_cast %267 : vector<16xf32> to vector<16x1xf32>
    %cst_117 = arith.constant 3.200000e+01 : f32
    %269 = vector.broadcast %cst_117 : f32 to vector<16x1xf32>
    %270 = arith.divf %268, %269 : vector<16x1xf32>
    %271 = vector.broadcast %270 : vector<16x1xf32> to vector<16x32xf32>
    %272 = arith.subf %262, %271 : vector<16x32xf32>
    %273 = arith.mulf %272, %272 : vector<16x32xf32>
    %cst_118 = arith.constant dense<0.000000e+00> : vector<16xf32>
    %274 = vector.multi_reduction <add>, %273, %cst_118 [1] : vector<16x32xf32> to vector<16xf32>
    %275 = vector.shape_cast %274 : vector<16xf32> to vector<16x1xf32>
    %cst_119 = arith.constant 3.200000e+01 : f32
    %276 = vector.broadcast %cst_119 : f32 to vector<16x1xf32>
    %277 = arith.divf %275, %276 : vector<16x1xf32>
    %278 = vector.broadcast %270 : vector<16x1xf32> to vector<16x32xf32>
    %279 = arith.subf %262, %278 : vector<16x32xf32>
    %cst_120 = arith.constant 9.99999974E-6 : f32
    %280 = vector.broadcast %cst_120 : f32 to vector<16x1xf32>
    %281 = arith.addf %277, %280 : vector<16x1xf32>
    %282 = math.rsqrt %281 : vector<16x1xf32>
    %283 = vector.broadcast %282 : vector<16x1xf32> to vector<16x32xf32>
    %284 = arith.mulf %279, %283 : vector<16x32xf32>
    %285 = vector.broadcast %264 : vector<1x32xf32> to vector<16x32xf32>
    %286 = arith.mulf %284, %285 : vector<16x32xf32>
    %287 = vector.broadcast %266 : vector<1x32xf32> to vector<16x32xf32>
    %288 = arith.addf %286, %287 : vector<16x32xf32>
    %289 = vector.shape_cast %288 : vector<16x32xf32> to vector<2x8x32xf32>
    %c0_121 = arith.constant 0 : index
    %c0_122 = arith.constant 0 : index
    %c0_123 = arith.constant 0 : index
    %290 = vector.load %arg14[%c0_121, %c0_122, %c0_123] : memref<2x8x32xf32, #tpu.memory_space<vmem>>, vector<2x8x32xf32>
    tpu.vector_store %arg14[%c0_121, %c0_122, %c0_123], %289 {strides = array<i32>} : memref<2x8x32xf32, #tpu.memory_space<vmem>>, vector<2x8x32xf32>,
    return
  }
}

</mosaic_0001>

<bundles_post_ra>
// kernel: bert_encoder.1
= control target key start
LH: loop header
LB: loop body
LE: loop exit
PB: predicated region body
PF: predicated region fallthrough
CT: control target
= control target key end

     0   :  { %19 = vsyncpa [#allocation3], 0  ;;  %s5328_s0 = inlined_call_operand.hbm [shape: f32[2,8,32], index: 0, kind: input, shape index: {}]   ;;  %s5329_s1 = inlined_call_operand.vmem [shape: f32[2,1,8], index: 1, kind: input, shape index: {}]   ;;  %s5330_s2 = inlined_call_operand.vmem [shape: f32[2,32,96], index: 2, kind: input, shape index: {}]   ;;  %s5331_s3 = inlined_call_operand.vmem [shape: f32[2,1,96], index: 3, kind: input, shape index: {}]   ;;  %s5332_s4 = inlined_call_operand.vmem [shape: f32[2,32,32], index: 4, kind: input, shape index: {}]   ;;  %s5333_s5 = inlined_call_operand.vmem [shape: f32[2,1,32], index: 5, kind: input, shape index: {}]   ;;  %s5334_s6 = inlined_call_operand.vmem [shape: f32[2,1,32], index: 6, kind: input, shape index: {}]   ;;  %s5335_s7 = inlined_call_operand.vmem [shape: f32[2,1,32], index: 7, kind: input, shape index: {}]   ;;  %s5336_s8 = inlined_call_operand.vmem [shape: f32[2,32,64], index: 8, kind: input, shape index: {}]   ;;  %s5337_s9 = inlined_call_operand.vmem [shape: f32[2,1,64], index: 9, kind: input, shape index: {}]   ;;  %s5338_s10 = inlined_call_operand.vmem [shape: f32[2,64,32], index: 10, kind: input, shape index: {}]   ;;  %s5339_s11 = inlined_call_operand.vmem [shape: f32[2,1,32], index: 11, kind: input, shape index: {}]   ;;  %s5340_s12 = inlined_call_operand.vmem [shape: f32[2,1,32], index: 12, kind: input, shape index: {}]   ;;  %s5341_s13 = inlined_call_operand.hbm [shape: f32[2,1,32], index: 13, kind: input, shape index: {}]   ;;  %s5342_s14 = inlined_call_operand.hbm [shape: f32[2,8,32], index: 14, kind: output, shape index: {}]  }
   0x1   :  { %20 = vsyncpa [#allocation6], 0 }
   0x2   :  { %21 = vsyncpa [#allocation4], 0  ;;  %s26_s15 = sshll.u32 %s5328_s0, 4  ;;  %s3922_s16 = smov [#allocation2]   ;;  %s27_s15 = int_to_ptr.hbm [resolvable:$true] %s26_s15 }
   0x3   :  { %s28_s17 = sshll.u32 %s3922_s16, 4  ;;  %s63_s20 = sshll.u32 %s5341_s13, 4  ;;  %s29_s17 = int_to_ptr.vmem [resolvable:$true] %s28_s17  ;;  %s64_s20 = int_to_ptr.hbm [resolvable:$true] %s63_s20 }
   0x4   :  { %s5343_s21 = smov 128   ;;  %s3924_s22 = smov 8  }
   0x5   :  { %34 = dma.hbm_to_vmem [thread:$0]  %s27_s15, 256, %s29_s17, [#allocation3], %s5343_s21, %s5343_s21, %s3924_s22  }
   0x6   :  { %s3925_s23 = smov [#allocation5]   ;;  %s3926_s25 = smov 16  }
   0x7   :  { %s65_s24 = sshll.u32 %s3925_s23, 4  ;;  %s3927_s0 = smov 1   ;;  %s66_s24 = int_to_ptr.vmem [resolvable:$true] %s65_s24 }
   0x8   :  { %71 = dma.hbm_to_vmem [thread:$0]  %s64_s20, 32, %s66_s24, [#allocation6], %s3926_s25, %s3926_s25, %s3927_s0  }
   0x9   :  { %3916 = dma.done.wait [#allocation3], 256  }
   0xa   :  { %3917 = vsyncadd [#allocation3], 4294967040 }
   0xb   :  { %3918 = dma.done.wait [#allocation6], 32  }
   0xc   :  { %3919 = vsyncadd [#allocation6], 4294967264  ;;  %v87_v0 = vld [vmem:[%s5330_s2 + $0x18] sm:$0xff]  ;;  %v86_v1 = vld [vmem:[%s5330_s2 + $0x10] sm:$0xff]  ;;  %vm92_vm0 = vcmask 261120   ;;  %s3928_s19 = smov 96  }
   0xd   :  { %111 = vmatpush.msra.mxu0 %v87_v0  ;;  %v85_v2 = vld [vmem:[%s5330_s2 + $0x8] sm:$0xff]  ;;  %v84_v3 = vld [vmem:[%s5330_s2] sm:$0xff]  ;;  %s3929_s20 = smov 120   ;;  %s3930_s23 = smov 112   ;;  %v3933_v16 = vmov 1983009808  }
   0xe   :  { %v80_v4 = vld [vmem:[#allocation2] sm:$0xff]  ;;  %v81_v5 = vld [vmem:[#allocation2 + $0x8] sm:$0xff]  ;;  %s3931_s24 = smov 104   ;;  %s3932_s0 = smov 64   ;;  %v138_v17 = vunpack.c.l.s4 %v3933_v16  ;;  %vm133_vm1 = vcmask 1047556   ;;  %vm490_vm2 = vcmask 64512  }
   0xf   :  { %112 = vmatpush.msra.mxu0 %v86_v1  ;;  %v3740_v6 = vld [vmem:[%s5331_s3] ss:$0 sm:$0xff]  ;;  %v3934_v30 = vmov 1934713408   ;;  %s3935_s29 = smov 24   ;;  %vm854_vm3 = vcmask 130048  }
  0x10   :  { %v4060_v21 = vunpack.c.0.s8 %v138_v17  ;;  %v162_v31 = vunpack.c.l.s4 %v3934_v30  ;;  %vm856_vm4 = vcmask 195584   ;;  %vm1743_vm9 = vcmask 523264   ;;  %s3579_s13 = sshll.u32 %s5342_s14, 4  ;;  %s3580_s13 = int_to_ptr.hbm [resolvable:$true] %s3579_s13 }
  0x11   :  { %113 = vmatpush.msra.mxu0 %v85_v2 }
  0x12   :  { %v4070_v36 = vunpack.c.0.s8 %v162_v31 }
  0x13   :  { %114 = vmatpush.msra.mxu0 %v84_v3 }
  0x14   :  { %3593 = vmatmul.msk.f32.vlgmr.msra.gmra.mxu0 %vm92_vm0, %v80_v4 }
  0x1c   :  { %3594 = vmatmul.msk.f32.gmra.mxu0 %vm92_vm0, %v81_v5 }
  0x91   :  { %v116_v7 = vpop.f32.mrf.mxu0 }
  0x92   :  { %v117_v8 = vadd.f32 %v3740_v6, %v116_v7 }
  0x94   :  { %243 = vrot.lane.b32.xlu2 %v117_v8, %s3928_s19  ;;  %123 = vrot.lane.b32.xlu1 %v117_v8, %s3929_s20  ;;  %v135_v19 = vrot.slane %v117_v8, 4 }
  0x95   :  { %126 = vrot.lane.b32.xlu0 %v117_v8, %s3930_s23 }
  0x99   :  { %v119_v11 = vpop.f32.mrf.mxu0 }
  0x9a   :  { %v4047_v12 = vadd.f32 %v3740_v6, %v119_v11 }
  0x9d   :  { %129 = vrot.lane.b32.xlu0 %v117_v8, %s3931_s24 }
  0xee   :  { %v244_v27 = vpop.permute.xlu2 %243 }
  0xef   :  { %v257_v60 = vrot.slane %v244_v27, 4 }
 0x106   :  { %v124_v9 = vpop.permute.xlu1 %123 }
 0x107   :  { %v127_v10 = vpop.permute.xlu0 %126  ;;  %245 = vrot.lane.b32.xlu0 %v124_v9, %s3928_s19  ;;  %v147_v22 = vrot.slane %v124_v9, 4 }
 0x108   :  { %247 = vrot.lane.b32.xlu1 %v127_v10, %s3928_s19  ;;  %v3700_v14 = vpack.i.bf16 %v117_v8, %v127_v10  ;;  %v132_v18 = vrot.slane %v127_v10, 4  ;;  %v136_v24 = vsel %vm133_vm1, %v127_v10, %v135_v19 }
 0x109   :  { %v144_v29 = vperm.slane %v136_v24, %v4060_v21 }
 0x10a   :  { %v134_v23 = vsel %vm133_vm1, %v132_v18, %v117_v8 }
 0x10b   :  { %v140_v28 = vperm.slane %v134_v23, %v4060_v21  ;;  %v171_v35 = vrot.slane %v144_v29, 4 }
 0x10d   :  { %v159_v34 = vrot.slane %v140_v28, 4 }
 0x10f   :  { %v130_v13 = vpop.permute.xlu0 %129  ;;  %862 = vrot.lane.b32.xlu0 %v4047_v12, %s3930_s23 }
 0x110   :  { %249 = vrot.lane.b32.xlu2 %v130_v13, %s3928_s19  ;;  %v3705_v15 = vpack.i.bf16 %v124_v9, %v130_v13  ;;  %v145_v20 = vrot.slane %v130_v13, 4  ;;  %v148_v26 = vsel %vm133_vm1, %v130_v13, %v147_v22 }
 0x111   :  { %v156_v33 = vperm.slane %v148_v26, %v4060_v21 }
 0x112   :  { %v146_v25 = vsel %vm133_vm1, %v145_v20, %v124_v9 }
 0x113   :  { %v152_v32 = vperm.slane %v146_v25, %v4060_v21  ;;  %v169_v39 = vrot.slane %v156_v33, 4  ;;  %v172_v40 = vsel %vm133_vm1, %v156_v33, %v171_v35 }
 0x114   :  { %v180_v43 = vperm.slane %v172_v40, %v4070_v36 }
 0x115   :  { %v157_v37 = vrot.slane %v152_v32, 4  ;;  %v160_v38 = vsel %vm133_vm1, %v152_v32, %v159_v34  ;;  %v170_v45 = vsel %vm133_vm1, %v169_v39, %v144_v29 }
 0x116   :  { %v168_v42 = vperm.slane %v160_v38, %v4070_v36  ;;  %v176_v46 = vperm.slane %v170_v45, %v4070_v36  ;;  %v187_v47 = vrot.slane %v180_v43, 4 }
 0x117   :  { %3701 = vrot.lane.b32.xlu0 %v3700_v14, %s3932_s0  ;;  %v158_v44 = vsel %vm133_vm1, %v157_v37, %v140_v28 }
 0x118   :  { %859 = vrot.lane.b32.xlu2 %v4047_v12, %s3929_s20  ;;  %v164_v48 = vperm.slane %v158_v44, %v4070_v36  ;;  %v183_v49 = vrot.slane %v168_v42, 4  ;;  %v185_v51 = vrot.slane %v176_v46, 4  ;;  %v188_v52 = vsel %vm133_vm1, 0.0, %v187_v47 }
 0x119   :  { %v205_v55 = vrot.slane %v188_v52, 4  ;;  %v200_v9 = vsel %vm133_vm1, %v187_v47, %v176_v46 }
 0x11a   :  { %v181_v53 = vrot.slane %v164_v48, 4  ;;  %v184_v54 = vsel %vm133_vm1, 0.0, %v183_v49  ;;  %v186_v57 = vsel %vm133_vm1, 0.0, %v185_v51  ;;  %v189_v17 = vsel %vm133_vm1, %v183_v49, %v164_v48 }
 0x11b   :  { %v194_v56 = vrot.slane %v184_v54, 4  ;;  %v206_v3 = vsel %vm133_vm1, %v205_v55, %v186_v57  ;;  %v204_v23 = vperm.slane %v200_v9, %v4060_v21  ;;  %v193_v25 = vperm.slane %v189_v17, %v4060_v21 }
 0x11c   :  { %v182_v58 = vsel %vm133_vm1, 0.0, %v181_v53  ;;  %v210_v14 = vperm.slane %v206_v3, %v4060_v21 }
 0x11d   :  { %v195_v2 = vsel %vm133_vm1, %v194_v56, %v182_v58  ;;  %v225_v37 = vrot.slane %v204_v23, 4  ;;  %v213_v40 = vrot.slane %v193_v25, 4 }
 0x11e   :  { %v199_v13 = vperm.slane %v195_v2, %v4060_v21 }
 0x11f   :  { %v226_v49 = vsel %vm133_vm1, %v210_v14, %v225_v37 }
 0x120   :  { %865 = vrot.lane.b32.xlu2 %v4047_v12, %s3931_s24  ;;  %v211_v26 = vrot.slane %v199_v13, 4  ;;  %v214_v54 = vsel %vm133_vm1, %v199_v13, %v213_v40 }
 0x121   :  { %v4139_v3 = vperm.slane %v214_v54, %v4070_v36 }
 0x122   :  { %v212_v39 = vsel %vm133_vm1, %v211_v26, %v193_v25 }
 0x123   :  { %v4127_v53 = vperm.slane %v212_v39, %v4070_v36 }
 0x128   :  { %3706 = vrot.lane.b32.xlu2 %v3705_v15, %s3932_s0 }
 0x130   :  { %978 = vrot.lane.b32.xlu2 %v4047_v12, %s3928_s19 }
 0x16a   :  { %v250_v41 = vpop.permute.xlu2 %249 }
 0x16b   :  { %v267_v59 = vrot.slane %v250_v41, 4 }
 0x172   :  { %v4080_v50 = vpop.permute.xlu2 %859 }
 0x173   :  { %980 = vrot.lane.b32.xlu2 %v4080_v50, %s3928_s19 }
 0x179   :  { %v246_v61 = vpop.permute.xlu0 %245 }
 0x17a   :  { %v248_v62 = vpop.permute.xlu1 %247  ;;  %v268_v63 = vsel %vm133_vm1, %v267_v59, %v246_v61  ;;  %v269_v0 = vrot.slane %v246_v61, 4  ;;  %v4089_v1 = vpop.permute.xlu2 %865 }
 0x17b   :  { %v255_v4 = vrot.slane %v248_v62, 4  ;;  %v258_v5 = vsel %vm133_vm1, %v248_v62, %v257_v60  ;;  %v274_v6 = vperm.slane %v268_v63, %v4060_v21  ;;  %v4134_v62 = vperm.slane %v226_v49, %v4070_v36 }
 0x17c   :  { %v266_v7 = vperm.slane %v258_v5, %v4060_v21  ;;  %v270_v8 = vsel %vm133_vm1, %v250_v41, %v269_v0 }
 0x17d   :  { %v256_v10 = vsel %vm133_vm1, %v255_v4, %v244_v27  ;;  %v278_v11 = vperm.slane %v270_v8, %v4060_v21  ;;  %v279_v18 = vrot.slane %v274_v6, 4  ;;  %v223_v27 = vrot.slane %v210_v14, 4 }
 0x17e   :  { %v262_v15 = vperm.slane %v256_v10, %v4060_v21  ;;  %v293_v16 = vrot.slane %v266_v7, 4 }
 0x17f   :  { %v291_v19 = vrot.slane %v278_v11, 4  ;;  %v224_v41 = vsel %vm133_vm1, %v223_v27, %v204_v23 }
 0x180   :  { %v281_v20 = vrot.slane %v262_v15, 4  ;;  %v294_v22 = vsel %vm133_vm1, %v278_v11, %v293_v16  ;;  %v280_v31 = vsel %vm133_vm1, %v279_v18, %v262_v15  ;;  %v4122_v48 = vperm.slane %v224_v41, %v4070_v36 }
 0x181   :  { %v4106_v24 = vpop.permute.xlu0 %862  ;;  %v302_v29 = vperm.slane %v294_v22, %v4070_v36  ;;  %v292_v33 = vsel %vm133_vm1, %v291_v19, %v266_v7  ;;  %v286_v42 = vperm.slane %v280_v31, %v4070_v36  ;;  %v237_v7 = vrot.slane %v4127_v53, 4 }
 0x182   :  { %v282_v28 = vsel %vm133_vm1, %v274_v6, %v281_v20  ;;  %v3707_v30 = vpop.permute.xlu2 %3706  ;;  %982 = vrot.lane.b32.xlu2 %v4106_v24, %s3928_s19  ;;  %v298_v43 = vperm.slane %v292_v33, %v4070_v36  ;;  %v235_v2 = vrot.slane %v4122_v48, 4 }
 0x183   :  { %v290_v32 = vperm.slane %v282_v28, %v4070_v36  ;;  %v3709_v34 = vunpack.i.h.bf16 %v3707_v30  ;;  %v3708_v35 = vunpack.i.l.bf16 %v3707_v30  ;;  %v309_v44 = vrot.slane %v302_v29, 4 }
 0x184   :  { %v303_v55 = vrot.slane %v286_v42, 4  ;;  %v307_v56 = vrot.slane %v298_v43, 4 }
 0x185   :  { %v305_v38 = vrot.slane %v290_v32, 4  ;;  %v391_v45 = vrot.slane %v3709_v34, 4  ;;  %v389_v47 = vrot.slane %v3708_v35, 4  ;;  %v310_v57 = vsel %vm133_vm1, 0.0, %v309_v44 }
 0x186   :  { %v327_v4 = vrot.slane %v310_v57, 4  ;;  %v304_v8 = vsel %vm133_vm1, 0.0, %v303_v55  ;;  %v308_v10 = vsel %vm133_vm1, 0.0, %v307_v56  ;;  %v322_v16 = vsel %vm133_vm1, %v309_v44, %v298_v43 }
 0x187   :  { %v306_v46 = vsel %vm133_vm1, 0.0, %v305_v38  ;;  %v392_v51 = vsel %vm133_vm1, %v3708_v35, %v391_v45  ;;  %v390_v58 = vsel %vm133_vm1, %v389_v47, %v3709_v34  ;;  %v311_v6 = vsel %vm133_vm1, %v305_v38, %v286_v42 }
 0x188   :  { %v316_v59 = vrot.slane %v306_v46, 4  ;;  %v400_v60 = vperm.slane %v392_v51, %v4060_v21  ;;  %v396_v63 = vperm.slane %v390_v58, %v4060_v21  ;;  %v315_v11 = vperm.slane %v311_v6, %v4060_v21 }
 0x189   :  { %v3702_v52 = vpop.permute.xlu0 %3701  ;;  %v326_v23 = vperm.slane %v322_v16, %v4060_v21  ;;  %v328_v25 = vsel %vm133_vm1, %v327_v4, %v308_v10 }
 0x18a   :  { %v3704_v61 = vunpack.i.h.bf16 %v3702_v52  ;;  %v3703_v0 = vunpack.i.l.bf16 %v3702_v52  ;;  %v413_v13 = vrot.slane %v400_v60, 4  ;;  %v317_v15 = vsel %vm133_vm1, %v316_v59, %v304_v8 }
 0x18b   :  { %v401_v17 = vrot.slane %v396_v63, 4  ;;  %v321_v20 = vperm.slane %v317_v15, %v4060_v21  ;;  %v335_v26 = vrot.slane %v315_v11, 4  ;;  %v332_v29 = vperm.slane %v328_v25, %v4060_v21 }
 0x18c   :  { %v379_v5 = vrot.slane %v3704_v61, 4  ;;  %v377_v9 = vrot.slane %v3703_v0, 4  ;;  %v347_v54 = vrot.slane %v326_v23, 4 }
 0x18d   :  { %v333_v30 = vrot.slane %v321_v20, 4  ;;  %v336_v34 = vsel %vm133_vm1, %v321_v20, %v335_v26  ;;  %v345_v39 = vrot.slane %v332_v29, 4 }
 0x18e   :  { %v380_v14 = vsel %vm133_vm1, %v3703_v0, %v379_v5  ;;  %v378_v18 = vsel %vm133_vm1, %v377_v9, %v3704_v61  ;;  %v344_v47 = vperm.slane %v336_v34, %v4070_v36 }
 0x18f   :  { %v388_v19 = vperm.slane %v380_v14, %v4060_v21  ;;  %v384_v22 = vperm.slane %v378_v18, %v4060_v21  ;;  %v334_v38 = vsel %vm133_vm1, %v333_v30, %v315_v11  ;;  %v346_v46 = vsel %vm133_vm1, %v345_v39, %v326_v23 }
 0x190   :  { %v340_v43 = vperm.slane %v334_v38, %v4070_v36  ;;  %v352_v52 = vperm.slane %v346_v46, %v4070_v36  ;;  %v363_v56 = vrot.slane %v344_v47, 4  ;;  %v868_v46 = vrot.slane %v4106_v24, 4 }
 0x191   :  { %v414_v27 = vsel %vm133_vm1, %v413_v13, %v388_v19  ;;  %v415_v28 = vrot.slane %v388_v19, 4  ;;  %v402_v31 = vsel %vm133_vm1, %v401_v17, %v384_v22  ;;  %v403_v32 = vrot.slane %v384_v22, 4 }
 0x192   :  { %v420_v33 = vperm.slane %v414_v27, %v4070_v36  ;;  %v408_v35 = vperm.slane %v402_v31, %v4070_v36  ;;  %v359_v57 = vrot.slane %v340_v43, 4  ;;  %v357_v61 = vrot.slane %v352_v52, 4 }
 0x193   :  { %v416_v37 = vsel %vm133_vm1, %v400_v60, %v415_v28  ;;  %v404_v40 = vsel %vm133_vm1, %v396_v63, %v403_v32  ;;  %v348_v63 = vsel %vm133_vm1, %v332_v29, %v347_v54  ;;  %v238_v17 = vsel %vm133_vm1, %v4122_v48, %v237_v7 }
 0x194   :  { %v424_v41 = vperm.slane %v416_v37, %v4070_v36  ;;  %v429_v42 = vrot.slane %v420_v33, 4  ;;  %v412_v44 = vperm.slane %v404_v40, %v4070_v36  ;;  %v425_v45 = vrot.slane %v408_v35, 4 }
 0x195   :  { %v356_v5 = vperm.slane %v348_v63, %v4070_v36  ;;  %v360_v6 = vsel %vm133_vm1, %v352_v52, %v359_v57  ;;  %v358_v9 = vsel %vm133_vm1, %v357_v61, %v340_v43  ;;  %v236_v22 = vsel %vm133_vm1, %v235_v2, %v4127_v53 }
 0x196   :  { %v430_v49 = vsel %vm133_vm1, 0.0, %v429_v42  ;;  %v431_v51 = vrot.slane %v424_v41, 4  ;;  %v427_v55 = vrot.slane %v412_v44, 4  ;;  %v426_v58 = vsel %vm133_vm1, 0.0, %v425_v45  ;;  %3597 = vmatpush.xpose.msk.msra.mxu3 %vm490_vm2, %v360_v6  ;;  %3595 = vmatpush.xpose.msk.msra.mxu1 %vm490_vm2, %v358_v9 }
 0x197   :  { %v364_v13 = vsel %vm133_vm1, %v356_v5, %v363_v56  ;;  %v361_v14 = vrot.slane %v356_v5, 4  ;;  %v239_v53 = vrot.slane %v4134_v62, 4  ;;  %v241_v31 = vrot.slane %v4139_v3, 4 }
 0x198   :  { %v432_v59 = vsel %vm133_vm1, 0.0, %v431_v51  ;;  %v444_v60 = vsel %vm133_vm1, %v431_v51, %v420_v33  ;;  %v428_v0 = vsel %vm133_vm1, 0.0, %v427_v55  ;;  %v433_v10 = vsel %vm133_vm1, %v427_v55, %v408_v35 }
 0x199   :  { %v449_v4 = vrot.slane %v432_v59, 4  ;;  %v438_v8 = vrot.slane %v428_v0, 4  ;;  %v448_v11 = vperm.slane %v444_v60, %v4060_v21  ;;  %v437_v15 = vperm.slane %v433_v10, %v4060_v21  ;;  %3598 = vmatmul.msk.f32.vlgmr.msra.gmra.mxu3 %vm490_vm2, %v238_v17  ;;  %3596 = vmatmul.msk.f32.vlgmr.msra.gmra.mxu1 %vm490_vm2, %v236_v22 }
 0x19a   :  { %3601 = vmatpush.xpose.msk.msrb.mxu1 %vm490_vm2, %v364_v13  ;;  %v362_v23 = vsel %vm133_vm1, %v361_v14, %v344_v47  ;;  %v240_v40 = vsel %vm133_vm1, %v239_v53, %v4139_v3  ;;  %v242_v42 = vsel %vm133_vm1, %v4134_v62, %v241_v31  ;;  %v870_v3 = vrot.slane %v4047_v12, 4 }
 0x19b   :  { %v450_v16 = vsel %vm133_vm1, %v449_v4, %v430_v49  ;;  %v439_v18 = vsel %vm133_vm1, %v438_v8, %v426_v58  ;;  %v469_v20 = vrot.slane %v448_v11, 4  ;;  %v457_v26 = vrot.slane %v437_v15, 4  ;;  %3599 = vmatpush.xpose.msk.msrb.mxu3 %vm490_vm2, %v362_v23 }
 0x19c   :  { %v454_v19 = vperm.slane %v450_v16, %v4060_v21  ;;  %v443_v25 = vperm.slane %v439_v18, %v4060_v21  ;;  %v882_v47 = vrot.slane %v4080_v50, 4  ;;  %v871_v62 = vsel %vm133_vm1, %v4106_v24, %v870_v3 }
 0x19d   :  { %v880_v49 = vrot.slane %v4089_v1, 4  ;;  %v869_v51 = vsel %vm133_vm1, %v868_v46, %v4047_v12  ;;  %v879_v52 = vperm.slane %v871_v62, %v4060_v21 }
 0x19e   :  { %v470_v7 = vsel %vm133_vm1, %v454_v19, %v469_v20  ;;  %v467_v27 = vrot.slane %v454_v19, 4  ;;  %v458_v28 = vsel %vm133_vm1, %v443_v25, %v457_v26  ;;  %v455_v29 = vrot.slane %v443_v25, 4 }
 0x19f   :  { %v478_v48 = vperm.slane %v470_v7, %v4070_v36  ;;  %v466_v2 = vperm.slane %v458_v28, %v4070_v36  ;;  %v883_v54 = vsel %vm133_vm1, %v4089_v1, %v882_v47  ;;  %v875_v55 = vperm.slane %v869_v51, %v4060_v21  ;;  %v3741_v47 = vld [vmem:[%s5329_s1] ss:$0 sm:$0xff] }
 0x1a0   :  { %v468_v30 = vsel %vm133_vm1, %v467_v27, %v448_v11  ;;  %v456_v33 = vsel %vm133_vm1, %v455_v29, %v437_v15  ;;  %v881_v56 = vsel %vm133_vm1, %v880_v49, %v4080_v50  ;;  %v891_v57 = vperm.slane %v883_v54, %v4060_v21 }
 0x1a1   :  { %v483_v32 = vrot.slane %v478_v48, 4  ;;  %v474_v34 = vperm.slane %v468_v30, %v4070_v36  ;;  %v462_v35 = vperm.slane %v456_v33, %v4070_v36  ;;  %v485_v37 = vrot.slane %v466_v2, 4  ;;  %3600 = vmatmul.msk.f32.vlgmr.msrb.gmra.mxu3 %vm490_vm2, %v240_v40  ;;  %3602 = vmatmul.msk.f32.vlgmr.msrb.gmra.mxu1 %vm490_vm2, %v242_v42 }
 0x1a2   :  { %v906_v58 = vrot.slane %v879_v52, 4  ;;  %v887_v59 = vperm.slane %v881_v56, %v4060_v21  ;;  %v894_v60 = vrot.slane %v875_v55, 4  ;;  %v904_v61 = vrot.slane %v891_v57, 4 }
 0x1a3   :  { %v484_v38 = vsel %vm133_vm1, %v483_v32, %v466_v2  ;;  %v479_v39 = vrot.slane %v474_v34, 4  ;;  %v481_v41 = vrot.slane %v462_v35, 4  ;;  %v486_v45 = vsel %vm133_vm1, %v478_v48, %v485_v37 }
 0x1a4   :  { %703 = vmatpush.msra.mxu1 %v484_v38  ;;  %v907_v63 = vsel %vm133_vm1, %v891_v57, %v906_v58  ;;  %v895_v0 = vsel %vm133_vm1, %v887_v59, %v894_v60  ;;  %v892_v5 = vrot.slane %v887_v59, 4  ;;  %v905_v6 = vsel %vm133_vm1, %v904_v61, %v879_v52 }
 0x1a5   :  { %v480_v43 = vsel %vm133_vm1, %v479_v39, %v462_v35  ;;  %v482_v44 = vsel %vm133_vm1, %v474_v34, %v481_v41  ;;  %v915_v4 = vperm.slane %v907_v63, %v4070_v36  ;;  %v903_v8 = vperm.slane %v895_v0, %v4070_v36  ;;  %v979_v63 = vpop.permute.xlu2 %978 }
 0x1a6   :  { %657 = vmatpush.msra.mxu2 %v480_v43  ;;  %680 = vmatpush.msra.mxu3 %v482_v44  ;;  %v911_v9 = vperm.slane %v905_v6, %v4070_v36  ;;  %v893_v11 = vsel %vm133_vm1, %v892_v5, %v875_v55 }
 0x1a7   :  { %v922_v10 = vrot.slane %v915_v4, 4  ;;  %v918_v13 = vrot.slane %v903_v8, 4  ;;  %v899_v14 = vperm.slane %v893_v11, %v4070_v36 }
 0x1a8   :  { %726 = vmatpush.msrb.mxu2 %v486_v45  ;;  %v920_v15 = vrot.slane %v911_v9, 4 }
 0x1a9   :  { %v923_v16 = vsel %vm133_vm1, 0.0, %v922_v10  ;;  %v919_v17 = vsel %vm133_vm1, 0.0, %v918_v13  ;;  %v916_v19 = vrot.slane %v899_v14, 4  ;;  %v935_v27 = vsel %vm133_vm1, %v922_v10, %v911_v9 }
 0x1aa   :  { %v940_v18 = vrot.slane %v923_v16, 4  ;;  %v921_v20 = vsel %vm133_vm1, 0.0, %v920_v15  ;;  %v929_v22 = vrot.slane %v919_v17, 4  ;;  %v939_v48 = vperm.slane %v935_v27, %v4060_v21 }
 0x1ab   :  { %v917_v25 = vsel %vm133_vm1, 0.0, %v916_v19  ;;  %v924_v53 = vsel %vm133_vm1, %v918_v13, %v899_v14  ;;  %v992_v17 = vrot.slane %v979_v63, 4 }
 0x1ac   :  { %v941_v23 = vsel %vm133_vm1, %v940_v18, %v921_v20  ;;  %v930_v7 = vsel %vm133_vm1, %v929_v22, %v917_v25  ;;  %v928_v2 = vperm.slane %v924_v53, %v4060_v21  ;;  %v960_v32 = vrot.slane %v939_v48, 4 }
 0x1ad   :  { %v945_v26 = vperm.slane %v941_v23, %v4060_v21  ;;  %v934_v28 = vperm.slane %v930_v7, %v4060_v21 }
 0x1ae   :  { %v948_v35 = vrot.slane %v928_v2, 4 }
 0x1af   :  { %v958_v29 = vrot.slane %v945_v26, 4  ;;  %v946_v30 = vrot.slane %v934_v28, 4  ;;  %v961_v37 = vsel %vm133_vm1, %v945_v26, %v960_v32 }
 0x1b0   :  { %v969_v40 = vperm.slane %v961_v37, %v4070_v36  ;;  %v949_v41 = vsel %vm133_vm1, %v934_v28, %v948_v35 }
 0x1b1   :  { %v959_v31 = vsel %vm133_vm1, %v958_v29, %v939_v48  ;;  %v947_v34 = vsel %vm133_vm1, %v946_v30, %v928_v2  ;;  %v957_v43 = vperm.slane %v949_v41, %v4070_v36 }
 0x1b2   :  { %v4260_v33 = vperm.slane %v959_v31, %v4070_v36  ;;  %v4265_v38 = vperm.slane %v947_v34, %v4070_v36  ;;  %v974_v44 = vrot.slane %v969_v40, 4 }
 0x1b3   :  { %v976_v45 = vrot.slane %v957_v43, 4 }
 0x1b4   :  { %v970_v39 = vrot.slane %v4260_v33, 4  ;;  %v4276_v3 = vsel %vm133_vm1, %v974_v44, %v957_v43 }
 0x1b5   :  { %v4279_v46 = vsel %vm133_vm1, %v969_v40, %v976_v45 }
 0x1b6   :  { %v4272_v42 = vsel %vm133_vm1, %v970_v39, %v4265_v38 }
 0x1cd   :  { %v981_v0 = vpop.permute.xlu2 %980 }
 0x1ce   :  { %v1004_v7 = vrot.slane %v981_v0, 4 }
 0x1dc   :  { %v983_v4 = vpop.permute.xlu2 %982 }
 0x1dd   :  { %v990_v19 = vrot.slane %v983_v4, 4  ;;  %v993_v22 = vsel %vm133_vm1, %v983_v4, %v992_v17 }
 0x1de   :  { %v1001_v26 = vperm.slane %v993_v22, %v4060_v21 }
 0x1df   :  { %v991_v23 = vsel %vm133_vm1, %v990_v19, %v979_v63 }
 0x1e0   :  { %v997_v27 = vperm.slane %v991_v23, %v4060_v21  ;;  %v1028_v2 = vrot.slane %v1001_v26, 4 }
 0x1e2   :  { %v1016_v31 = vrot.slane %v997_v27, 4 }
 0x216   :  { %v514_v62 = vpop.f32.mrf.mxu1 }
 0x217   :  { %v515_v49 = vadd.f32 %v3741_v47, %v514_v62 }
 0x219   :  { %v595_v51 = vsel %vm490_vm2, %v515_v49, -inf }
 0x21a   :  { %596 = vmax.xlane.f32.xlu0 %v595_v51 }
 0x21c   :  { %v540_v52 = vpop.f32.mrf.mxu3 }
 0x21d   :  { %v541_v54 = vadd.f32 %v3741_v47, %v540_v52 }
 0x21e   :  { %v592_v55 = vpop.f32.mrf.mxu1 }
 0x21f   :  { %v598_v56 = vsel %vm490_vm2, %v541_v54, -inf  ;;  %v593_v57 = vadd.f32 %v3741_v47, %v592_v55 }
 0x220   :  { %599 = vmax.xlane.f32.xlu1 %v598_v56 }
 0x221   :  { %v604_v58 = vsel %vm490_vm2, %v593_v57, -inf }
 0x222   :  { %605 = vmax.xlane.f32.xlu2 %v604_v58 }
 0x224   :  { %v566_v59 = vpop.f32.mrf.mxu3 }
 0x225   :  { %v4289_v60 = vadd.f32 %v3741_v47, %v566_v59 }
 0x227   :  { %v601_v61 = vsel %vm490_vm2, %v4289_v60, -inf }
 0x239   :  { %984 = vrot.lane.b32.xlu1 %v4089_v1, %s3928_s19 }
 0x263   :  { %602 = vmax.xlane.f32.xlu1 %v601_v61 }
 0x28d   :  { %v597_v5 = vpop.xlane.xlu0 %596 }
 0x28e   :  { %v607_v9 = vsub.f32 %v515_v49, %v597_v5 }
 0x290   :  { %v611_v11 = vmul.f32 1.442695, %v607_v9 }
 0x293   :  { %v600_v6 = vpop.xlane.xlu1 %599 }
 0x294   :  { %v608_v8 = vsub.f32 %v541_v54, %v600_v6 }
 0x295   :  { %v606_v13 = vpop.xlane.xlu2 %605 }
 0x296   :  { %v613_v10 = vmul.f32 1.442695, %v608_v8  ;;  %v610_v15 = vsub.f32 %v593_v57, %v606_v13 }
 0x298   :  { %3758 = vpow2.f32 %v613_v10  ;;  %v617_v18 = vmul.f32 1.442695, %v610_v15 }
 0x299   :  { %3760 = vpow2.f32 %v611_v11 }
 0x29a   :  { %3762 = vpow2.f32 %v617_v18 }
 0x29e   :  { %v4293_v14 = vpop.eup %3758 }
 0x29f   :  { %v622_v16 = vsel %vm490_vm2, %v4293_v14, 0.0  ;;  %v4297_v20 = vpop.eup %3760 }
 0x2a0   :  { %623 = vadd.xlane.f32.xlu0 %v622_v16  ;;  %v619_v25 = vsel %vm490_vm2, %v4297_v20, 0.0  ;;  %v4305_v48 = vpop.eup %3762 }
 0x2a1   :  { %v628_v39 = vsel %vm490_vm2, %v4305_v48, 0.0 }
 0x2a8   :  { %620 = vadd.xlane.f32.xlu0 %v619_v25 }
 0x2ab   :  { %v985_v28 = vpop.permute.xlu1 %984 }
 0x2ac   :  { %v1002_v29 = vrot.slane %v985_v28, 4  ;;  %v1005_v53 = vsel %vm133_vm1, %v985_v28, %v1004_v7 }
 0x2ad   :  { %v1013_v30 = vperm.slane %v1005_v53, %v4060_v21 }
 0x2ae   :  { %v1003_v32 = vsel %vm133_vm1, %v1002_v29, %v981_v0 }
 0x2af   :  { %v1009_v34 = vperm.slane %v1003_v32, %v4060_v21  ;;  %v1026_v35 = vrot.slane %v1013_v30, 4  ;;  %v1029_v37 = vsel %vm133_vm1, %v1013_v30, %v1028_v2 }
 0x2b0   :  { %v1037_v40 = vperm.slane %v1029_v37, %v4070_v36  ;;  %629 = vadd.xlane.f32.xlu0 %v628_v39 }
 0x2b1   :  { %v1014_v41 = vrot.slane %v1009_v34, 4  ;;  %v1017_v43 = vsel %vm133_vm1, %v1009_v34, %v1016_v31  ;;  %v1027_v44 = vsel %vm133_vm1, %v1026_v35, %v1001_v26  ;;  %v972_v34 = vrot.slane %v4265_v38, 4 }
 0x2b2   :  { %v1025_v45 = vperm.slane %v1017_v43, %v4070_v36  ;;  %v1033_v47 = vperm.slane %v1027_v44, %v4070_v36  ;;  %v1044_v62 = vrot.slane %v1037_v40, 4  ;;  %v3710_v38 = vpack.i.bf16 %v4080_v50, %v4047_v12 }
 0x2b3   :  { %v1015_v49 = vsel %vm133_vm1, %v1014_v41, %v997_v27  ;;  %v973_v37 = vsel %vm133_vm1, %v4260_v33, %v972_v34 }
 0x2b4   :  { %v1021_v51 = vperm.slane %v1015_v49, %v4070_v36  ;;  %v1040_v52 = vrot.slane %v1025_v45, 4  ;;  %v1042_v54 = vrot.slane %v1033_v47, 4  ;;  %v1045_v55 = vsel %vm133_vm1, 0.0, %v1044_v62 }
 0x2b5   :  { %v1057_v56 = vsel %vm133_vm1, %v1044_v62, %v1033_v47  ;;  %v1062_v57 = vrot.slane %v1045_v55, 4 }
 0x2b6   :  { %v1038_v58 = vrot.slane %v1021_v51, 4  ;;  %v1041_v59 = vsel %vm133_vm1, 0.0, %v1040_v52  ;;  %v1043_v61 = vsel %vm133_vm1, 0.0, %v1042_v54  ;;  %v1046_v63 = vsel %vm133_vm1, %v1040_v52, %v1021_v51 }
 0x2b7   :  { %v1051_v0 = vrot.slane %v1041_v59, 4  ;;  %v1061_v4 = vperm.slane %v1057_v56, %v4060_v21  ;;  %v1063_v5 = vsel %vm133_vm1, %v1062_v57, %v1043_v61  ;;  %v1050_v6 = vperm.slane %v1046_v63, %v4060_v21 }
 0x2b8   :  { %v1039_v8 = vsel %vm133_vm1, 0.0, %v1038_v58  ;;  %v1067_v9 = vperm.slane %v1063_v5, %v4060_v21 }
 0x2b9   :  { %v1082_v10 = vrot.slane %v1061_v4, 4  ;;  %v1052_v11 = vsel %vm133_vm1, %v1051_v0, %v1039_v8  ;;  %v1070_v13 = vrot.slane %v1050_v6, 4 }
 0x2ba   :  { %v1056_v15 = vperm.slane %v1052_v11, %v4060_v21  ;;  %v1080_v16 = vrot.slane %v1067_v9, 4 }
 0x2bb   :  { %v1083_v17 = vsel %vm133_vm1, %v1067_v9, %v1082_v10 }
 0x2bc   :  { %v1071_v18 = vsel %vm133_vm1, %v1056_v15, %v1070_v13  ;;  %v1091_v19 = vperm.slane %v1083_v17, %v4070_v36  ;;  %v1068_v22 = vrot.slane %v1056_v15, 4  ;;  %v1081_v23 = vsel %vm133_vm1, %v1080_v16, %v1061_v4 }
 0x2bd   :  { %v1079_v25 = vperm.slane %v1071_v18, %v4070_v36  ;;  %v1087_v26 = vperm.slane %v1081_v23, %v4070_v36 }
 0x2be   :  { %v1096_v7 = vrot.slane %v1091_v19, 4  ;;  %v1069_v27 = vsel %vm133_vm1, %v1068_v22, %v1050_v6 }
 0x2bf   :  { %v1075_v28 = vperm.slane %v1069_v27, %v4070_v36  ;;  %v1092_v29 = vrot.slane %v1087_v26, 4  ;;  %v1098_v53 = vrot.slane %v1079_v25, 4 }
 0x2c0   :  { %v1097_v2 = vsel %vm133_vm1, %v1096_v7, %v1079_v25 }
 0x2c1   :  { %3611 = vmatpush.xpose.msk.msrb.mxu1 %vm490_vm2, %v1097_v2  ;;  %v1093_v30 = vsel %vm133_vm1, %v1092_v29, %v1075_v28  ;;  %v1094_v31 = vrot.slane %v1075_v28, 4  ;;  %v1099_v32 = vsel %vm133_vm1, %v1091_v19, %v1098_v53 }
 0x2c2   :  { %3607 = vmatpush.xpose.msk.msrb.mxu3 %vm490_vm2, %v1093_v30 }
 0x2c3   :  { %v1095_v35 = vsel %vm133_vm1, %v1087_v26, %v1094_v31 }
 0x2c4   :  { %3609 = vmatpush.xpose.msk.msrb.mxu0 %vm490_vm2, %v1095_v35 }
 0x2c7   :  { %3610 = vmatmul.msk.f32.vlgmr.msrb.gmra.mxu0 %vm490_vm2, %v973_v37 }
 0x2d6   :  { %v603_v39 = vpop.xlane.xlu1 %602 }
 0x2d7   :  { %v609_v40 = vsub.f32 %v4289_v60, %v603_v39 }
 0x2d9   :  { %v615_v41 = vmul.f32 1.442695, %v609_v40 }
 0x2db   :  { %3764 = vpow2.f32 %v615_v41 }
 0x2e1   :  { %v3765_v43 = vpop.eup %3764 }
 0x2e2   :  { %v625_v44 = vsel %vm490_vm2, %v3765_v43, 0.0 }
 0x2e3   :  { %626 = vadd.xlane.f32.xlu2 %v625_v44 }
 0x2fb   :  { %3711 = vrot.lane.b32.xlu2 %v3710_v38, %s3932_s0 }
 0x313   :  { %v624_v45 = vpop.xlane.xlu0 %623 }
 0x314   :  { %3766 = vrcp.f32 %v624_v45 }
 0x31a   :  { %v3767_v47 = vpop.eup %3766 }
 0x31b   :  { %v636_v33 = vmul.f32 %v3767_v47, %v4293_v14  ;;  %v621_v62 = vpop.xlane.xlu0 %620  ;;  %v3742_v14 = vld [vmem:[%s5329_s1 + $0x1] ss:$0 sm:$0xff] }
 0x31c   :  { %3768 = vrcp.f32 %v621_v62 }
 0x31d   :  { %3604 = vmatmul.msk.f32.vlgmr.msra.gmra.mxu3 %vm490_vm2, %v636_v33 }
 0x322   :  { %v3769_v60 = vpop.eup %3768 }
 0x323   :  { %v630_v49 = vpop.xlane.xlu0 %629  ;;  %v635_v51 = vmul.f32 %v3769_v60, %v4297_v20 }
 0x324   :  { %3770 = vrcp.f32 %v630_v49 }
 0x325   :  { %3603 = vmatmul.msk.f32.vlgmr.msra.gmra.mxu2 %vm490_vm2, %v635_v51  ;;  %3608 = vmatmul.msk.f32.vlgmr.msrb.gmra.mxu3 %vm490_vm2, %v4272_v42 }
 0x326   :  { %3613 = vmatpush.xpose.msk.msra.mxu2 %vm490_vm2, %v1099_v32 }
 0x32a   :  { %v3771_v12 = vpop.eup %3770 }
 0x32b   :  { %v638_v50 = vmul.f32 %v3771_v12, %v4305_v48 }
 0x32d   :  { %3606 = vmatmul.msk.f32.vlgmr.msrb.gmra.mxu2 %vm490_vm2, %v638_v50 }
 0x335   :  { %3614 = vmatmul.msk.f32.vlgmr.msra.gmra.mxu2 %vm490_vm2, %v4279_v46 }
 0x344   :  { %v1274_v20 = vpop.f32.mrf.mxu0 }
 0x345   :  { %v4371_v52 = vadd.f32 %v3742_v14, %v1274_v20 }
 0x347   :  { %v1332_v42 = vsel %vm490_vm2, %v4371_v52, -inf }
 0x348   :  { %1333 = vmax.xlane.f32.xlu2 %v1332_v42 }
 0x356   :  { %v627_v54 = vpop.xlane.xlu2 %626 }
 0x357   :  { %3772 = vrcp.f32 %v627_v54 }
 0x35d   :  { %v3773_v55 = vpop.eup %3772 }
 0x35e   :  { %v637_v48 = vmul.f32 %v3773_v55, %v3765_v43 }
 0x360   :  { %3605 = vmatmul.msk.f32.vlgmr.msra.gmra.mxu1 %vm490_vm2, %v637_v48 }
 0x368   :  { %3612 = vmatmul.msk.f32.vlgmr.msrb.gmra.mxu1 %vm490_vm2, %v4276_v3  ;;  %v3715_v3 = vpack.i.bf16 %v4089_v1, %v4106_v24 }
 0x3a0   :  { %v682_v46 = vpop.f32.mrf.mxu3 }
 0x3a1   :  { %v745_v5 = vrot.slane %v682_v46, 4 }
 0x3a8   :  { %v659_v56 = vpop.f32.mrf.mxu2  ;;  %v1248_v57 = vpop.f32.mrf.mxu3 }
 0x3a9   :  { %v4378_v58 = vadd.f32 %v3742_v14, %v1248_v57  ;;  %v733_v11 = vrot.slane %v659_v56, 4 }
 0x3ab   :  { %v1329_v59 = vsel %vm490_vm2, %v4378_v58, -inf }
 0x3ac   :  { %1330 = vmax.xlane.f32.xlu0 %v1329_v59 }
 0x3b0   :  { %v728_v61 = vpop.f32.mrf.mxu2 }
 0x3b1   :  { %v743_v6 = vrot.slane %v728_v61, 4  ;;  %v746_v8 = vsel %vm133_vm1, %v728_v61, %v745_v5 }
 0x3b2   :  { %v754_v10 = vperm.slane %v746_v8, %v4060_v21 }
 0x3b3   :  { %v744_v9 = vsel %vm133_vm1, %v743_v6, %v682_v46 }
 0x3b4   :  { %v750_v13 = vperm.slane %v744_v9, %v4060_v21  ;;  %v767_v18 = vrot.slane %v754_v10, 4 }
 0x3b6   :  { %v755_v19 = vrot.slane %v750_v13, 4 }
 0x3b8   :  { %v1326_v63 = vpop.f32.mrf.mxu2 }
 0x3b9   :  { %v4382_v0 = vadd.f32 %v3742_v14, %v1326_v63 }
 0x3bb   :  { %v1338_v4 = vsel %vm490_vm2, %v4382_v0, -inf }
 0x3bc   :  { %1339 = vmax.xlane.f32.xlu1 %v1338_v4 }
 0x3c0   :  { %3716 = vrot.lane.b32.xlu0 %v3715_v3, %s3932_s0 }
 0x3dd   :  { %v705_v15 = vpop.f32.mrf.mxu1 }
 0x3de   :  { %v731_v16 = vrot.slane %v705_v15, 4  ;;  %v734_v17 = vsel %vm133_vm1, %v705_v15, %v733_v11 }
 0x3df   :  { %v742_v1 = vperm.slane %v734_v17, %v4060_v21 }
 0x3e0   :  { %v732_v24 = vsel %vm133_vm1, %v731_v16, %v659_v56  ;;  %v3712_v16 = vpop.permute.xlu2 %3711 }
 0x3e1   :  { %v738_v22 = vperm.slane %v732_v24, %v4060_v21  ;;  %v768_v23 = vsel %vm133_vm1, %v767_v18, %v742_v1  ;;  %v769_v25 = vrot.slane %v742_v1, 4 }
 0x3e2   :  { %v774_v26 = vperm.slane %v768_v23, %v4070_v36  ;;  %v3714_v23 = vunpack.i.h.bf16 %v3712_v16 }
 0x3e3   :  { %v756_v7 = vsel %vm133_vm1, %v755_v19, %v738_v22  ;;  %v757_v27 = vrot.slane %v738_v22, 4  ;;  %v770_v28 = vsel %vm133_vm1, %v754_v10, %v769_v25  ;;  %v3713_v25 = vunpack.i.l.bf16 %v3712_v16 }
 0x3e4   :  { %v762_v29 = vperm.slane %v756_v7, %v4070_v36  ;;  %v778_v53 = vperm.slane %v770_v28, %v4070_v36  ;;  %v783_v32 = vrot.slane %v774_v26, 4  ;;  %v1126_v28 = vrot.slane %v3714_v23, 4 }
 0x3e5   :  { %v758_v2 = vsel %vm133_vm1, %v750_v13, %v757_v27  ;;  %v1300_v30 = vpop.f32.mrf.mxu1 }
 0x3e6   :  { %v766_v31 = vperm.slane %v758_v2, %v4070_v36  ;;  %v785_v34 = vrot.slane %v778_v53, 4  ;;  %v4405_v35 = vadd.f32 %v3742_v14, %v1300_v30  ;;  %v779_v37 = vrot.slane %v762_v29, 4 }
 0x3e7   :  { %v784_v47 = vsel %vm133_vm1, 0.0, %v783_v32  ;;  %v1114_v53 = vrot.slane %v3713_v25, 4 }
 0x3e8   :  { %v781_v39 = vrot.slane %v766_v31, 4  ;;  %v786_v40 = vsel %vm133_vm1, 0.0, %v785_v34  ;;  %v798_v41 = vsel %vm133_vm1, %v785_v34, %v774_v26  ;;  %v1335_v44 = vsel %vm490_vm2, %v4405_v35, -inf  ;;  %v1334_v1 = vpop.xlane.xlu2 %1333 }
 0x3e9   :  { %v803_v43 = vrot.slane %v786_v40, 4  ;;  %v802_v38 = vperm.slane %v798_v41, %v4060_v21  ;;  %1336 = vmax.xlane.f32.xlu1 %v1335_v44  ;;  %v780_v12 = vsel %vm133_vm1, 0.0, %v779_v37  ;;  %v1342_v19 = vsub.f32 %v4371_v52, %v1334_v1 }
 0x3ea   :  { %v782_v45 = vsel %vm133_vm1, 0.0, %v781_v39  ;;  %v787_v33 = vsel %vm133_vm1, %v781_v39, %v762_v29 }
 0x3eb   :  { %v792_v62 = vrot.slane %v782_v45, 4  ;;  %v791_v60 = vperm.slane %v787_v33, %v4060_v21  ;;  %v804_v49 = vsel %vm133_vm1, %v803_v43, %v784_v47  ;;  %v823_v51 = vrot.slane %v802_v38, 4 }
 0x3ec   :  { %v808_v50 = vperm.slane %v804_v49, %v4060_v21  ;;  %v1347_v26 = vmul.f32 1.442695, %v1342_v19 }
 0x3ed   :  { %v793_v14 = vsel %vm133_vm1, %v792_v62, %v780_v12  ;;  %v811_v20 = vrot.slane %v791_v60, 4 }
 0x3ee   :  { %v797_v42 = vperm.slane %v793_v14, %v4060_v21  ;;  %v821_v54 = vrot.slane %v808_v50, 4  ;;  %v824_v55 = vsel %vm133_vm1, %v808_v50, %v823_v51 }
 0x3ef   :  { %v832_v48 = vperm.slane %v824_v55, %v4070_v36 }
 0x3f0   :  { %v809_v46 = vrot.slane %v797_v42, 4  ;;  %v822_v56 = vsel %vm133_vm1, %v821_v54, %v802_v38  ;;  %v812_v57 = vsel %vm133_vm1, %v797_v42, %v811_v20 }
 0x3f1   :  { %v828_v59 = vperm.slane %v822_v56, %v4070_v36  ;;  %v820_v61 = vperm.slane %v812_v57, %v4070_v36  ;;  %v837_v63 = vrot.slane %v832_v48, 4 }
 0x3f2   :  { %v810_v4 = vsel %vm133_vm1, %v809_v46, %v791_v60 }
 0x3f3   :  { %v816_v3 = vperm.slane %v810_v4, %v4070_v36  ;;  %v833_v5 = vrot.slane %v828_v59, 4  ;;  %v838_v6 = vsel %vm133_vm1, %v837_v63, %v820_v61  ;;  %v839_v8 = vrot.slane %v820_v61, 4 }
 0x3f5   :  { %v835_v9 = vrot.slane %v816_v3, 4  ;;  %v840_v10 = vsel %vm133_vm1, %v832_v48, %v839_v8  ;;  %v4432_v11 = vsel %vm133_vm1, %v833_v5, %v816_v3 }
 0x3f7   :  { %v836_v13 = vsel %vm133_vm1, %v828_v59, %v835_v9 }
 0x402   :  { %842 = vrot.lane.b32.xlu1 %v836_v13, %s3924_s22 }
 0x40a   :  { %846 = vrot.lane.b32.xlu1 %v838_v6, %s3926_s25 }
 0x412   :  { %850 = vrot.lane.b32.xlu1 %v840_v10, %s3935_s29 }
 0x41f   :  { %v1331_v15 = vpop.xlane.xlu0 %1330 }
 0x420   :  { %v1341_v17 = vsub.f32 %v4378_v58, %v1331_v15 }
 0x422   :  { %v1345_v18 = vmul.f32 1.442695, %v1341_v17 }
 0x424   :  { %3774 = vpow2.f32 %v1345_v18 }
 0x425   :  { %3776 = vpow2.f32 %v1347_v26 }
 0x42a   :  { %v4439_v24 = vpop.eup %3774 }
 0x42b   :  { %v1353_v22 = vsel %vm490_vm2, %v4439_v24, 0.0  ;;  %v4453_v45 = vpop.eup %3776 }
 0x42c   :  { %1354 = vadd.xlane.f32.xlu0 %v1353_v22  ;;  %v1356_v42 = vsel %vm490_vm2, %v4453_v45, 0.0 }
 0x42f   :  { %v1340_v7 = vpop.xlane.xlu1 %1339 }
 0x430   :  { %v1344_v27 = vsub.f32 %v4382_v0, %v1340_v7 }
 0x432   :  { %v1351_v29 = vmul.f32 1.442695, %v1344_v27  ;;  %v3717_v58 = vpop.permute.xlu0 %3716 }
 0x433   :  { %v3719_v2 = vunpack.i.h.bf16 %v3717_v58  ;;  %v3718_v30 = vunpack.i.l.bf16 %v3717_v58 }
 0x434   :  { %3778 = vpow2.f32 %v1351_v29 }
 0x435   :  { %v1124_v31 = vrot.slane %v3719_v2, 4  ;;  %v1127_v52 = vsel %vm133_vm1, %v3719_v2, %v1126_v28  ;;  %v1112_v32 = vrot.slane %v3718_v30, 4  ;;  %v1115_v34 = vsel %vm133_vm1, %v3718_v30, %v1114_v53 }
 0x436   :  { %v1135_v37 = vperm.slane %v1127_v52, %v4060_v21  ;;  %v1123_v39 = vperm.slane %v1115_v34, %v4060_v21 }
 0x437   :  { %v1125_v0 = vsel %vm133_vm1, %v1124_v31, %v3714_v23  ;;  %v1113_v40 = vsel %vm133_vm1, %v1112_v32, %v3713_v25 }
 0x438   :  { %v1131_v41 = vperm.slane %v1125_v0, %v4060_v21  ;;  %v1148_v43 = vrot.slane %v1135_v37, 4  ;;  %v1119_v44 = vperm.slane %v1113_v40, %v4060_v21  ;;  %v1150_v38 = vrot.slane %v1123_v39, 4 }
 0x43a   :  { %v4455_v47 = vpop.eup %3778  ;;  %v1136_v33 = vrot.slane %v1131_v41, 4  ;;  %v1138_v62 = vrot.slane %v1119_v44, 4  ;;  %v1149_v60 = vsel %vm133_vm1, %v1148_v43, %v1123_v39  ;;  %v1151_v49 = vsel %vm133_vm1, %v1135_v37, %v1150_v38  ;;  %v1592_v38 = vld [vmem:[%s5332_s4 + $0x10] sm:$0xff] }
 0x43b   :  { %v1155_v51 = vperm.slane %v1149_v60, %v4070_v36  ;;  %v1159_v12 = vperm.slane %v1151_v49, %v4070_v36  ;;  %v1362_v50 = vsel %vm490_vm2, %v4455_v47, 0.0 }
 0x43c   :  { %v1137_v14 = vsel %vm133_vm1, %v1136_v33, %v1119_v44  ;;  %v1139_v20 = vsel %vm133_vm1, %v1131_v41, %v1138_v62  ;;  %1363 = vadd.xlane.f32.xlu0 %v1362_v50  ;;  %1357 = vadd.xlane.f32.xlu1 %v1356_v42  ;;  %v1593_v44 = vld [vmem:[%s5332_s4 + $0x18] sm:$0xff]  ;;  %v1591_v33 = vld [vmem:[%s5332_s4 + $0x8] sm:$0xff]  ;;  %v1590_v62 = vld [vmem:[%s5332_s4] sm:$0xff] }
 0x43d   :  { %v1143_v54 = vperm.slane %v1137_v14, %v4070_v36  ;;  %v1147_v55 = vperm.slane %v1139_v20, %v4070_v36  ;;  %v1164_v48 = vrot.slane %v1155_v51, 4  ;;  %v1166_v46 = vrot.slane %v1159_v12, 4 }
 0x43f   :  { %v1160_v56 = vrot.slane %v1143_v54, 4  ;;  %v1162_v57 = vrot.slane %v1147_v55, 4  ;;  %v1167_v59 = vsel %vm133_vm1, 0.0, %v1166_v46  ;;  %v1179_v61 = vsel %vm133_vm1, %v1166_v46, %v1155_v51 }
 0x440   :  { %v1184_v63 = vrot.slane %v1167_v59, 4  ;;  %v1165_v3 = vsel %vm133_vm1, 0.0, %v1164_v48  ;;  %v1183_v6 = vperm.slane %v1179_v61, %v4060_v21 }
 0x441   :  { %v1163_v4 = vsel %vm133_vm1, 0.0, %v1162_v57  ;;  %v1168_v5 = vsel %vm133_vm1, %v1162_v57, %v1143_v54  ;;  %v1161_v13 = vsel %vm133_vm1, 0.0, %v1160_v56 }
 0x442   :  { %v1173_v8 = vrot.slane %v1163_v4, 4  ;;  %v1172_v9 = vperm.slane %v1168_v5, %v4060_v21  ;;  %v1185_v10 = vsel %vm133_vm1, %v1184_v63, %v1165_v3  ;;  %v1204_v16 = vrot.slane %v1183_v6, 4  ;;  %v4522_v63 = vld [vmem:[%s5333_s5] ss:$0 sm:$0xff] }
 0x443   :  { %v1189_v15 = vperm.slane %v1185_v10, %v4060_v21 }
 0x444   :  { %v1174_v17 = vsel %vm133_vm1, %v1173_v8, %v1161_v13  ;;  %v1192_v18 = vrot.slane %v1172_v9, 4 }
 0x445   :  { %v1178_v1 = vperm.slane %v1174_v17, %v4060_v21  ;;  %v1205_v19 = vsel %vm133_vm1, %v1189_v15, %v1204_v16  ;;  %v1202_v22 = vrot.slane %v1189_v15, 4 }
 0x446   :  { %v1213_v23 = vperm.slane %v1205_v19, %v4070_v36 }
 0x447   :  { %v1193_v25 = vsel %vm133_vm1, %v1178_v1, %v1192_v18  ;;  %v1190_v26 = vrot.slane %v1178_v1, 4  ;;  %v1203_v7 = vsel %vm133_vm1, %v1202_v22, %v1183_v6 }
 0x448   :  { %v1201_v27 = vperm.slane %v1193_v25, %v4070_v36  ;;  %v1218_v28 = vrot.slane %v1213_v23, 4  ;;  %v1209_v29 = vperm.slane %v1203_v7, %v4070_v36 }
 0x449   :  { %v1191_v58 = vsel %vm133_vm1, %v1190_v26, %v1172_v9 }
 0x44a   :  { %v1219_v53 = vsel %vm133_vm1, %v1218_v28, %v1201_v27  ;;  %v1197_v2 = vperm.slane %v1191_v58, %v4070_v36  ;;  %v1214_v30 = vrot.slane %v1209_v29, 4  ;;  %v1220_v31 = vrot.slane %v1201_v27, 4 }
 0x44b   :  { %1437 = vmatpush.msra.mxu1 %v1219_v53 }
 0x44c   :  { %v1215_v52 = vsel %vm133_vm1, %v1214_v30, %v1197_v2  ;;  %v1221_v32 = vsel %vm133_vm1, %v1213_v23, %v1220_v31  ;;  %v1216_v34 = vrot.slane %v1197_v2, 4 }
 0x44d   :  { %1391 = vmatpush.msra.mxu3 %v1215_v52  ;;  %1460 = vmatpush.msrb.mxu2 %v1221_v32 }
 0x44e   :  { %v1217_v37 = vsel %vm133_vm1, %v1209_v29, %v1216_v34 }
 0x44f   :  { %1414 = vmatpush.msra.mxu0 %v1217_v37  ;;  %1616 = vmatpush.msrb.mxu3 %v1593_v44 }
 0x451   :  { %1617 = vmatpush.msrb.mxu3 %v1592_v38 }
 0x453   :  { %1618 = vmatpush.msrb.mxu3 %v1591_v33 }
 0x455   :  { %1619 = vmatpush.msrb.mxu3 %v1590_v62 }
 0x45c   :  { %v1337_v39 = vpop.xlane.xlu1 %1336 }
 0x45d   :  { %v1343_v0 = vsub.f32 %v4405_v35, %v1337_v39 }
 0x45f   :  { %v1349_v40 = vmul.f32 1.442695, %v1343_v0 }
 0x461   :  { %3780 = vpow2.f32 %v1349_v40 }
 0x467   :  { %v3781_v41 = vpop.eup %3780 }
 0x468   :  { %v1359_v43 = vsel %vm490_vm2, %v3781_v41, 0.0 }
 0x469   :  { %1360 = vadd.xlane.f32.xlu2 %v1359_v43 }
 0x474   :  { %v843_v35 = vpop.permute.xlu1 %842 }
 0x475   :  { %v853_v14 = vsel %vm490_vm2, %v4432_v11, %v843_v35 }
 0x47c   :  { %v847_v60 = vpop.permute.xlu1 %846 }
 0x47d   :  { %v855_v20 = vsel %vm854_vm3, %v853_v14, %v847_v60 }
 0x484   :  { %v851_v50 = vpop.permute.xlu1 %850 }
 0x485   :  { %v857_v54 = vsel %vm856_vm4, %v855_v20, %v851_v50 }
 0x49f   :  { %v1355_v49 = vpop.xlane.xlu0 %1354 }
 0x4a0   :  { %3782 = vrcp.f32 %v1355_v49 }
 0x4a6   :  { %v3783_v51 = vpop.eup %3782 }
 0x4a7   :  { %v1369_v12 = vmul.f32 %v3783_v51, %v4439_v24 }
 0x4a9   :  { %3615 = vmatmul.msk.f32.vlgmr.msra.gmra.mxu3 %vm490_vm2, %v1369_v12 }
 0x4af   :  { %v1364_v42 = vpop.xlane.xlu0 %1363  ;;  %v1358_v55 = vpop.xlane.xlu1 %1357 }
 0x4b0   :  { %3784 = vrcp.f32 %v1364_v42 }
 0x4b1   :  { %3786 = vrcp.f32 %v1358_v55  ;;  %3619 = vmatmul.msk.f32.vlgmr.msrb.gmra.mxu3 %vm92_vm0, %v857_v54 }
 0x4b6   :  { %v3785_v48 = vpop.eup %3784 }
 0x4b7   :  { %v3787_v24 = vpop.eup %3786  ;;  %v1372_v46 = vmul.f32 %v3785_v48, %v4455_v47 }
 0x4b8   :  { %v1370_v56 = vmul.f32 %v3787_v24, %v4453_v45  ;;  %v3840_v45 = vld [vmem:[#allocation2] sm:$0xff] }
 0x4b9   :  { %3618 = vmatmul.msk.f32.vlgmr.msrb.gmra.mxu2 %vm490_vm2, %v1372_v46 }
 0x4ba   :  { %3616 = vmatmul.msk.f32.vlgmr.msra.gmra.mxu0 %vm490_vm2, %v1370_v56 }
 0x4dc   :  { %v1361_v11 = vpop.xlane.xlu2 %1360 }
 0x4dd   :  { %3788 = vrcp.f32 %v1361_v11 }
 0x4e3   :  { %v3789_v57 = vpop.eup %3788 }
 0x4e4   :  { %v1371_v59 = vmul.f32 %v3789_v57, %v3781_v41 }
 0x4e6   :  { %3617 = vmatmul.msk.f32.vlgmr.msra.gmra.mxu1 %vm490_vm2, %v1371_v59 }
 0x52c   :  { %v1393_v61 = vpop.f32.mrf.mxu3 }
 0x52d   :  { %v1467_v17 = vrot.slane %v1393_v61, 4 }
 0x534   :  { %v1621_v4 = vpop.f32.mrf.mxu3 }
 0x535   :  { %v1622_v47 = vadd.f32 %v4522_v63, %v1621_v4 }
 0x537   :  { %v4525_v3 = vadd.f32 %v3840_v45, %v1622_v47  ;;  %v1416_v6 = vpop.f32.mrf.mxu0 }
 0x538   :  { %v1479_v9 = vrot.slane %v1416_v6, 4 }
 0x539   :  { %v1631_v5 = vsel %vm92_vm0, %v4525_v3, 0.0 }
 0x53a   :  { %1632 = vadd.xlane.f32.xlu0 %v1631_v5 }
 0x53c   :  { %v1462_v8 = vpop.f32.mrf.mxu2 }
 0x53d   :  { %v1477_v10 = vrot.slane %v1462_v8, 4  ;;  %v1480_v13 = vsel %vm133_vm1, %v1462_v8, %v1479_v9 }
 0x53e   :  { %v1488_v16 = vperm.slane %v1480_v13, %v4060_v21 }
 0x53f   :  { %v1478_v15 = vsel %vm133_vm1, %v1477_v10, %v1416_v6 }
 0x540   :  { %v1484_v18 = vperm.slane %v1478_v15, %v4060_v21  ;;  %v1501_v23 = vrot.slane %v1488_v16, 4  ;;  %v3936_v15 = vmov 32.0  }
 0x541   :  { %3790 = vrcp.f32 %v3936_v15 }
 0x542   :  { %v1489_v7 = vrot.slane %v1484_v18, 4 }
 0x563   :  { %v1439_v1 = vpop.f32.mrf.mxu1 }
 0x564   :  { %v1465_v19 = vrot.slane %v1439_v1, 4  ;;  %v1468_v22 = vsel %vm133_vm1, %v1439_v1, %v1467_v17 }
 0x565   :  { %v1476_v25 = vperm.slane %v1468_v22, %v4060_v21 }
 0x566   :  { %v1466_v26 = vsel %vm133_vm1, %v1465_v19, %v1393_v61 }
 0x567   :  { %v1472_v27 = vperm.slane %v1466_v26, %v4060_v21  ;;  %v1502_v28 = vsel %vm133_vm1, %v1501_v23, %v1476_v25  ;;  %v1503_v29 = vrot.slane %v1476_v25, 4 }
 0x568   :  { %v1508_v58 = vperm.slane %v1502_v28, %v4070_v36  ;;  %v1695_v28 = vld [vmem:[%s5336_s8 + $0x18] sm:$0xff] }
 0x569   :  { %v1490_v53 = vsel %vm133_vm1, %v1489_v7, %v1472_v27  ;;  %v1491_v2 = vrot.slane %v1472_v27, 4  ;;  %v1504_v30 = vsel %vm133_vm1, %v1488_v16, %v1503_v29  ;;  %v3791_v16 = vpop.eup %3790  ;;  %v1694_v29 = vld [vmem:[%s5336_s8 + $0x10] sm:$0xff]  ;;  %1718 = vmatpush.msrb.mxu0 %v1695_v28 }
 0x56a   :  { %v1496_v31 = vperm.slane %v1490_v53, %v4070_v36  ;;  %v1512_v52 = vperm.slane %v1504_v30, %v4070_v36  ;;  %v1517_v37 = vrot.slane %v1508_v58, 4  ;;  %v1638_v17 = vmul.f32 32.0, %v3791_v16 }
 0x56b   :  { %v1492_v32 = vsel %vm133_vm1, %v1484_v18, %v1491_v2  ;;  %vm1642_vm5 = vweird.f32 %v3791_v16  ;;  %1719 = vmatpush.msrb.mxu0 %v1694_v29 }
 0x56c   :  { %v1500_v34 = vperm.slane %v1492_v32, %v4070_v36  ;;  %v1519_v39 = vrot.slane %v1512_v52, 4  ;;  %v1513_v0 = vrot.slane %v1496_v31, 4  ;;  %v1518_v35 = vsel %vm133_vm1, 0.0, %v1517_v37 }
 0x56d   :  { %v1639_v18 = vsub.f32 1.0, %v1638_v17 }
 0x56e   :  { %v1515_v40 = vrot.slane %v1500_v34, 4  ;;  %v1520_v41 = vsel %vm133_vm1, 0.0, %v1519_v39  ;;  %v1532_v43 = vsel %vm133_vm1, %v1519_v39, %v1508_v58  ;;  %v1514_v50 = vsel %vm133_vm1, 0.0, %v1513_v0  ;;  %v1693_v58 = vld [vmem:[%s5336_s8 + $0x8] sm:$0xff] }
 0x56f   :  { %v1537_v44 = vrot.slane %v1520_v41, 4  ;;  %v1536_v38 = vperm.slane %v1532_v43, %v4060_v21  ;;  %v1640_v1 = vmul.f32 %v3791_v16, %v1639_v18  ;;  %1720 = vmatpush.msrb.mxu0 %v1693_v58 }
 0x570   :  { %v1516_v33 = vsel %vm133_vm1, 0.0, %v1515_v40  ;;  %v1521_v62 = vsel %vm133_vm1, %v1515_v40, %v1496_v31 }
 0x571   :  { %v1526_v60 = vrot.slane %v1516_v33, 4  ;;  %v1525_v49 = vperm.slane %v1521_v62, %v4060_v21  ;;  %v1538_v51 = vsel %vm133_vm1, %v1537_v44, %v1518_v35  ;;  %v1557_v12 = vrot.slane %v1536_v38, 4  ;;  %v4597_v33 = vld [vmem:[%s5334_s6] ss:$0 sm:$0xff] }
 0x572   :  { %v1542_v14 = vperm.slane %v1538_v51, %v4060_v21  ;;  %v1641_v19 = vadd.f32 %v3791_v16, %v1640_v1 }
 0x573   :  { %v1527_v20 = vsel %vm133_vm1, %v1526_v60, %v1514_v50  ;;  %v1545_v42 = vrot.slane %v1525_v49, 4  ;;  %v4602_v60 = vld [vmem:[%s5335_s7] ss:$0 sm:$0xff]  ;;  %v1737_v50 = vld [vmem:[%s5338_s10 + $0x30] sm:$0xff] }
 0x574   :  { %v1531_v54 = vperm.slane %v1527_v20, %v4060_v21  ;;  %v1555_v55 = vrot.slane %v1542_v14, 4  ;;  %v1558_v48 = vsel %vm133_vm1, %v1542_v14, %v1557_v12  ;;  %v4571_v22 = vsel %vm1642_vm5, %v3791_v16, %v1641_v19  ;;  %v1738_v12 = vld [vmem:[%s5338_s10 + $0x38] sm:$0xff]  ;;  %v1736_v14 = vld [vmem:[%s5338_s10 + $0x28] sm:$0xff]  ;;  %v1735_v20 = vld [vmem:[%s5338_s10 + $0x20] sm:$0xff] }
 0x575   :  { %v1566_v24 = vperm.slane %v1558_v48, %v4070_v36  ;;  %1758 = vmatpush.msrb.mxu1 %v1738_v12  ;;  %v1731_v48 = vld [vmem:[%s5338_s10] sm:$0xff] }
 0x576   :  { %v1543_v46 = vrot.slane %v1531_v54, 4  ;;  %v1556_v56 = vsel %vm133_vm1, %v1555_v55, %v1536_v38  ;;  %v1546_v11 = vsel %vm133_vm1, %v1531_v54, %v1545_v42  ;;  %v1734_v42 = vld [vmem:[%s5338_s10 + $0x18] sm:$0xff]  ;;  %v1733_v54 = vld [vmem:[%s5338_s10 + $0x10] sm:$0xff]  ;;  %v1732_v55 = vld [vmem:[%s5338_s10 + $0x8] sm:$0xff] }
 0x577   :  { %v1562_v57 = vperm.slane %v1556_v56, %v4070_v36  ;;  %v1554_v59 = vperm.slane %v1546_v11, %v4070_v36  ;;  %v1571_v61 = vrot.slane %v1566_v24, 4  ;;  %1759 = vmatpush.msrb.mxu1 %v1737_v50  ;;  %v3841_v56 = vld [vmem:[#allocation2 + $0x8] sm:$0xff]  ;;  %v4669_v12 = vld [vmem:[%s5340_s12] ss:$0 sm:$0xff] }
 0x578   :  { %v1544_v4 = vsel %vm133_vm1, %v1543_v46, %v1525_v49 }
 0x579   :  { %v1550_v47 = vperm.slane %v1544_v4, %v4070_v36  ;;  %v1567_v45 = vrot.slane %v1562_v57, 4  ;;  %v1572_v5 = vsel %vm133_vm1, %v1571_v61, %v1554_v59  ;;  %v1573_v10 = vrot.slane %v1554_v59, 4  ;;  %1760 = vmatpush.msrb.mxu1 %v1736_v14  ;;  %v3746_v59 = vld [vmem:[%s5337_s9] ss:$0 sm:$0xff] }
 0x57b   :  { %v1569_v6 = vrot.slane %v1550_v47, 4  ;;  %v1568_v8 = vsel %vm133_vm1, %v1567_v45, %v1550_v47  ;;  %v1574_v13 = vsel %vm133_vm1, %v1566_v24, %v1573_v10  ;;  %1761 = vmatpush.msrb.mxu1 %v1735_v20  ;;  %v4671_v20 = vld [vmem:[#allocation5] ss:$0 sm:$0xff] }
 0x57d   :  { %v1570_v9 = vsel %vm133_vm1, %v1562_v57, %v1569_v6  ;;  %1762 = vmatpush.msrb.mxu1 %v1734_v42 }
 0x57e   :  { %1576 = vrot.lane.b32.xlu0 %v1570_v9, %s3924_s22  ;;  %v4642_v9 = vld [vmem:[%s5339_s11] ss:$0 sm:$0xff] }
 0x57f   :  { %1763 = vmatpush.msrb.mxu1 %v1733_v54 }
 0x581   :  { %1764 = vmatpush.msrb.mxu1 %v1732_v55 }
 0x583   :  { %1765 = vmatpush.msrb.mxu1 %v1731_v48 }
 0x586   :  { %1584 = vrot.lane.b32.xlu0 %v1574_v13, %s3935_s29 }
 0x5ad   :  { %v1633_v23 = vpop.xlane.xlu0 %1632 }
 0x5ae   :  { %v1644_v25 = vmul.f32 %v4571_v22, %v1633_v23 }
 0x5b0   :  { %v1646_v26 = vsub.f32 %v4525_v3, %v1644_v25  ;;  %v1692_v3 = vld [vmem:[%s5336_s8] sm:$0xff] }
 0x5b1   :  { %1721 = vmatpush.msrb.mxu0 %v1692_v3 }
 0x5b2   :  { %v1648_v7 = vmul.f32 %v1646_v26, %v1646_v26 }
 0x5b4   :  { %v1650_v27 = vsel %vm92_vm0, %v1648_v7, 0.0 }
 0x5b5   :  { %1651 = vadd.xlane.f32.xlu2 %v1650_v27 }
 0x5cd   :  { %1580 = vrot.lane.b32.xlu2 %v1572_v5, %s3926_s25 }
 0x5f0   :  { %v1577_v53 = vpop.permute.xlu0 %1576 }
 0x5f1   :  { %v1587_v52 = vsel %vm490_vm2, %v1568_v8, %v1577_v53 }
 0x5f8   :  { %v1585_v34 = vpop.permute.xlu0 %1584 }
 0x628   :  { %v1652_v2 = vpop.xlane.xlu2 %1651 }
 0x629   :  { %v1656_v30 = vmul.f32 %v1652_v2, %v4571_v22 }
 0x62b   :  { %v1658_v31 = vadd.f32 1e-05, %v1656_v30 }
 0x62d   :  { %3792 = vrsqrt.f32 %v1658_v31  ;;  %vm1666_vm7 = vweird.f32 %v1658_v31 }
 0x630   :  { %v1581_v32 = vpop.permute.xlu2 %1580 }
 0x631   :  { %v1588_v37 = vsel %vm854_vm3, %v1587_v52, %v1581_v32  ;;  %v3628_v32 = vld [vmem:[%s5330_s2 + $0x38] sm:$0xff] }
 0x632   :  { %v1589_v39 = vsel %vm856_vm4, %v1588_v37, %v1585_v34  ;;  %v3627_v34 = vld [vmem:[%s5330_s2 + $0x30] sm:$0xff]  ;;  %1859 = vmatpush.msra.mxu2 %v3628_v32  ;;  %v3626_v37 = vld [vmem:[%s5330_s2 + $0x28] sm:$0xff] }
 0x633   :  { %v3793_v0 = vpop.eup %3792  ;;  %3620 = vmatmul.msk.f32.gmra.mxu3 %vm92_vm0, %v1589_v39  ;;  %v3625_v39 = vld [vmem:[%s5330_s2 + $0x20] sm:$0xff] }
 0x634   :  { %v1661_v40 = vmul.f32 %v3793_v0, %v1658_v31  ;;  %vm1667_vm6 = vweird.f32 %v3793_v0  ;;  %1860 = vmatpush.msra.mxu2 %v3627_v34 }
 0x635   :  { %vm1668_vm8 = vmor %vm1666_vm7, %vm1667_vm6 }
 0x636   :  { %v1662_v41 = vmul.f32 %v3793_v0, %v1661_v40  ;;  %1861 = vmatpush.msra.mxu2 %v3626_v37 }
 0x638   :  { %v1663_v43 = vmul.f32 0.5, %v1662_v41  ;;  %1862 = vmatpush.msra.mxu2 %v3625_v39 }
 0x63a   :  { %v1664_v44 = vsub.f32 1.5, %v1663_v43 }
 0x63c   :  { %v1665_v38 = vmul.f32 %v3793_v0, %v1664_v44 }
 0x63e   :  { %v1669_v35 = vsel %vm1668_vm8, %v3793_v0, %v1665_v38 }
 0x63f   :  { %v1680_v62 = vmul.f32 %v1669_v35, %v1646_v26 }
 0x641   :  { %v1685_v49 = vmul.f32 %v4597_v33, %v1680_v62 }
 0x643   :  { %v1690_v51 = vadd.f32 %v4602_v60, %v1685_v49 }
 0x645   :  { %3621 = vmatmul.msk.f32.vlgmr.msrb.gmra.mxu0 %vm92_vm0, %v1690_v51 }
 0x6b6   :  { %v1624_v24 = vpop.f32.mrf.mxu3 }
 0x6b7   :  { %v1625_v46 = vadd.f32 %v4522_v63, %v1624_v24 }
 0x6b9   :  { %v1628_v11 = vadd.f32 %v3841_v56, %v1625_v46  ;;  %v4684_v56 = vld [vmem:[%s5331_s3 + $0x1] ss:$0 sm:$0xff] }
 0x6bb   :  { %v1634_v57 = vsel %vm92_vm0, %v1628_v11, 0.0 }
 0x6bc   :  { %1635 = vadd.xlane.f32.xlu2 %v1634_v57 }
 0x6c2   :  { %v1723_v61 = vpop.f32.mrf.mxu0 }
 0x6c3   :  { %v1724_v4 = vadd.f32 %v3746_v59, %v1723_v61 }
 0x6c5   :  { %v1729_v47 = vmax.f32 %v1724_v4, 0.0 }
 0x6c7   :  { %3623 = vmatmul.msk.f32.vlgmr.msrb.gmra.mxu1 %vm1743_vm9, %v1729_v47 }
 0x72f   :  { %v1636_v45 = vpop.xlane.xlu2 %1635 }
 0x730   :  { %v1645_v5 = vmul.f32 %v4571_v22, %v1636_v45 }
 0x732   :  { %v1647_v6 = vsub.f32 %v1628_v11, %v1645_v5 }
 0x734   :  { %v1649_v63 = vmul.f32 %v1647_v6, %v1647_v6 }
 0x736   :  { %v1653_v8 = vsel %vm92_vm0, %v1649_v63, 0.0 }
 0x737   :  { %1654 = vadd.xlane.f32.xlu0 %v1653_v8 }
 0x744   :  { %v1767_v10 = vpop.f32.mrf.mxu1 }
 0x745   :  { %v1768_v13 = vadd.f32 %v4642_v9, %v1767_v10 }
 0x747   :  { %v1773_v15 = vadd.f32 %v1768_v13, %v1690_v51 }
 0x749   :  { %v1777_v16 = vsel %vm92_vm0, %v1773_v15, 0.0 }
 0x74a   :  { %1778 = vadd.xlane.f32.xlu1 %v1777_v16 }
 0x7aa   :  { %v1655_v17 = vpop.xlane.xlu0 %1654 }
 0x7ab   :  { %v1657_v18 = vmul.f32 %v1655_v17, %v4571_v22 }
 0x7ad   :  { %v1659_v1 = vadd.f32 1e-05, %v1657_v18 }
 0x7af   :  { %3794 = vrsqrt.f32 %v1659_v1  ;;  %vm1676_vm11 = vweird.f32 %v1659_v1 }
 0x7b5   :  { %v3795_v19 = vpop.eup %3794 }
 0x7b6   :  { %v1671_v23 = vmul.f32 %v3795_v19, %v1659_v1  ;;  %vm1677_vm10 = vweird.f32 %v3795_v19 }
 0x7b7   :  { %vm1678_vm12 = vmor %vm1676_vm11, %vm1677_vm10 }
 0x7b8   :  { %v1672_v25 = vmul.f32 %v3795_v19, %v1671_v23 }
 0x7ba   :  { %v1673_v26 = vmul.f32 0.5, %v1672_v25 }
 0x7bc   :  { %v1674_v7 = vsub.f32 1.5, %v1673_v26 }
 0x7bd   :  { %v1779_v27 = vpop.xlane.xlu1 %1778 }
 0x7be   :  { %v1675_v28 = vmul.f32 %v3795_v19, %v1674_v7  ;;  %v1783_v29 = vmul.f32 %v1779_v27, %v4571_v22 }
 0x7c0   :  { %v1679_v58 = vsel %vm1678_vm12, %v3795_v19, %v1675_v28  ;;  %v1785_v3 = vsub.f32 %v1773_v15, %v1783_v29 }
 0x7c1   :  { %v1681_v53 = vmul.f32 %v1679_v58, %v1647_v6 }
 0x7c2   :  { %v1787_v2 = vmul.f32 %v1785_v3, %v1785_v3 }
 0x7c3   :  { %v1686_v30 = vmul.f32 %v4597_v33, %v1681_v53 }
 0x7c4   :  { %v1789_v31 = vsel %vm92_vm0, %v1787_v2, 0.0 }
 0x7c5   :  { %1790 = vadd.xlane.f32.xlu1 %v1789_v31  ;;  %v1691_v52 = vadd.f32 %v4602_v60, %v1686_v30 }
 0x7c7   :  { %3622 = vmatmul.msk.f32.gmra.mxu0 %vm92_vm0, %v1691_v52 }
 0x838   :  { %v1791_v0 = vpop.xlane.xlu1 %1790 }
 0x839   :  { %v1795_v40 = vmul.f32 %v1791_v0, %v4571_v22 }
 0x83b   :  { %v1797_v41 = vadd.f32 1e-05, %v1795_v40 }
 0x83d   :  { %3796 = vrsqrt.f32 %v1797_v41  ;;  %vm1805_vm14 = vweird.f32 %v1797_v41 }
 0x843   :  { %v3797_v43 = vpop.eup %3796 }
 0x844   :  { %v1800_v44 = vmul.f32 %v3797_v43, %v1797_v41  ;;  %v1726_v38 = vpop.f32.mrf.mxu0  ;;  %vm1806_vm13 = vweird.f32 %v3797_v43 }
 0x845   :  { %v1727_v33 = vadd.f32 %v3746_v59, %v1726_v38  ;;  %vm1807_vm15 = vmor %vm1805_vm14, %vm1806_vm13 }
 0x846   :  { %v1801_v35 = vmul.f32 %v3797_v43, %v1800_v44 }
 0x847   :  { %v1730_v62 = vmax.f32 %v1727_v33, 0.0 }
 0x848   :  { %v1802_v60 = vmul.f32 0.5, %v1801_v35 }
 0x849   :  { %3624 = vmatmul.msk.f32.gmra.mxu1 %vm1743_vm9, %v1730_v62 }
 0x84a   :  { %v1803_v49 = vsub.f32 1.5, %v1802_v60 }
 0x84c   :  { %v1804_v51 = vmul.f32 %v3797_v43, %v1803_v49 }
 0x84e   :  { %v1808_v50 = vsel %vm1807_vm15, %v3797_v43, %v1804_v51 }
 0x84f   :  { %v1819_v14 = vmul.f32 %v1808_v50, %v1785_v3 }
 0x851   :  { %v1824_v42 = vmul.f32 %v4669_v12, %v1819_v14 }
 0x853   :  { %v4675_v54 = vadd.f32 %v4671_v20, %v1824_v42 }
 0x855   :  { %3630 = vmatmul.msk.f32.vlgmr.msra.gmra.mxu2 %vm92_vm0, %v4675_v54 }
 0x8c6   :  { %v1770_v55 = vpop.f32.mrf.mxu1 }
 0x8c7   :  { %v1771_v48 = vadd.f32 %v4642_v9, %v1770_v55 }
 0x8c9   :  { %v1774_v24 = vadd.f32 %v1771_v48, %v1691_v52 }
 0x8cb   :  { %v1780_v46 = vsel %vm92_vm0, %v1774_v24, 0.0 }
 0x8cc   :  { %1781 = vadd.xlane.f32.xlu1 %v1780_v46 }
 0x8d8   :  { %v1864_v11 = vpop.f32.mrf.mxu2 }
 0x8d9   :  { %v1865_v57 = vadd.f32 %v4684_v56, %v1864_v11 }
 0x8db   :  { %1874 = vrot.lane.b32.xlu2 %v1865_v57, %s3930_s23  ;;  %1877 = vrot.lane.b32.xlu0 %v1865_v57, %s3931_s24  ;;  %v1882_v15 = vrot.slane %v1865_v57, 4 }
 0x8e3   :  { %1990 = vrot.lane.b32.xlu0 %v1865_v57, %s3928_s19 }
 0x8e5   :  { %1871 = vrot.lane.b32.xlu1 %v1865_v57, %s3929_s20 }
 0x935   :  { %v4691_v59 = vpop.permute.xlu2 %1874 }
 0x936   :  { %1994 = vrot.lane.b32.xlu0 %v4691_v59, %s3928_s19  ;;  %v1880_v9 = vrot.slane %v4691_v59, 4  ;;  %v1883_v18 = vsel %vm133_vm1, %v4691_v59, %v1882_v15 }
 0x937   :  { %v1891_v25 = vperm.slane %v1883_v18, %v4060_v21 }
 0x938   :  { %v1881_v10 = vsel %vm133_vm1, %v1880_v9, %v1865_v57 }
 0x939   :  { %v1887_v1 = vperm.slane %v1881_v10, %v4060_v21  ;;  %v1918_v58 = vrot.slane %v1891_v25, 4 }
 0x93b   :  { %v1906_v26 = vrot.slane %v1887_v1, 4 }
 0x93f   :  { %v1782_v61 = vpop.xlane.xlu1 %1781 }
 0x940   :  { %v1784_v4 = vmul.f32 %v1782_v61, %v4571_v22 }
 0x942   :  { %v4696_v47 = vsub.f32 %v1774_v24, %v1784_v4 }
 0x944   :  { %v1788_v45 = vmul.f32 %v4696_v47, %v4696_v47 }
 0x946   :  { %v1792_v5 = vsel %vm92_vm0, %v1788_v45, 0.0 }
 0x947   :  { %1793 = vadd.xlane.f32.xlu1 %v1792_v5 }
 0x94d   :  { %v4702_v63 = vpop.permute.xlu0 %1877 }
 0x94e   :  { %v1892_v13 = vrot.slane %v4702_v63, 4 }
 0x955   :  { %v1991_v27 = vpop.permute.xlu0 %1990 }
 0x956   :  { %v2004_v41 = vrot.slane %v1991_v27, 4 }
 0x957   :  { %v1872_v6 = vpop.permute.xlu1 %1871 }
 0x958   :  { %1992 = vrot.lane.b32.xlu2 %v1872_v6, %s3928_s19  ;;  %v3720_v8 = vpack.i.bf16 %v1872_v6, %v1865_v57  ;;  %v1894_v16 = vrot.slane %v1872_v6, 4  ;;  %v1893_v17 = vsel %vm133_vm1, %v1892_v13, %v1872_v6 }
 0x959   :  { %v1899_v23 = vperm.slane %v1893_v17, %v4060_v21 }
 0x95a   :  { %v1895_v19 = vsel %vm133_vm1, %v4702_v63, %v1894_v16 }
 0x95b   :  { %v1903_v7 = vperm.slane %v1895_v19, %v4060_v21  ;;  %v1904_v28 = vrot.slane %v1899_v23, 4  ;;  %v1907_v29 = vsel %vm133_vm1, %v1899_v23, %v1906_v26 }
 0x95c   :  { %v1915_v3 = vperm.slane %v1907_v29, %v4070_v36 }
 0x95d   :  { %v1916_v53 = vrot.slane %v1903_v7, 4  ;;  %v1919_v2 = vsel %vm133_vm1, %v1903_v7, %v1918_v58  ;;  %v1905_v30 = vsel %vm133_vm1, %v1904_v28, %v1887_v1 }
 0x95e   :  { %v1927_v31 = vperm.slane %v1919_v2, %v4070_v36  ;;  %v1911_v52 = vperm.slane %v1905_v30, %v4070_v36  ;;  %v1930_v34 = vrot.slane %v1915_v3, 4 }
 0x95f   :  { %v1917_v32 = vsel %vm133_vm1, %v1916_v53, %v1891_v25 }
 0x960   :  { %1996 = vrot.lane.b32.xlu2 %v4702_v63, %s3928_s19  ;;  %v1923_v39 = vperm.slane %v1917_v32, %v4070_v36  ;;  %v1934_v0 = vrot.slane %v1927_v31, 4  ;;  %v1928_v43 = vrot.slane %v1911_v52, 4  ;;  %v1931_v44 = vsel %vm133_vm1, 0.0, %v1930_v34 }
 0x961   :  { %v1941_v60 = vrot.slane %v1931_v44, 4  ;;  %v1936_v1 = vsel %vm133_vm1, %v1930_v34, %v1911_v52 }
 0x962   :  { %v1932_v35 = vrot.slane %v1923_v39, 4  ;;  %v1935_v62 = vsel %vm133_vm1, 0.0, %v1934_v0  ;;  %v1929_v49 = vsel %vm133_vm1, 0.0, %v1928_v43  ;;  %v4760_v58 = vperm.slane %v1936_v1, %v4060_v21 }
 0x963   :  { %v1952_v14 = vrot.slane %v1935_v62, 4  ;;  %v1942_v11 = vsel %vm133_vm1, %v1941_v60, %v1929_v49  ;;  %v1947_v34 = vsel %vm133_vm1, %v1934_v0, %v1923_v39 }
 0x964   :  { %v1933_v55 = vsel %vm133_vm1, 0.0, %v1932_v35  ;;  %v4743_v9 = vperm.slane %v1942_v11, %v4060_v21  ;;  %v1951_v39 = vperm.slane %v1947_v34, %v4060_v21 }
 0x965   :  { %v1953_v10 = vsel %vm133_vm1, %v1952_v14, %v1933_v55 }
 0x966   :  { %v4754_v26 = vperm.slane %v1953_v10, %v4060_v21  ;;  %v1958_v3 = vrot.slane %v4743_v9, 4 }
 0x968   :  { %3721 = vrot.lane.b32.xlu2 %v3720_v8, %s3932_s0  ;;  %v1959_v0 = vsel %vm133_vm1, %v1958_v3, %v4760_v58 }
 0x9a8   :  { %v1995_v37 = vpop.permute.xlu0 %1994 }
 0x9a9   :  { %v2002_v38 = vrot.slane %v1995_v37, 4  ;;  %v2005_v33 = vsel %vm133_vm1, %v1995_v37, %v2004_v41  ;;  %v1970_v37 = vrot.slane %v4754_v26, 4 }
 0x9aa   :  { %v2013_v50 = vperm.slane %v2005_v33, %v4060_v21 }
 0x9ab   :  { %v2003_v51 = vsel %vm133_vm1, %v2002_v38, %v1991_v27 }
 0x9ac   :  { %v2009_v48 = vperm.slane %v2003_v51, %v4060_v21  ;;  %v2040_v45 = vrot.slane %v2013_v50, 4 }
 0x9ae   :  { %v2028_v13 = vrot.slane %v2009_v48, 4 }
 0x9b2   :  { %v1993_v40 = vpop.permute.xlu2 %1992 }
 0x9b3   :  { %v2016_v42 = vrot.slane %v1993_v40, 4 }
 0x9ba   :  { %v1794_v24 = vpop.xlane.xlu1 %1793  ;;  %v1997_v46 = vpop.permute.xlu2 %1996 }
 0x9bb   :  { %v1796_v57 = vmul.f32 %v1794_v24, %v4571_v22  ;;  %v2014_v61 = vrot.slane %v1997_v46, 4  ;;  %v2017_v4 = vsel %vm133_vm1, %v1997_v46, %v2016_v42 }
 0x9bc   :  { %v2025_v5 = vperm.slane %v2017_v4, %v4060_v21 }
 0x9bd   :  { %v4739_v6 = vadd.f32 1e-05, %v1796_v57  ;;  %v2015_v8 = vsel %vm133_vm1, %v2014_v61, %v1993_v40 }
 0x9be   :  { %v2021_v15 = vperm.slane %v2015_v8, %v4060_v21  ;;  %v2038_v16 = vrot.slane %v2025_v5, 4  ;;  %v2041_v17 = vsel %vm133_vm1, %v2025_v5, %v2040_v45  ;;  %v1965_v45 = vperm.slane %v1959_v0, %v4070_v36 }
 0x9bf   :  { %3798 = vrsqrt.f32 %v4739_v6  ;;  %v2049_v18 = vperm.slane %v2041_v17, %v4070_v36  ;;  %v1960_v5 = vrot.slane %v4760_v58, 4  ;;  %vm1815_vm6 = vweird.f32 %v4739_v6 }
 0x9c0   :  { %v2026_v19 = vrot.slane %v2021_v15, 4  ;;  %v2029_v23 = vsel %vm133_vm1, %v2021_v15, %v2028_v13  ;;  %v2039_v25 = vsel %vm133_vm1, %v2038_v16, %v2013_v50 }
 0x9c1   :  { %v2037_v7 = vperm.slane %v2029_v23, %v4070_v36  ;;  %v2045_v27 = vperm.slane %v2039_v25, %v4070_v36  ;;  %v2056_v28 = vrot.slane %v2049_v18, 4 }
 0x9c2   :  { %v2027_v29 = vsel %vm133_vm1, %v2026_v19, %v2009_v48  ;;  %v1971_v48 = vsel %vm133_vm1, %v1970_v37, %v1951_v39 }
 0x9c3   :  { %v2033_v53 = vperm.slane %v2027_v29, %v4070_v36  ;;  %v2052_v2 = vrot.slane %v2037_v7, 4  ;;  %v2054_v30 = vrot.slane %v2045_v27, 4  ;;  %v2057_v31 = vsel %vm133_vm1, 0.0, %v2056_v28 }
 0x9c4   :  { %v2069_v52 = vsel %vm133_vm1, %v2056_v28, %v2045_v27  ;;  %v2074_v32 = vrot.slane %v2057_v31, 4  ;;  %v1977_v18 = vperm.slane %v1971_v48, %v4070_v36  ;;  %v1972_v28 = vrot.slane %v1951_v39, 4 }
 0x9c5   :  { %v3799_v40 = vpop.eup %3798  ;;  %v2050_v41 = vrot.slane %v2033_v53, 4  ;;  %v2053_v43 = vsel %vm133_vm1, 0.0, %v2052_v2  ;;  %v2055_v44 = vsel %vm133_vm1, 0.0, %v2054_v30  ;;  %v2058_v38 = vsel %vm133_vm1, %v2052_v2, %v2033_v53 }
 0x9c6   :  { %v1810_v33 = vmul.f32 %v3799_v40, %v4739_v6  ;;  %v2063_v35 = vrot.slane %v2053_v43, 4  ;;  %v2073_v62 = vperm.slane %v2069_v52, %v4060_v21  ;;  %v2075_v49 = vsel %vm133_vm1, %v2074_v32, %v2055_v44 }
 0x9c7   :  { %v2051_v60 = vsel %vm133_vm1, 0.0, %v2050_v41  ;;  %v2079_v50 = vperm.slane %v2075_v49, %v4060_v21  ;;  %v2062_v42 = vperm.slane %v2058_v38, %v4060_v21  ;;  %vm1816_vm5 = vweird.f32 %v3799_v40 }
 0x9c8   :  { %v1811_v51 = vmul.f32 %v3799_v40, %v1810_v33  ;;  %v2094_v14 = vrot.slane %v2073_v62, 4  ;;  %v2064_v55 = vsel %vm133_vm1, %v2063_v35, %v2051_v60  ;;  %vm1817_vm7 = vmor %vm1815_vm6, %vm1816_vm5  ;;  %v1982_v2 = vrot.slane %v1977_v18, 4 }
 0x9c9   :  { %v2068_v46 = vperm.slane %v2064_v55, %v4060_v21  ;;  %v2082_v11 = vrot.slane %v2062_v42, 4  ;;  %v2092_v4 = vrot.slane %v2079_v50, 4  ;;  %v1984_v31 = vrot.slane %v1965_v45, 4 }
 0x9ca   :  { %v1812_v24 = vmul.f32 0.5, %v1811_v51  ;;  %v2095_v57 = vsel %vm133_vm1, %v2079_v50, %v2094_v14  ;;  %v1961_v52 = vsel %vm133_vm1, %v4743_v9, %v1960_v5  ;;  %v1973_v37 = vsel %vm133_vm1, %v4754_v26, %v1972_v28  ;;  %v3722_v50 = vpop.permute.xlu2 %3721 }
 0x9cb   :  { %v2103_v61 = vperm.slane %v2095_v57, %v4070_v36  ;;  %v2083_v10 = vsel %vm133_vm1, %v2068_v46, %v2082_v11  ;;  %v2080_v13 = vrot.slane %v2068_v46, 4  ;;  %v2093_v17 = vsel %vm133_vm1, %v2092_v4, %v2073_v62 }
 0x9cc   :  { %v1813_v8 = vsub.f32 1.5, %v1812_v24  ;;  %v2091_v15 = vperm.slane %v2083_v10, %v4070_v36  ;;  %v2099_v23 = vperm.slane %v2093_v17, %v4070_v36  ;;  %v1969_v9 = vperm.slane %v1961_v52, %v4070_v36 }
 0x9cd   :  { %v2108_v16 = vrot.slane %v2103_v61, 4  ;;  %v2081_v19 = vsel %vm133_vm1, %v2080_v13, %v2062_v42  ;;  %v1985_v41 = vsel %vm133_vm1, %v1977_v18, %v1984_v31  ;;  %v3725_v35 = vpack.i.bf16 %v4702_v63, %v4691_v59 }
 0x9ce   :  { %v1814_v1 = vmul.f32 %v3799_v40, %v1813_v8  ;;  %v2087_v7 = vperm.slane %v2081_v19, %v4070_v36  ;;  %v2110_v27 = vrot.slane %v2091_v15, 4  ;;  %v2104_v58 = vrot.slane %v2099_v23, 4 }
 0x9cf   :  { %v2109_v25 = vsel %vm133_vm1, %v2108_v16, %v2091_v15  ;;  %v1988_v26 = vrot.slane %v1969_v9, 4  ;;  %v3723_v24 = vunpack.i.l.bf16 %v3722_v50  ;;  %v3724_v46 = vunpack.i.h.bf16 %v3722_v50 }
 0x9d0   :  { %v1818_v29 = vsel %vm1817_vm7, %v3799_v40, %v1814_v1  ;;  %3636 = vmatpush.xpose.msk.msrb.mxu2 %vm490_vm2, %v2109_v25  ;;  %v2111_v3 = vsel %vm133_vm1, %v2103_v61, %v2110_v27  ;;  %v2106_v53 = vrot.slane %v2087_v7, 4  ;;  %v2105_v30 = vsel %vm133_vm1, %v2104_v58, %v2087_v7 }
 0x9d1   :  { %v1820_v6 = vmul.f32 %v1818_v29, %v4696_v47  ;;  %3632 = vmatpush.xpose.msk.msra.mxu3 %vm490_vm2, %v2105_v30  ;;  %v1983_v47 = vsel %vm133_vm1, %v1982_v2, %v1965_v45  ;;  %v2126_v4 = vrot.slane %v3723_v24, 4  ;;  %v2138_v16 = vrot.slane %v3724_v46, 4 }
 0x9d2   :  { %v2107_v32 = vsel %vm133_vm1, %v2099_v23, %v2106_v53 }
 0x9d3   :  { %v1825_v34 = vmul.f32 %v4669_v12, %v1820_v6  ;;  %3634 = vmatpush.xpose.msk.msra.mxu0 %vm490_vm2, %v2107_v32  ;;  %v1981_v12 = vperm.slane %v1973_v37, %v4070_v36 }
 0x9d4   :  { %3633 = vmatmul.msk.f32.vlgmr.msra.gmra.mxu3 %vm490_vm2, %v1983_v47 }
 0x9d5   :  { %3638 = vmatpush.xpose.msk.msrb.mxu3 %vm490_vm2, %v2111_v3  ;;  %v4811_v40 = vadd.f32 %v4671_v20, %v1825_v34  ;;  %v1986_v43 = vrot.slane %v1981_v12, 4  ;;  %v1989_v44 = vsel %vm133_vm1, %v1981_v12, %v1988_v26 }
 0x9d6   :  { %3635 = vmatmul.msk.f32.vlgmr.msra.gmra.mxu0 %vm490_vm2, %v1985_v41 }
 0x9d7   :  { %3631 = vmatmul.msk.f32.gmra.mxu2 %vm92_vm0, %v4811_v40  ;;  %v1987_v20 = vsel %vm133_vm1, %v1986_v43, %v1969_v9 }
 0x9dc   :  { %3639 = vmatmul.msk.f32.vlgmr.msrb.gmra.mxu3 %vm490_vm2, %v1989_v44 }
 0x9df   :  { %3637 = vmatmul.msk.f32.vlgmr.msrb.gmra.mxu2 %vm490_vm2, %v1987_v20 }
 0xa53   :  { %v2283_v62 = vpop.f32.mrf.mxu0 }
 0xa5a   :  { %v1867_v38 = vpop.f32.mrf.mxu2 }
 0xa5b   :  { %v4825_v33 = vadd.f32 %v4684_v56, %v1867_v38  ;;  %v4841_v56 = vld [vmem:[%s5329_s1] ss:$0 sm:$0xff] }
 0xa5c   :  { %v4844_v60 = vadd.f32 %v4841_v56, %v2283_v62 }
 0xa5d   :  { %2600 = vrot.lane.b32.xlu1 %v4825_v33, %s3929_s20  ;;  %2603 = vrot.lane.b32.xlu0 %v4825_v33, %s3930_s23  ;;  %v2611_v14 = vrot.slane %v4825_v33, 4 }
 0xa5e   :  { %v2341_v59 = vsel %vm490_vm2, %v4844_v60, -inf }
 0xa62   :  { %v2309_v63 = vpop.f32.mrf.mxu2 }
 0xa63   :  { %v4849_v49 = vadd.f32 %v4841_v56, %v2309_v63 }
 0xa65   :  { %2606 = vrot.lane.b32.xlu1 %v4825_v33, %s3931_s24  ;;  %3726 = vrot.lane.b32.xlu0 %v3725_v35, %s3932_s0  ;;  %v2344_v39 = vsel %vm490_vm2, %v4849_v49, -inf }
 0xa6d   :  { %2719 = vrot.lane.b32.xlu0 %v4825_v33, %s3928_s19 }
 0xa8f   :  { %2342 = vmax.xlane.f32.xlu1 %v2341_v59 }
 0xa97   :  { %2345 = vmax.xlane.f32.xlu0 %v2344_v39 }
 0xacf   :  { %v4853_v0 = vpop.permute.xlu1 %2600  ;;  %v4855_v51 = vpop.permute.xlu0 %2603 }
 0xad0   :  { %v2609_v42 = vrot.slane %v4855_v51, 4  ;;  %2721 = vrot.lane.b32.xlu2 %v4853_v0, %s3928_s19  ;;  %2723 = vrot.lane.b32.xlu0 %v4855_v51, %s3928_s19  ;;  %v2612_v48 = vsel %vm133_vm1, %v4855_v51, %v2611_v14  ;;  %v2623_v61 = vrot.slane %v4853_v0, 4 }
 0xad1   :  { %v2620_v57 = vperm.slane %v2612_v48, %v4060_v21 }
 0xad2   :  { %v2610_v55 = vsel %vm133_vm1, %v2609_v42, %v4825_v33 }
 0xad3   :  { %v2616_v11 = vperm.slane %v2610_v55, %v4060_v21  ;;  %v2647_v18 = vrot.slane %v2620_v57, 4 }
 0xad5   :  { %v2635_v17 = vrot.slane %v2616_v11, 4 }
 0xad7   :  { %v4870_v45 = vpop.permute.xlu1 %2606  ;;  %v3727_v5 = vpop.permute.xlu0 %3726 }
 0xad8   :  { %v2621_v8 = vrot.slane %v4870_v45, 4  ;;  %v2624_v10 = vsel %vm133_vm1, %v4870_v45, %v2623_v61  ;;  %v3729_v13 = vunpack.i.h.bf16 %v3727_v5  ;;  %v3728_v15 = vunpack.i.l.bf16 %v3727_v5 }
 0xad9   :  { %v2632_v1 = vperm.slane %v2624_v10, %v4060_v21 }
 0xada   :  { %v2622_v19 = vsel %vm133_vm1, %v2621_v8, %v4853_v0  ;;  %v2136_v23 = vrot.slane %v3729_v13, 4  ;;  %v2124_v25 = vrot.slane %v3728_v15, 4  ;;  %v2127_v7 = vsel %vm133_vm1, %v3728_v15, %v2126_v4 }
 0xadb   :  { %v2628_v27 = vperm.slane %v2622_v19, %v4060_v21  ;;  %v2645_v28 = vrot.slane %v2632_v1, 4  ;;  %v2648_v29 = vsel %vm133_vm1, %v2632_v1, %v2647_v18  ;;  %v2135_v58 = vperm.slane %v2127_v7, %v4060_v21 }
 0xadc   :  { %v2656_v3 = vperm.slane %v2648_v29, %v4070_v36  ;;  %v2125_v53 = vsel %vm133_vm1, %v2124_v25, %v3723_v24  ;;  %v2137_v2 = vsel %vm133_vm1, %v2136_v23, %v3724_v46  ;;  %v2139_v6 = vsel %vm133_vm1, %v3729_v13, %v2138_v16 }
 0xadd   :  { %v2633_v30 = vrot.slane %v2628_v27, 4  ;;  %v2636_v31 = vsel %vm133_vm1, %v2628_v27, %v2635_v17  ;;  %v2646_v52 = vsel %vm133_vm1, %v2645_v28, %v2620_v57  ;;  %v2131_v32 = vperm.slane %v2125_v53, %v4060_v21 }
 0xade   :  { %v2644_v34 = vperm.slane %v2636_v31, %v4070_v36  ;;  %v2652_v37 = vperm.slane %v2646_v52, %v4070_v36  ;;  %v2663_v47 = vrot.slane %v2656_v3, 4  ;;  %v2143_v9 = vperm.slane %v2137_v2, %v4060_v21 }
 0xadf   :  { %v2634_v41 = vsel %vm133_vm1, %v2633_v30, %v2616_v11  ;;  %v2147_v12 = vperm.slane %v2139_v6, %v4060_v21  ;;  %v2150_v26 = vrot.slane %v2131_v32, 4  ;;  %v2162_v43 = vrot.slane %v2135_v58, 4 }
 0xae0   :  { %v2640_v44 = vperm.slane %v2634_v41, %v4070_v36  ;;  %v2659_v20 = vrot.slane %v2644_v34, 4  ;;  %v2661_v38 = vrot.slane %v2652_v37, 4  ;;  %v2664_v35 = vsel %vm133_vm1, 0.0, %v2663_v47 }
 0xae1   :  { %v2676_v62 = vsel %vm133_vm1, %v2663_v47, %v2652_v37  ;;  %v2148_v59 = vrot.slane %v2143_v9, 4  ;;  %v2151_v63 = vsel %vm133_vm1, %v2143_v9, %v2150_v26  ;;  %v2681_v42 = vrot.slane %v2664_v35, 4 }
 0xae2   :  { %v2657_v39 = vrot.slane %v2640_v44, 4  ;;  %v2660_v50 = vsel %vm133_vm1, 0.0, %v2659_v20  ;;  %v2662_v14 = vsel %vm133_vm1, 0.0, %v2661_v38  ;;  %v2159_v24 = vperm.slane %v2151_v63, %v4070_v36 }
 0xae3   :  { %v2670_v55 = vrot.slane %v2660_v50, 4  ;;  %v2149_v48 = vsel %vm133_vm1, %v2148_v59, %v2131_v32  ;;  %v2160_v46 = vrot.slane %v2147_v12, 4  ;;  %v2680_v11 = vperm.slane %v2676_v62, %v4060_v21 }
 0xae4   :  { %v2155_v57 = vperm.slane %v2149_v48, %v4070_v36  ;;  %v2163_v61 = vsel %vm133_vm1, %v2147_v12, %v2162_v43  ;;  %v2658_v4 = vsel %vm133_vm1, 0.0, %v2657_v39  ;;  %v2174_v10 = vrot.slane %v2159_v24, 4  ;;  %v2257_v39 = vpop.f32.mrf.mxu3 }
 0xae5   :  { %v2161_v5 = vsel %vm133_vm1, %v2160_v46, %v2135_v58  ;;  %v2171_v8 = vperm.slane %v2163_v61, %v4070_v36  ;;  %v2665_v13 = vsel %vm133_vm1, %v2659_v20, %v2640_v44  ;;  %v2671_v18 = vsel %vm133_vm1, %v2670_v55, %v2658_v4 }
 0xae6   :  { %v2167_v15 = vperm.slane %v2161_v5, %v4070_v36  ;;  %v2172_v16 = vrot.slane %v2155_v57, 4  ;;  %v2669_v17 = vperm.slane %v2665_v13, %v4060_v21  ;;  %v2175_v1 = vsel %vm133_vm1, 0.0, %v2174_v10 }
 0xae7   :  { %v2178_v19 = vrot.slane %v2171_v8, 4  ;;  %v2180_v23 = vsel %vm133_vm1, %v2174_v10, %v2155_v57  ;;  %v2675_v25 = vperm.slane %v2671_v18, %v4060_v21  ;;  %v2185_v27 = vrot.slane %v2175_v1, 4 }
 0xae8   :  { %v2176_v7 = vrot.slane %v2167_v15, 4  ;;  %v2173_v28 = vsel %vm133_vm1, 0.0, %v2172_v16  ;;  %v2184_v29 = vperm.slane %v2180_v23, %v4060_v21  ;;  %v2682_v53 = vsel %vm133_vm1, %v2681_v42, %v2662_v14 }
 0xae9   :  { %v2179_v58 = vsel %vm133_vm1, 0.0, %v2178_v19  ;;  %v2191_v3 = vsel %vm133_vm1, %v2178_v19, %v2167_v15  ;;  %v2689_v2 = vrot.slane %v2669_v17, 4  ;;  %v2186_v31 = vsel %vm133_vm1, %v2185_v27, %v2173_v28 }
 0xaea   :  { %v2177_v6 = vsel %vm133_vm1, 0.0, %v2176_v7  ;;  %v2196_v30 = vrot.slane %v2179_v58, 4  ;;  %v2195_v52 = vperm.slane %v2191_v3, %v4060_v21  ;;  %v2190_v32 = vperm.slane %v2186_v31, %v4060_v21 }
 0xaeb   :  { %v2204_v34 = vrot.slane %v2184_v29, 4  ;;  %v2686_v37 = vperm.slane %v2682_v53, %v4060_v21  ;;  %v2690_v47 = vsel %vm133_vm1, %v2675_v25, %v2689_v2  ;;  %v2701_v26 = vrot.slane %v2680_v11, 4 }
 0xaec   :  { %v2197_v9 = vsel %vm133_vm1, %v2196_v30, %v2177_v6  ;;  %v2216_v41 = vrot.slane %v2195_v52, 4  ;;  %v2698_v12 = vperm.slane %v2690_v47, %v4070_v36  ;;  %v2202_v20 = vrot.slane %v2190_v32, 4  ;;  %v2335_v53 = vpop.f32.mrf.mxu3  ;;  %v2720_v30 = vpop.permute.xlu0 %2719 }
 0xaed   :  { %v2201_v43 = vperm.slane %v2197_v9, %v4060_v21  ;;  %v2205_v44 = vsel %vm133_vm1, %v2190_v32, %v2204_v34  ;;  %v2687_v38 = vrot.slane %v2675_v25, 4  ;;  %v2702_v62 = vsel %vm133_vm1, %v2686_v37, %v2701_v26 }
 0xaee   :  { %v2213_v35 = vperm.slane %v2205_v44, %v4070_v36  ;;  %v2699_v59 = vrot.slane %v2686_v37, 4  ;;  %v2717_v63 = vrot.slane %v2698_v12, 4  ;;  %v2203_v14 = vsel %vm133_vm1, %v2202_v20, %v2184_v29 }
 0xaef   :  { %v2217_v50 = vsel %vm133_vm1, %v2201_v43, %v2216_v41  ;;  %v2214_v42 = vrot.slane %v2201_v43, 4  ;;  %v2710_v55 = vperm.slane %v2702_v62, %v4070_v36  ;;  %v2209_v24 = vperm.slane %v2203_v14, %v4070_v36 }
 0xaf0   :  { %v2225_v48 = vperm.slane %v2217_v50, %v4070_v36  ;;  %v2232_v46 = vrot.slane %v2213_v35, 4  ;;  %v2688_v57 = vsel %vm133_vm1, %v2687_v38, %v2669_v17  ;;  %v2700_v8 = vsel %vm133_vm1, %v2699_v59, %v2680_v11 }
 0xaf1   :  { %v2215_v61 = vsel %vm133_vm1, %v2214_v42, %v2195_v52  ;;  %v2715_v4 = vrot.slane %v2710_v55, 4  ;;  %v2694_v5 = vperm.slane %v2688_v57, %v4070_v36  ;;  %v2228_v16 = vrot.slane %v2209_v24, 4 }
 0xaf2   :  { %v2230_v10 = vrot.slane %v2225_v48, 4  ;;  %v2221_v13 = vperm.slane %v2215_v61, %v4070_v36  ;;  %v2233_v15 = vsel %vm133_vm1, %v2225_v48, %v2232_v46  ;;  %v2706_v1 = vperm.slane %v2700_v8, %v4070_v36 }
 0xaf3   :  { %2469 = vmatpush.msra.mxu3 %v2233_v15  ;;  %v4944_v18 = vsel %vm133_vm1, %v2715_v4, %v2698_v12  ;;  %v2713_v17 = vrot.slane %v2694_v5, 4  ;;  %v4948_v19 = vsel %vm133_vm1, %v2710_v55, %v2717_v63  ;;  %v2258_v23 = vadd.f32 %v4841_v56, %v2257_v39 }
 0xaf4   :  { %v2231_v11 = vsel %vm133_vm1, %v2230_v10, %v2213_v35  ;;  %v2226_v25 = vrot.slane %v2221_v13, 4  ;;  %v2229_v7 = vsel %vm133_vm1, %v2221_v13, %v2228_v16  ;;  %v2711_v27 = vrot.slane %v2706_v1, 4 }
 0xaf5   :  { %2446 = vmatpush.msra.mxu2 %v2231_v11  ;;  %2423 = vmatpush.msra.mxu1 %v2229_v7  ;;  %v4954_v28 = vsel %vm133_vm1, %v2706_v1, %v2713_v17  ;;  %v2338_v3 = vsel %vm490_vm2, %v2258_v23, -inf  ;;  %v2336_v2 = vadd.f32 %v4841_v56, %v2335_v53  ;;  %v2733_v38 = vrot.slane %v2720_v30, 4 }
 0xaf6   :  { %v2227_v29 = vsel %vm133_vm1, %v2226_v25, %v2209_v24  ;;  %v4958_v58 = vsel %vm133_vm1, %v2711_v27, %v2694_v5 }
 0xaf7   :  { %2400 = vmatpush.msrb.mxu0 %v2227_v29  ;;  %v2347_v6 = vsel %vm490_vm2, %v2336_v2, -inf }
 0xaf9   :  { %2339 = vmax.xlane.f32.xlu2 %v2338_v3 }
 0xb01   :  { %2348 = vmax.xlane.f32.xlu2 %v2347_v6 }
 0xb02   :  { %v2343_v56 = vpop.xlane.xlu1 %2342 }
 0xb03   :  { %v2351_v12 = vsub.f32 %v4844_v60, %v2343_v56 }
 0xb0a   :  { %v2346_v31 = vpop.xlane.xlu0 %2345 }
 0xb0b   :  { %v2352_v52 = vsub.f32 %v4849_v49, %v2346_v31  ;;  %v2356_v49 = vmul.f32 1.442695, %v2351_v12 }
 0xb0d   :  { %v2358_v32 = vmul.f32 1.442695, %v2352_v52 }
 0xb0f   :  { %3800 = vpow2.f32 %v2358_v32 }
 0xb15   :  { %v4964_v34 = vpop.eup %3800 }
 0xb16   :  { %v2368_v37 = vsel %vm490_vm2, %v4964_v34, 0.0 }
 0xb17   :  { %2369 = vadd.xlane.f32.xlu0 %v2368_v37 }
 0xb19   :  { %2725 = vrot.lane.b32.xlu2 %v4870_v45, %s3928_s19 }
 0xb2a   :  { %v2722_v47 = vpop.permute.xlu2 %2721 }
 0xb2b   :  { %v2745_v14 = vrot.slane %v2722_v47, 4 }
 0xb42   :  { %v2724_v43 = vpop.permute.xlu0 %2723 }
 0xb43   :  { %v2731_v44 = vrot.slane %v2724_v43, 4  ;;  %v2734_v59 = vsel %vm133_vm1, %v2724_v43, %v2733_v38 }
 0xb44   :  { %v2742_v60 = vperm.slane %v2734_v59, %v4060_v21 }
 0xb45   :  { %v2732_v39 = vsel %vm133_vm1, %v2731_v44, %v2720_v30 }
 0xb46   :  { %v2738_v42 = vperm.slane %v2732_v39, %v4060_v21  ;;  %v2769_v57 = vrot.slane %v2742_v60, 4 }
 0xb48   :  { %v2757_v5 = vrot.slane %v2738_v42, 4 }
 0xb6c   :  { %v2340_v9 = vpop.xlane.xlu2 %2339 }
 0xb6d   :  { %v2350_v41 = vsub.f32 %v2258_v23, %v2340_v9 }
 0xb6f   :  { %v2354_v26 = vmul.f32 1.442695, %v2350_v41 }
 0xb71   :  { %3802 = vpow2.f32 %v2354_v26 }
 0xb72   :  { %3804 = vpow2.f32 %v2356_v49 }
 0xb74   :  { %v2349_v20 = vpop.xlane.xlu2 %2348 }
 0xb75   :  { %v2353_v35 = vsub.f32 %v2336_v2, %v2349_v20 }
 0xb77   :  { %v4971_v62 = vpop.eup %3802  ;;  %v2360_v63 = vmul.f32 1.442695, %v2353_v35 }
 0xb78   :  { %v2362_v50 = vsel %vm490_vm2, %v4971_v62, 0.0  ;;  %v4979_v55 = vpop.eup %3804 }
 0xb79   :  { %3806 = vpow2.f32 %v2360_v63  ;;  %2363 = vadd.xlane.f32.xlu1 %v2362_v50  ;;  %v2365_v10 = vsel %vm490_vm2, %v4979_v55, 0.0 }
 0xb7c   :  { %v2726_v48 = vpop.permute.xlu2 %2725 }
 0xb7d   :  { %v2743_v24 = vrot.slane %v2726_v48, 4  ;;  %v2746_v46 = vsel %vm133_vm1, %v2726_v48, %v2745_v14 }
 0xb7e   :  { %v2754_v61 = vperm.slane %v2746_v46, %v4060_v21 }
 0xb7f   :  { %v4983_v4 = vpop.eup %3806  ;;  %v2744_v8 = vsel %vm133_vm1, %v2743_v24, %v2722_v47 }
 0xb80   :  { %v2750_v13 = vperm.slane %v2744_v8, %v4060_v21  ;;  %v2767_v15 = vrot.slane %v2754_v61, 4  ;;  %v2770_v16 = vsel %vm133_vm1, %v2754_v61, %v2769_v57  ;;  %v2371_v1 = vsel %vm490_vm2, %v4983_v4, 0.0 }
 0xb81   :  { %v2778_v17 = vperm.slane %v2770_v16, %v4070_v36  ;;  %2366 = vadd.xlane.f32.xlu1 %v2365_v10  ;;  %2372 = vadd.xlane.f32.xlu2 %v2371_v1 }
 0xb82   :  { %v2755_v23 = vrot.slane %v2750_v13, 4  ;;  %v2758_v11 = vsel %vm133_vm1, %v2750_v13, %v2757_v5  ;;  %v2768_v25 = vsel %vm133_vm1, %v2767_v15, %v2742_v60 }
 0xb83   :  { %v2766_v7 = vperm.slane %v2758_v11, %v4070_v36  ;;  %v2774_v27 = vperm.slane %v2768_v25, %v4070_v36  ;;  %v2785_v29 = vrot.slane %v2778_v17, 4 }
 0xb84   :  { %v2756_v3 = vsel %vm133_vm1, %v2755_v23, %v2738_v42 }
 0xb85   :  { %v2762_v53 = vperm.slane %v2756_v3, %v4070_v36  ;;  %v2781_v2 = vrot.slane %v2766_v7, 4  ;;  %v2783_v6 = vrot.slane %v2774_v27, 4  ;;  %v2786_v30 = vsel %vm133_vm1, 0.0, %v2785_v29 }
 0xb86   :  { %v2798_v31 = vsel %vm133_vm1, %v2785_v29, %v2774_v27  ;;  %v2803_v52 = vrot.slane %v2786_v30, 4 }
 0xb87   :  { %v2779_v32 = vrot.slane %v2762_v53, 4  ;;  %v2782_v37 = vsel %vm133_vm1, 0.0, %v2781_v2  ;;  %v2784_v47 = vsel %vm133_vm1, 0.0, %v2783_v6  ;;  %v2787_v56 = vsel %vm133_vm1, %v2781_v2, %v2762_v53 }
 0xb88   :  { %v2792_v9 = vrot.slane %v2782_v37, 4  ;;  %v2802_v41 = vperm.slane %v2798_v31, %v4060_v21  ;;  %v2804_v12 = vsel %vm133_vm1, %v2803_v52, %v2784_v47  ;;  %v2791_v26 = vperm.slane %v2787_v56, %v4060_v21 }
 0xb89   :  { %v2780_v43 = vsel %vm133_vm1, 0.0, %v2779_v32  ;;  %v2808_v49 = vperm.slane %v2804_v12, %v4060_v21 }
 0xb8a   :  { %v2823_v44 = vrot.slane %v2802_v41, 4  ;;  %v2370_v20 = vpop.xlane.xlu0 %2369  ;;  %v2793_v38 = vsel %vm133_vm1, %v2792_v9, %v2780_v43  ;;  %v2811_v35 = vrot.slane %v2791_v26, 4 }
 0xb8b   :  { %3808 = vrcp.f32 %v2370_v20  ;;  %v2797_v59 = vperm.slane %v2793_v38, %v4060_v21  ;;  %v2821_v63 = vrot.slane %v2808_v49, 4 }
 0xb8c   :  { %v2824_v39 = vsel %vm133_vm1, %v2808_v49, %v2823_v44 }
 0xb8d   :  { %v2812_v50 = vsel %vm133_vm1, %v2797_v59, %v2811_v35  ;;  %v2832_v60 = vperm.slane %v2824_v39, %v4070_v36  ;;  %v2809_v14 = vrot.slane %v2797_v59, 4  ;;  %v2822_v42 = vsel %vm133_vm1, %v2821_v63, %v2802_v41 }
 0xb8e   :  { %v2820_v48 = vperm.slane %v2812_v50, %v4070_v36  ;;  %v2828_v24 = vperm.slane %v2822_v42, %v4070_v36 }
 0xb8f   :  { %v2837_v46 = vrot.slane %v2832_v60, 4  ;;  %v2810_v57 = vsel %vm133_vm1, %v2809_v14, %v2791_v26 }
 0xb90   :  { %v2816_v61 = vperm.slane %v2810_v57, %v4070_v36  ;;  %v2833_v5 = vrot.slane %v2828_v24, 4  ;;  %v2839_v8 = vrot.slane %v2820_v48, 4 }
 0xb91   :  { %v3809_v10 = vpop.eup %3808  ;;  %v2838_v13 = vsel %vm133_vm1, %v2837_v46, %v2820_v48 }
 0xb92   :  { %v2380_v15 = vmul.f32 %v3809_v10, %v4964_v34  ;;  %3648 = vmatpush.xpose.msk.msrb.mxu2 %vm490_vm2, %v2838_v13  ;;  %v2834_v16 = vsel %vm133_vm1, %v2833_v5, %v2816_v61  ;;  %v2840_v1 = vsel %vm133_vm1, %v2832_v60, %v2839_v8  ;;  %v2835_v17 = vrot.slane %v2816_v61, 4 }
 0xb93   :  { %3644 = vmatpush.xpose.msk.msra.mxu0 %vm490_vm2, %v2834_v16  ;;  %3650 = vmatpush.xpose.msk.msrb.mxu3 %vm490_vm2, %v2840_v1  ;;  %v3730_v34 = vpack.i.bf16 %v4853_v0, %v4825_v33 }
 0xb94   :  { %3642 = vmatmul.msk.f32.vlgmr.msra.gmra.mxu2 %vm490_vm2, %v2380_v15  ;;  %v2836_v23 = vsel %vm133_vm1, %v2828_v24, %v2835_v17 }
 0xb95   :  { %3646 = vmatpush.xpose.msk.msrb.mxu1 %vm490_vm2, %v2836_v23 }
 0xb99   :  { %3731 = vrot.lane.b32.xlu2 %v3730_v34, %s3932_s0 }
 0xb9c   :  { %3649 = vmatmul.msk.f32.vlgmr.msrb.gmra.mxu2 %vm490_vm2, %v4944_v18 }
 0xbec   :  { %v2364_v11 = vpop.xlane.xlu1 %2363 }
 0xbed   :  { %3810 = vrcp.f32 %v2364_v11 }
 0xbf3   :  { %v3811_v25 = vpop.eup %3810 }
 0xbf4   :  { %v2378_v7 = vmul.f32 %v3811_v25, %v4971_v62  ;;  %v2367_v27 = vpop.xlane.xlu1 %2366  ;;  %v2373_v29 = vpop.xlane.xlu2 %2372 }
 0xbf5   :  { %3812 = vrcp.f32 %v2367_v27 }
 0xbf6   :  { %3814 = vrcp.f32 %v2373_v29  ;;  %3640 = vmatmul.msk.f32.vlgmr.msrb.gmra.mxu0 %vm490_vm2, %v2378_v7 }
 0xbfb   :  { %v3813_v3 = vpop.eup %3812 }
 0xbfc   :  { %v3815_v53 = vpop.eup %3814  ;;  %v2379_v33 = vmul.f32 %v3813_v3, %v4979_v55 }
 0xbfd   :  { %v2381_v0 = vmul.f32 %v3815_v53, %v4983_v4  ;;  %v3843_v4 = vld [vmem:[%s5329_s1 + $0x1] ss:$0 sm:$0xff] }
 0xbfe   :  { %3641 = vmatmul.msk.f32.vlgmr.msra.gmra.mxu1 %vm490_vm2, %v2379_v33  ;;  %3645 = vmatmul.msk.f32.vlgmr.msra.gmra.mxu0 %vm490_vm2, %v4958_v58 }
 0xbff   :  { %3643 = vmatmul.msk.f32.vlgmr.msra.gmra.mxu3 %vm490_vm2, %v2381_v0 }
 0xc06   :  { %3647 = vmatmul.msk.f32.vlgmr.msrb.gmra.mxu1 %vm490_vm2, %v4954_v28 }
 0xc07   :  { %3651 = vmatmul.msk.f32.vlgmr.msrb.gmra.mxu3 %vm490_vm2, %v4948_v19 }
 0xc17   :  { %v2448_v62 = vpop.f32.mrf.mxu2 }
 0xc18   :  { %v2474_v30 = vrot.slane %v2448_v62, 4 }
 0xc1f   :  { %v3038_v52 = vpop.f32.mrf.mxu2 }
 0xc20   :  { %v5056_v37 = vadd.f32 %v3843_v4, %v3038_v52 }
 0xc22   :  { %v3073_v35 = vsel %vm490_vm2, %v5056_v37, -inf }
 0xc73   :  { %v2402_v18 = vpop.f32.mrf.mxu0 }
 0xc74   :  { %v2476_v2 = vrot.slane %v2402_v18, 4  ;;  %v2475_v28 = vsel %vm133_vm1, %v2474_v30, %v2402_v18 }
 0xc75   :  { %v2481_v47 = vperm.slane %v2475_v28, %v4060_v21 }
 0xc76   :  { %v2477_v58 = vsel %vm133_vm1, %v2448_v62, %v2476_v2 }
 0xc77   :  { %v2485_v32 = vperm.slane %v2477_v58, %v4060_v21  ;;  %v2500_v20 = vrot.slane %v2481_v47, 4 }
 0xc79   :  { %v2512_v43 = vrot.slane %v2485_v32, 4 }
 0xc7b   :  { %v2425_v6 = vpop.f32.mrf.mxu1  ;;  %v2986_v55 = vpop.f32.mrf.mxu0 }
 0xc7c   :  { %v5049_v31 = vadd.f32 %v3843_v4, %v2986_v55  ;;  %v2488_v56 = vrot.slane %v2425_v6, 4 }
 0xc7e   :  { %v3067_v19 = vsel %vm490_vm2, %v5049_v31, -inf }
 0xc7f   :  { %3068 = vmax.xlane.f32.xlu1 %v3067_v19 }
 0xc82   :  { %v2471_v9 = vpop.f32.mrf.mxu3 }
 0xc83   :  { %v2486_v41 = vrot.slane %v2471_v9, 4  ;;  %v2489_v12 = vsel %vm133_vm1, %v2471_v9, %v2488_v56  ;;  %v3012_v26 = vpop.f32.mrf.mxu1 }
 0xc84   :  { %v2497_v49 = vperm.slane %v2489_v12, %v4060_v21  ;;  %v5061_v44 = vadd.f32 %v3843_v4, %v3012_v26 }
 0xc85   :  { %v2487_v38 = vsel %vm133_vm1, %v2486_v41, %v2425_v6 }
 0xc86   :  { %v2493_v59 = vperm.slane %v2487_v38, %v4060_v21  ;;  %v2510_v63 = vrot.slane %v2497_v49, 4  ;;  %v2513_v39 = vsel %vm133_vm1, %v2497_v49, %v2512_v43  ;;  %v3070_v50 = vsel %vm490_vm2, %v5061_v44, -inf }
 0xc87   :  { %v2521_v60 = vperm.slane %v2513_v39, %v4070_v36  ;;  %3071 = vmax.xlane.f32.xlu0 %v3070_v50  ;;  %3074 = vmax.xlane.f32.xlu1 %v3073_v35  ;;  %v3735_v43 = vpack.i.bf16 %v4870_v45, %v4855_v51 }
 0xc88   :  { %v2498_v14 = vrot.slane %v2493_v59, 4  ;;  %v2501_v42 = vsel %vm133_vm1, %v2493_v59, %v2500_v20  ;;  %v2511_v48 = vsel %vm133_vm1, %v2510_v63, %v2485_v32 }
 0xc89   :  { %v2509_v24 = vperm.slane %v2501_v42, %v4070_v36  ;;  %v2517_v46 = vperm.slane %v2511_v48, %v4070_v36  ;;  %v2528_v57 = vrot.slane %v2521_v60, 4 }
 0xc8a   :  { %v2499_v61 = vsel %vm133_vm1, %v2498_v14, %v2481_v47  ;;  %v3064_v5 = vpop.f32.mrf.mxu3 }
 0xc8b   :  { %v2505_v8 = vperm.slane %v2499_v61, %v4070_v36  ;;  %v2524_v10 = vrot.slane %v2509_v24, 4  ;;  %v2526_v13 = vrot.slane %v2517_v46, 4  ;;  %v2529_v15 = vsel %vm133_vm1, 0.0, %v2528_v57 }
 0xc8c   :  { %v2546_v16 = vrot.slane %v2529_v15, 4  ;;  %v3065_v1 = vadd.f32 %v3843_v4, %v3064_v5  ;;  %v2541_v17 = vsel %vm133_vm1, %v2528_v57, %v2517_v46 }
 0xc8d   :  { %v2522_v23 = vrot.slane %v2505_v8, 4  ;;  %v2525_v34 = vsel %vm133_vm1, 0.0, %v2524_v10  ;;  %v2527_v11 = vsel %vm133_vm1, 0.0, %v2526_v13  ;;  %v2530_v25 = vsel %vm133_vm1, %v2524_v10, %v2505_v8 }
 0xc8e   :  { %v2535_v7 = vrot.slane %v2525_v34, 4  ;;  %v3076_v27 = vsel %vm490_vm2, %v3065_v1, -inf  ;;  %v2534_v29 = vperm.slane %v2530_v25, %v4060_v21  ;;  %v2545_v3 = vperm.slane %v2541_v17, %v4060_v21 }
 0xc8f   :  { %3077 = vmax.xlane.f32.xlu1 %v3076_v27  ;;  %v2523_v53 = vsel %vm133_vm1, 0.0, %v2522_v23  ;;  %v2547_v33 = vsel %vm133_vm1, %v2546_v16, %v2527_v11 }
 0xc90   :  { %v2536_v0 = vsel %vm133_vm1, %v2535_v7, %v2523_v53  ;;  %v2551_v18 = vperm.slane %v2547_v33, %v4060_v21  ;;  %v2554_v62 = vrot.slane %v2534_v29, 4  ;;  %v2566_v2 = vrot.slane %v2545_v3, 4 }
 0xc91   :  { %v2540_v6 = vperm.slane %v2536_v0, %v4060_v21 }
 0xc92   :  { %v2564_v55 = vrot.slane %v2551_v18, 4  ;;  %v2567_v30 = vsel %vm133_vm1, %v2551_v18, %v2566_v2 }
 0xc93   :  { %v2552_v4 = vrot.slane %v2540_v6, 4  ;;  %v2555_v58 = vsel %vm133_vm1, %v2540_v6, %v2554_v62  ;;  %v2575_v52 = vperm.slane %v2567_v30, %v4070_v36 }
 0xc94   :  { %v2565_v28 = vsel %vm133_vm1, %v2564_v55, %v2545_v3  ;;  %v2563_v19 = vperm.slane %v2555_v58, %v4070_v36 }
 0xc95   :  { %v2553_v32 = vsel %vm133_vm1, %v2552_v4, %v2534_v29  ;;  %v2571_v47 = vperm.slane %v2565_v28, %v4070_v36  ;;  %v2580_v56 = vrot.slane %v2575_v52, 4 }
 0xc96   :  { %v2559_v9 = vperm.slane %v2553_v32, %v4070_v36  ;;  %v2582_v38 = vrot.slane %v2563_v19, 4 }
 0xc97   :  { %v2576_v41 = vrot.slane %v2571_v47, 4  ;;  %v5099_v12 = vsel %vm133_vm1, %v2580_v56, %v2563_v19 }
 0xc98   :  { %v2578_v49 = vrot.slane %v2559_v9, 4  ;;  %v2583_v35 = vsel %vm133_vm1, %v2575_v52, %v2582_v38 }
 0xc99   :  { %v5102_v26 = vsel %vm133_vm1, %v2576_v41, %v2559_v9 }
 0xc9a   :  { %v2579_v20 = vsel %vm133_vm1, %v2571_v47, %v2578_v49 }
 0xca8   :  { %3736 = vrot.lane.b32.xlu1 %v3735_v43, %s3932_s0 }
 0xcb0   :  { %2585 = vrot.lane.b32.xlu1 %v2579_v20, %s3924_s22 }
 0xcb8   :  { %2593 = vrot.lane.b32.xlu1 %v2583_v35, %s3935_s29 }
 0xcf2   :  { %v3069_v59 = vpop.xlane.xlu1 %3068 }
 0xcf3   :  { %v3079_v57 = vsub.f32 %v5049_v31, %v3069_v59  ;;  %v3732_v31 = vpop.permute.xlu2 %3731 }
 0xcf4   :  { %v3734_v13 = vunpack.i.h.bf16 %v3732_v31  ;;  %v3733_v15 = vunpack.i.l.bf16 %v3732_v31 }
 0xcf6   :  { %v2867_v17 = vrot.slane %v3734_v13, 4  ;;  %v2855_v23 = vrot.slane %v3733_v15, 4 }
 0xcfa   :  { %v3072_v63 = vpop.xlane.xlu0 %3071  ;;  %v3075_v39 = vpop.xlane.xlu1 %3074 }
 0xcfb   :  { %v3080_v50 = vsub.f32 %v5061_v44, %v3072_v63  ;;  %v3081_v60 = vsub.f32 %v5056_v37, %v3075_v39  ;;  %v3083_v44 = vmul.f32 1.442695, %v3079_v57 }
 0xcfd   :  { %v3085_v51 = vmul.f32 1.442695, %v3080_v50  ;;  %v3087_v45 = vmul.f32 1.442695, %v3081_v60 }
 0xcff   :  { %3816 = vpow2.f32 %v3085_v51 }
 0xd00   :  { %3818 = vpow2.f32 %v3087_v45 }
 0xd02   :  { %v3078_v14 = vpop.xlane.xlu1 %3077 }
 0xd03   :  { %v3082_v42 = vsub.f32 %v3065_v1, %v3078_v14 }
 0xd05   :  { %v5113_v48 = vpop.eup %3816  ;;  %v3089_v24 = vmul.f32 1.442695, %v3082_v42 }
 0xd06   :  { %v5115_v46 = vpop.eup %3818  ;;  %v3094_v61 = vsel %vm490_vm2, %v5113_v48, 0.0 }
 0xd07   :  { %3820 = vpow2.f32 %v3089_v24  ;;  %3095 = vadd.xlane.f32.xlu2 %v3094_v61  ;;  %v3097_v37 = vsel %vm490_vm2, %v5115_v46, 0.0 }
 0xd08   :  { %3098 = vadd.xlane.f32.xlu0 %v3097_v37  ;;  %3822 = vpow2.f32 %v3083_v44 }
 0xd0d   :  { %v5122_v5 = vpop.eup %3820 }
 0xd0e   :  { %v3100_v8 = vsel %vm490_vm2, %v5122_v5, 0.0  ;;  %v5126_v10 = vpop.eup %3822 }
 0xd0f   :  { %v3091_v16 = vsel %vm490_vm2, %v5126_v10, 0.0 }
 0xd10   :  { %3101 = vadd.xlane.f32.xlu0 %v3100_v8 }
 0xd18   :  { %3092 = vadd.xlane.f32.xlu0 %v3091_v16 }
 0xd1a   :  { %v3737_v1 = vpop.permute.xlu1 %3736 }
 0xd1b   :  { %v3739_v34 = vunpack.i.h.bf16 %v3737_v1  ;;  %v3738_v11 = vunpack.i.l.bf16 %v3737_v1 }
 0xd1d   :  { %v2865_v25 = vrot.slane %v3739_v34, 4  ;;  %v2868_v7 = vsel %vm133_vm1, %v3739_v34, %v2867_v17  ;;  %v2853_v27 = vrot.slane %v3738_v11, 4  ;;  %v2856_v29 = vsel %vm133_vm1, %v3738_v11, %v2855_v23 }
 0xd1e   :  { %v2876_v3 = vperm.slane %v2868_v7, %v4060_v21  ;;  %v2864_v53 = vperm.slane %v2856_v29, %v4060_v21 }
 0xd1f   :  { %v2866_v33 = vsel %vm133_vm1, %v2865_v25, %v3734_v13  ;;  %v2854_v0 = vsel %vm133_vm1, %v2853_v27, %v3733_v15 }
 0xd20   :  { %v2872_v18 = vperm.slane %v2866_v33, %v4060_v21  ;;  %v2889_v62 = vrot.slane %v2876_v3, 4  ;;  %v2860_v2 = vperm.slane %v2854_v0, %v4060_v21  ;;  %v2891_v6 = vrot.slane %v2864_v53, 4  ;;  %v3659_v33 = vld [vmem:[%s5332_s4 + $0x38] sm:$0xff]  ;;  %v3658_v0 = vld [vmem:[%s5332_s4 + $0x30] sm:$0xff] }
 0xd22   :  { %v2877_v55 = vrot.slane %v2872_v18, 4  ;;  %v2879_v30 = vrot.slane %v2860_v2, 4  ;;  %v2890_v4 = vsel %vm133_vm1, %v2889_v62, %v2864_v53  ;;  %v2892_v58 = vsel %vm133_vm1, %v2876_v3, %v2891_v6  ;;  %v3656_v6 = vld [vmem:[%s5332_s4 + $0x20] sm:$0xff] }
 0xd23   :  { %v2896_v52 = vperm.slane %v2890_v4, %v4070_v36  ;;  %v2900_v28 = vperm.slane %v2892_v58, %v4070_v36 }
 0xd24   :  { %v2878_v19 = vsel %vm133_vm1, %v2877_v55, %v2860_v2  ;;  %v2880_v32 = vsel %vm133_vm1, %v2872_v18, %v2879_v30  ;;  %v3657_v18 = vld [vmem:[%s5332_s4 + $0x28] sm:$0xff] }
 0xd25   :  { %v2884_v47 = vperm.slane %v2878_v19, %v4070_v36  ;;  %v2888_v56 = vperm.slane %v2880_v32, %v4070_v36  ;;  %v2905_v9 = vrot.slane %v2896_v52, 4  ;;  %v2907_v41 = vrot.slane %v2900_v28, 4 }
 0xd27   :  { %v2901_v43 = vrot.slane %v2884_v47, 4  ;;  %v2903_v49 = vrot.slane %v2888_v56, 4  ;;  %v2908_v20 = vsel %vm133_vm1, 0.0, %v2907_v41  ;;  %v2920_v38 = vsel %vm133_vm1, %v2907_v41, %v2896_v52 }
 0xd28   :  { %v2925_v35 = vrot.slane %v2908_v20, 4  ;;  %v2906_v63 = vsel %vm133_vm1, 0.0, %v2905_v9  ;;  %v2924_v50 = vperm.slane %v2920_v38, %v4060_v21  ;;  %v2586_v9 = vpop.permute.xlu1 %2585 }
 0xd29   :  { %v2904_v59 = vsel %vm133_vm1, 0.0, %v2903_v49  ;;  %v2909_v39 = vsel %vm133_vm1, %v2903_v49, %v2884_v47  ;;  %v2902_v14 = vsel %vm133_vm1, 0.0, %v2901_v43 }
 0xd2a   :  { %v2914_v60 = vrot.slane %v2904_v59, 4  ;;  %v2913_v51 = vperm.slane %v2909_v39, %v4060_v21  ;;  %v2926_v45 = vsel %vm133_vm1, %v2925_v35, %v2906_v63  ;;  %v2945_v24 = vrot.slane %v2924_v50, 4 }
 0xd2b   :  { %v2930_v42 = vperm.slane %v2926_v45, %v4060_v21 }
 0xd2c   :  { %2589 = vrot.lane.b32.xlu0 %v5099_v12, %s3926_s25  ;;  %v2915_v57 = vsel %vm133_vm1, %v2914_v60, %v2902_v14  ;;  %v2933_v61 = vrot.slane %v2913_v51, 4 }
 0xd2d   :  { %v2919_v37 = vperm.slane %v2915_v57, %v4060_v21  ;;  %v2946_v44 = vsel %vm133_vm1, %v2930_v42, %v2945_v24  ;;  %v2943_v8 = vrot.slane %v2930_v42, 4 }
 0xd2e   :  { %v2954_v31 = vperm.slane %v2946_v44, %v4070_v36 }
 0xd2f   :  { %v2934_v13 = vsel %vm133_vm1, %v2919_v37, %v2933_v61  ;;  %v2931_v15 = vrot.slane %v2919_v37, 4  ;;  %v2944_v16 = vsel %vm133_vm1, %v2943_v8, %v2924_v50 }
 0xd30   :  { %v2942_v1 = vperm.slane %v2934_v13, %v4070_v36  ;;  %v2959_v17 = vrot.slane %v2954_v31, 4  ;;  %v2950_v12 = vperm.slane %v2944_v16, %v4070_v36  ;;  %v2594_v41 = vpop.permute.xlu1 %2593 }
 0xd31   :  { %v2932_v23 = vsel %vm133_vm1, %v2931_v15, %v2913_v51 }
 0xd32   :  { %v2960_v34 = vsel %vm133_vm1, %v2959_v17, %v2942_v1  ;;  %v2938_v11 = vperm.slane %v2932_v23, %v4070_v36  ;;  %v2955_v25 = vrot.slane %v2950_v12, 4  ;;  %v2961_v7 = vrot.slane %v2942_v1, 4 }
 0xd33   :  { %3175 = vmatpush.msra.mxu2 %v2960_v34 }
 0xd34   :  { %v2956_v27 = vsel %vm133_vm1, %v2955_v25, %v2938_v11  ;;  %v2962_v29 = vsel %vm133_vm1, %v2954_v31, %v2961_v7  ;;  %v2957_v3 = vrot.slane %v2938_v11, 4 }
 0xd35   :  { %3129 = vmatpush.msrb.mxu0 %v2956_v27  ;;  %3198 = vmatpush.msra.mxu3 %v2962_v29 }
 0xd36   :  { %v2958_v53 = vsel %vm133_vm1, %v2950_v12, %v2957_v3 }
 0xd37   :  { %3152 = vmatpush.msra.mxu1 %v2958_v53  ;;  %3356 = vmatpush.msra.mxu0 %v3659_v33 }
 0xd39   :  { %3357 = vmatpush.msra.mxu0 %v3658_v0 }
 0xd3b   :  { %3358 = vmatpush.msra.mxu0 %v3657_v18 }
 0xd3d   :  { %3359 = vmatpush.msra.mxu0 %v3656_v6 }
 0xd7a   :  { %v3096_v62 = vpop.xlane.xlu2 %3095 }
 0xd7b   :  { %3824 = vrcp.f32 %v3096_v62  ;;  %v3099_v2 = vpop.xlane.xlu0 %3098 }
 0xd7c   :  { %3826 = vrcp.f32 %v3099_v2 }
 0xd81   :  { %v3825_v55 = vpop.eup %3824 }
 0xd82   :  { %v3827_v30 = vpop.eup %3826  ;;  %v3108_v4 = vmul.f32 %v3825_v55, %v5113_v48  ;;  %v2596_v48 = vsel %vm490_vm2, %v5102_v26, %v2586_v9 }
 0xd83   :  { %v3109_v58 = vmul.f32 %v3827_v30, %v5115_v46  ;;  %v3102_v52 = vpop.xlane.xlu0 %3101 }
 0xd84   :  { %3828 = vrcp.f32 %v3102_v52  ;;  %3653 = vmatmul.msk.f32.vlgmr.msra.gmra.mxu1 %vm490_vm2, %v3108_v4 }
 0xd85   :  { %3654 = vmatmul.msk.f32.vlgmr.msra.gmra.mxu2 %vm490_vm2, %v3109_v58 }
 0xd8a   :  { %v3829_v28 = vpop.eup %3828 }
 0xd8b   :  { %v3110_v19 = vmul.f32 %v3829_v28, %v5122_v5  ;;  %v3093_v32 = vpop.xlane.xlu0 %3092 }
 0xd8c   :  { %3830 = vrcp.f32 %v3093_v32 }
 0xd8d   :  { %3655 = vmatmul.msk.f32.vlgmr.msra.gmra.mxu3 %vm490_vm2, %v3110_v19 }
 0xd92   :  { %v3831_v47 = vpop.eup %3830 }
 0xd93   :  { %v3107_v56 = vmul.f32 %v3831_v47, %v5126_v10 }
 0xd95   :  { %3652 = vmatmul.msk.f32.vlgmr.msrb.gmra.mxu0 %vm490_vm2, %v3107_v56 }
 0xd9e   :  { %v2590_v46 = vpop.permute.xlu0 %2589 }
 0xd9f   :  { %v2597_v43 = vsel %vm854_vm3, %v2596_v48, %v2590_v46 }
 0xda0   :  { %v2598_v49 = vsel %vm856_vm4, %v2597_v43, %v2594_v41 }
 0xda1   :  { %3661 = vmatmul.msk.f32.vlgmr.msra.gmra.mxu0 %vm92_vm0, %v2598_v49 }
 0xe01   :  { %v3154_v5 = vpop.f32.mrf.mxu1 }
 0xe02   :  { %v3217_v38 = vrot.slane %v3154_v5, 4 }
 0xe08   :  { %v3177_v20 = vpop.f32.mrf.mxu2 }
 0xe09   :  { %v3203_v59 = vrot.slane %v3177_v20, 4 }
 0xe10   :  { %v3200_v35 = vpop.f32.mrf.mxu3 }
 0xe11   :  { %v3215_v10 = vrot.slane %v3200_v35, 4  ;;  %v3218_v63 = vsel %vm133_vm1, %v3200_v35, %v3217_v38 }
 0xe12   :  { %v3226_v39 = vperm.slane %v3218_v63, %v4060_v21  ;;  %v3131_v50 = vpop.f32.mrf.mxu0 }
 0xe13   :  { %v3216_v26 = vsel %vm133_vm1, %v3215_v10, %v3154_v5  ;;  %v3204_v60 = vsel %vm133_vm1, %v3203_v59, %v3131_v50  ;;  %v3205_v51 = vrot.slane %v3131_v50, 4 }
 0xe14   :  { %v3222_v45 = vperm.slane %v3216_v26, %v4060_v21  ;;  %v3210_v14 = vperm.slane %v3204_v60, %v4060_v21  ;;  %v3239_v57 = vrot.slane %v3226_v39, 4 }
 0xe15   :  { %v3206_v42 = vsel %vm133_vm1, %v3177_v20, %v3205_v51 }
 0xe16   :  { %v3227_v24 = vrot.slane %v3222_v45, 4  ;;  %v3214_v61 = vperm.slane %v3206_v42, %v4060_v21  ;;  %v3229_v37 = vrot.slane %v3210_v14, 4 }
 0xe18   :  { %v3228_v44 = vsel %vm133_vm1, %v3227_v24, %v3210_v14  ;;  %v3230_v8 = vsel %vm133_vm1, %v3222_v45, %v3229_v37  ;;  %v3240_v31 = vsel %vm133_vm1, %v3239_v57, %v3214_v61  ;;  %v3241_v13 = vrot.slane %v3214_v61, 4 }
 0xe19   :  { %v3234_v15 = vperm.slane %v3228_v44, %v4070_v36  ;;  %v3238_v16 = vperm.slane %v3230_v8, %v4070_v36  ;;  %v3246_v1 = vperm.slane %v3240_v31, %v4070_v36 }
 0xe1a   :  { %v3242_v17 = vsel %vm133_vm1, %v3226_v39, %v3241_v13 }
 0xe1b   :  { %v3250_v12 = vperm.slane %v3242_v17, %v4070_v36  ;;  %v3251_v23 = vrot.slane %v3234_v15, 4  ;;  %v3253_v34 = vrot.slane %v3238_v16, 4  ;;  %v3255_v25 = vrot.slane %v3246_v1, 4  ;;  %v3668_v16 = vld [vmem:[%s5336_s8 + $0x38] sm:$0xff]  ;;  %v3666_v17 = vld [vmem:[%s5336_s8 + $0x28] sm:$0xff] }
 0xe1c   :  { %3455 = vmatpush.msrb.mxu1 %v3668_v16 }
 0xe1d   :  { %v3254_v11 = vsel %vm133_vm1, 0.0, %v3253_v34  ;;  %v3257_v7 = vrot.slane %v3250_v12, 4  ;;  %v3259_v27 = vsel %vm133_vm1, %v3253_v34, %v3234_v15  ;;  %v3252_v53 = vsel %vm133_vm1, 0.0, %v3251_v23 }
 0xe1e   :  { %v3264_v29 = vrot.slane %v3254_v11, 4  ;;  %v3263_v3 = vperm.slane %v3259_v27, %v4060_v21  ;;  %v3256_v6 = vsel %vm133_vm1, 0.0, %v3255_v25  ;;  %v3361_v63 = vpop.f32.mrf.mxu0 }
 0xe1f   :  { %v3258_v33 = vsel %vm133_vm1, 0.0, %v3257_v7  ;;  %v3270_v0 = vsel %vm133_vm1, %v3257_v7, %v3246_v1  ;;  %v3667_v1 = vld [vmem:[%s5336_s8 + $0x30] sm:$0xff] }
 0xe20   :  { %v3275_v18 = vrot.slane %v3258_v33, 4  ;;  %v3265_v62 = vsel %vm133_vm1, %v3264_v29, %v3252_v53  ;;  %v3274_v2 = vperm.slane %v3270_v0, %v4060_v21  ;;  %v3283_v30 = vrot.slane %v3263_v3, 4  ;;  %3456 = vmatpush.msrb.mxu1 %v3667_v1  ;;  %v3752_v53 = vld [vmem:[%s5334_s6 + $0x1] ss:$0 sm:$0xff] }
 0xe21   :  { %v3269_v55 = vperm.slane %v3265_v62, %v4060_v21 }
 0xe22   :  { %v3276_v4 = vsel %vm133_vm1, %v3275_v18, %v3256_v6  ;;  %v3295_v58 = vrot.slane %v3274_v2, 4  ;;  %3457 = vmatpush.msrb.mxu1 %v3666_v17  ;;  %v3753_v18 = vld [vmem:[%s5335_s7 + $0x1] ss:$0 sm:$0xff]  ;;  %v3679_v6 = vld [vmem:[%s5338_s10 + $0x78] sm:$0xff] }
 0xe23   :  { %v3280_v52 = vperm.slane %v3276_v4, %v4060_v21  ;;  %v3281_v28 = vrot.slane %v3269_v55, 4  ;;  %v3284_v19 = vsel %vm133_vm1, %v3269_v55, %v3283_v30  ;;  %v3678_v55 = vld [vmem:[%s5338_s10 + $0x70] sm:$0xff]  ;;  %3496 = vmatpush.msrb.mxu2 %v3679_v6  ;;  %v3677_v30 = vld [vmem:[%s5338_s10 + $0x68] sm:$0xff]  ;;  %v3676_v4 = vld [vmem:[%s5338_s10 + $0x60] sm:$0xff] }
 0xe24   :  { %v3292_v41 = vperm.slane %v3284_v19, %v4070_v36 }
 0xe25   :  { %v3296_v32 = vsel %vm133_vm1, %v3280_v52, %v3295_v58  ;;  %v3282_v47 = vsel %vm133_vm1, %v3281_v28, %v3263_v3  ;;  %v3293_v56 = vrot.slane %v3280_v52, 4  ;;  %3497 = vmatpush.msrb.mxu2 %v3678_v55  ;;  %v3675_v58 = vld [vmem:[%s5338_s10 + $0x58] sm:$0xff]  ;;  %v3757_v55 = vld [vmem:[#allocation5 + $0x1] ss:$0 sm:$0xff] }
 0xe26   :  { %v3304_v9 = vperm.slane %v3296_v32, %v4070_v36  ;;  %v3288_v48 = vperm.slane %v3282_v47, %v4070_v36  ;;  %v3311_v59 = vrot.slane %v3292_v41, 4 }
 0xe27   :  { %v3294_v46 = vsel %vm133_vm1, %v3293_v56, %v3274_v2  ;;  %3498 = vmatpush.msrb.mxu2 %v3677_v30  ;;  %v3674_v56 = vld [vmem:[%s5338_s10 + $0x50] sm:$0xff] }
 0xe28   :  { %v3309_v43 = vrot.slane %v3304_v9, 4  ;;  %v3300_v49 = vperm.slane %v3294_v46, %v4070_v36  ;;  %v3307_v21 = vrot.slane %v3288_v48, 4  ;;  %v3312_v10 = vsel %vm133_vm1, %v3304_v9, %v3311_v59  ;;  %v3751_v36 = vld [vmem:[%s5333_s5 + $0x1] ss:$0 sm:$0xff]  ;;  %v3673_v9 = vld [vmem:[%s5338_s10 + $0x48] sm:$0xff] }
 0xe29   :  { %v3362_v39 = vadd.f32 %v3751_v36, %v3361_v63  ;;  %3499 = vmatpush.msrb.mxu2 %v3676_v4  ;;  %v3754_v46 = vld [vmem:[%s5337_s9 + $0x1] ss:$0 sm:$0xff] }
 0xe2a   :  { %v3310_v5 = vsel %vm133_vm1, %v3309_v43, %v3292_v41  ;;  %v3305_v20 = vrot.slane %v3300_v49, 4  ;;  %v3308_v38 = vsel %vm133_vm1, %v3300_v49, %v3307_v21 }
 0xe2b   :  { %3318 = vrot.lane.b32.xlu0 %v3310_v5, %s3926_s25  ;;  %3314 = vrot.lane.b32.xlu1 %v3308_v38, %s3924_s22  ;;  %v3367_v50 = vadd.f32 %v3362_v39, %v4675_v54 }
 0xe2c   :  { %v3306_v35 = vsel %vm133_vm1, %v3305_v20, %v3288_v48  ;;  %3500 = vmatpush.msrb.mxu2 %v3675_v58  ;;  %v3672_v48 = vld [vmem:[%s5338_s10 + $0x40] sm:$0xff] }
 0xe2d   :  { %v3373_v26 = vsel %vm92_vm0, %v3367_v50, 0.0 }
 0xe2e   :  { %3501 = vmatpush.msrb.mxu2 %v3674_v56 }
 0xe30   :  { %3502 = vmatpush.msrb.mxu2 %v3673_v9 }
 0xe32   :  { %3503 = vmatpush.msrb.mxu2 %v3672_v48 }
 0xe33   :  { %3322 = vrot.lane.b32.xlu1 %v3312_v10, %s3935_s29 }
 0xe55   :  { %3374 = vadd.xlane.f32.xlu0 %v3373_v26 }
 0xe9d   :  { %v3315_v60 = vpop.permute.xlu1 %3314  ;;  %v3319_v51 = vpop.permute.xlu0 %3318 }
 0xe9e   :  { %v3325_v45 = vsel %vm490_vm2, %v3306_v35, %v3315_v60 }
 0xe9f   :  { %v3326_v42 = vsel %vm854_vm3, %v3325_v45, %v3319_v51  ;;  %v3755_v51 = vld [vmem:[%s5339_s11 + $0x1] ss:$0 sm:$0xff] }
 0xea5   :  { %v3323_v14 = vpop.permute.xlu1 %3322 }
 0xea6   :  { %v3327_v24 = vsel %vm856_vm4, %v3326_v42, %v3323_v14 }
 0xea7   :  { %3662 = vmatmul.msk.f32.gmra.mxu0 %vm92_vm0, %v3327_v24 }
 0xec8   :  { %v3375_v57 = vpop.xlane.xlu0 %3374 }
 0xec9   :  { %v3379_v61 = vmul.f32 %v3375_v57, %v4571_v22 }
 0xecb   :  { %v3381_v37 = vsub.f32 %v3367_v50, %v3379_v61 }
 0xecd   :  { %v3383_v44 = vmul.f32 %v3381_v37, %v3381_v37 }
 0xecf   :  { %v3385_v54 = vsel %vm92_vm0, %v3383_v44, 0.0 }
 0xed0   :  { %3386 = vadd.xlane.f32.xlu2 %v3385_v54 }
 0xf24   :  { %v3364_v8 = vpop.f32.mrf.mxu0 }
 0xf25   :  { %v3365_v31 = vadd.f32 %v3751_v36, %v3364_v8 }
 0xf27   :  { %v3368_v13 = vadd.f32 %v3365_v31, %v4811_v40  ;;  %v3665_v40 = vld [vmem:[%s5336_s8 + $0x20] sm:$0xff]  ;;  %s5344_s8 = smov 128  }
 0xf28   :  { %3458 = vmatpush.msrb.mxu1 %v3665_v40 }
 0xf29   :  { %v3376_v15 = vsel %vm92_vm0, %v3368_v13, 0.0 }
 0xf2a   :  { %3377 = vadd.xlane.f32.xlu1 %v3376_v15 }
 0xf43   :  { %v3387_v12 = vpop.xlane.xlu2 %3386 }
 0xf44   :  { %v3391_v23 = vmul.f32 %v3387_v12, %v4571_v22 }
 0xf46   :  { %v3393_v34 = vadd.f32 1e-05, %v3391_v23 }
 0xf48   :  { %3832 = vrsqrt.f32 %v3393_v34  ;;  %vm3401_vm2 = vweird.f32 %v3393_v34 }
 0xf4e   :  { %v3833_v11 = vpop.eup %3832 }
 0xf4f   :  { %v3396_v25 = vmul.f32 %v3833_v11, %v3393_v34  ;;  %vm3402_vm1 = vweird.f32 %v3833_v11 }
 0xf50   :  { %vm3403_vm3 = vmor %vm3401_vm2, %vm3402_vm1 }
 0xf51   :  { %v3397_v7 = vmul.f32 %v3833_v11, %v3396_v25 }
 0xf53   :  { %v3398_v27 = vmul.f32 0.5, %v3397_v7 }
 0xf55   :  { %v3399_v29 = vsub.f32 1.5, %v3398_v27 }
 0xf57   :  { %v3400_v3 = vmul.f32 %v3833_v11, %v3399_v29 }
 0xf59   :  { %v3404_v33 = vsel %vm3403_vm3, %v3833_v11, %v3400_v3 }
 0xf5a   :  { %v3415_v0 = vmul.f32 %v3404_v33, %v3381_v37 }
 0xf5c   :  { %v3420_v62 = vmul.f32 %v3752_v53, %v3415_v0 }
 0xf5e   :  { %v3425_v2 = vadd.f32 %v3753_v18, %v3420_v62  ;;  %v3756_v62 = vld [vmem:[%s5340_s12 + $0x1] ss:$0 sm:$0xff]  ;;  %s3937_s12 = smov [#allocation7]  }
 0xf5f   :  { %s3577_s17 = sshll.u32 %s3937_s12, 4  ;;  %s3578_s17 = int_to_ptr.vmem [resolvable:$true] %s3577_s17 }
 0xf60   :  { %3670 = vmatmul.msk.f32.vlgmr.msrb.gmra.mxu1 %vm92_vm0, %v3425_v2 }
 0xf9d   :  { %v3378_v52 = vpop.xlane.xlu1 %3377 }
 0xf9e   :  { %v3380_v28 = vmul.f32 %v3378_v52, %v4571_v22 }
 0xfa0   :  { %v3382_v19 = vsub.f32 %v3368_v13, %v3380_v28 }
 0xfa2   :  { %v3384_v32 = vmul.f32 %v3382_v19, %v3382_v19 }
 0xfa4   :  { %v3388_v47 = vsel %vm92_vm0, %v3384_v32, 0.0 }
 0xfa5   :  { %3389 = vadd.xlane.f32.xlu2 %v3388_v47 }
 0xfdd   :  { %v3460_v41 = vpop.f32.mrf.mxu1 }
 0xfde   :  { %v3461_v43 = vadd.f32 %v3754_v46, %v3460_v41 }
 0xfe0   :  { %v3466_v49 = vmax.f32 %v3461_v43, 0.0 }
 0xfe2   :  { %3681 = vmatmul.msk.f32.vlgmr.msrb.gmra.mxu2 %vm1743_vm9, %v3466_v49 }
0x1018   :  { %v3390_v21 = vpop.xlane.xlu2 %3389 }
0x1019   :  { %v3392_v5 = vmul.f32 %v3390_v21, %v4571_v22 }
0x101b   :  { %v3394_v20 = vadd.f32 1e-05, %v3392_v5 }
0x101d   :  { %3834 = vrsqrt.f32 %v3394_v20  ;;  %vm3411_vm8 = vweird.f32 %v3394_v20 }
0x1023   :  { %v3835_v38 = vpop.eup %3834 }
0x1024   :  { %v3406_v35 = vmul.f32 %v3835_v38, %v3394_v20  ;;  %vm3412_vm4 = vweird.f32 %v3835_v38 }
0x1025   :  { %vm3413_vm10 = vmor %vm3411_vm8, %vm3412_vm4 }
0x1026   :  { %v3407_v59 = vmul.f32 %v3835_v38, %v3406_v35 }
0x1028   :  { %v3408_v10 = vmul.f32 0.5, %v3407_v59 }
0x102a   :  { %v3409_v36 = vsub.f32 1.5, %v3408_v10 }
0x102c   :  { %v3410_v63 = vmul.f32 %v3835_v38, %v3409_v36 }
0x102e   :  { %v3414_v39 = vsel %vm3413_vm10, %v3835_v38, %v3410_v63 }
0x102f   :  { %v3416_v50 = vmul.f32 %v3414_v39, %v3382_v19 }
0x1031   :  { %v3421_v26 = vmul.f32 %v3752_v53, %v3416_v50 }
0x1033   :  { %v3426_v60 = vadd.f32 %v3753_v18, %v3421_v26 }
0x1035   :  { %3671 = vmatmul.msk.f32.gmra.mxu1 %vm92_vm0, %v3426_v60 }
0x1065   :  { %v3505_v45 = vpop.f32.mrf.mxu2 }
0x1066   :  { %v3506_v14 = vadd.f32 %v3755_v51, %v3505_v45 }
0x1068   :  { %v3511_v42 = vadd.f32 %v3506_v14, %v3425_v2 }
0x106a   :  { %v3517_v24 = vsel %vm92_vm0, %v3511_v42, 0.0 }
0x106b   :  { %3518 = vadd.xlane.f32.xlu2 %v3517_v24 }
0x10b2   :  { %v3463_v57 = vpop.f32.mrf.mxu1 }
0x10b3   :  { %v3464_v61 = vadd.f32 %v3754_v46, %v3463_v57 }
0x10b5   :  { %v3467_v37 = vmax.f32 %v3464_v61, 0.0 }
0x10b7   :  { %3682 = vmatmul.msk.f32.gmra.mxu2 %vm1743_vm9, %v3467_v37 }
0x10de   :  { %v3519_v44 = vpop.xlane.xlu2 %3518 }
0x10df   :  { %v3523_v8 = vmul.f32 %v3519_v44, %v4571_v22 }
0x10e1   :  { %v3525_v15 = vsub.f32 %v3511_v42, %v3523_v8 }
0x10e3   :  { %v3527_v1 = vmul.f32 %v3525_v15, %v3525_v15 }
0x10e5   :  { %v3529_v17 = vsel %vm92_vm0, %v3527_v1, 0.0 }
0x113a   :  { %v3508_v54 = vpop.f32.mrf.mxu2 }
0x113b   :  { %v3509_v31 = vadd.f32 %v3755_v51, %v3508_v54 }
0x113d   :  { %v3512_v13 = vadd.f32 %v3509_v31, %v3426_v60 }
0x113f   :  { %v3520_v16 = vsel %vm92_vm0, %v3512_v13, 0.0 }
0x1140   :  { %3521 = vadd.xlane.f32.xlu2 %v3520_v16 }
0x1148   :  { %3530 = vadd.xlane.f32.xlu2 %v3529_v17 }
0x11b3   :  { %v3522_v40 = vpop.xlane.xlu2 %3521 }
0x11b4   :  { %v3524_v12 = vmul.f32 %v3522_v40, %v4571_v22 }
0x11b6   :  { %v3526_v23 = vsub.f32 %v3512_v13, %v3524_v12 }
0x11b8   :  { %v3528_v34 = vmul.f32 %v3526_v23, %v3526_v23 }
0x11ba   :  { %v3532_v11 = vsel %vm92_vm0, %v3528_v34, 0.0 }
0x11bb   :  { %3533 = vadd.xlane.f32.xlu0 %v3532_v11  ;;  %v3531_v25 = vpop.xlane.xlu2 %3530 }
0x11bc   :  { %v3535_v7 = vmul.f32 %v3531_v25, %v4571_v22 }
0x11be   :  { %v3537_v27 = vadd.f32 1e-05, %v3535_v7 }
0x11c0   :  { %3836 = vrsqrt.f32 %v3537_v27  ;;  %vm3545_vm11 = vweird.f32 %v3537_v27 }
0x11c6   :  { %v3837_v29 = vpop.eup %3836 }
0x11c7   :  { %v3540_v3 = vmul.f32 %v3837_v29, %v3537_v27  ;;  %vm3546_vm9 = vweird.f32 %v3837_v29 }
0x11c8   :  { %vm3547_vm12 = vmor %vm3545_vm11, %vm3546_vm9 }
0x11c9   :  { %v3541_v53 = vmul.f32 %v3837_v29, %v3540_v3 }
0x11cb   :  { %v3542_v33 = vmul.f32 0.5, %v3541_v53 }
0x11cd   :  { %v3543_v0 = vsub.f32 1.5, %v3542_v33 }
0x11cf   :  { %v3544_v18 = vmul.f32 %v3837_v29, %v3543_v0 }
0x11d1   :  { %v3548_v2 = vsel %vm3547_vm12, %v3837_v29, %v3544_v18 }
0x11d2   :  { %v3559_v6 = vmul.f32 %v3548_v2, %v3525_v15 }
0x11d4   :  { %v3564_v30 = vmul.f32 %v3756_v62, %v3559_v6 }
0x11d6   :  { %v3569_v4 = vadd.f32 %v3757_v55, %v3564_v30 }
0x11d8   :  { %3571 = vst.msk [vmem:[#allocation7] sm:$0xff] %vm92_vm0, %v3569_v4 }
0x122e   :  { %v3534_v58 = vpop.xlane.xlu0 %3533 }
0x122f   :  { %v3536_v52 = vmul.f32 %v3534_v58, %v4571_v22 }
0x1231   :  { %v3538_v28 = vadd.f32 1e-05, %v3536_v52 }
0x1233   :  { %3838 = vrsqrt.f32 %v3538_v28  ;;  %vm3555_vm14 = vweird.f32 %v3538_v28 }
0x1239   :  { %v3839_v19 = vpop.eup %3838 }
0x123a   :  { %v3550_v32 = vmul.f32 %v3839_v19, %v3538_v28  ;;  %vm3556_vm13 = vweird.f32 %v3839_v19 }
0x123b   :  { %vm3557_vm15 = vmor %vm3555_vm14, %vm3556_vm13 }
0x123c   :  { %v3551_v47 = vmul.f32 %v3839_v19, %v3550_v32 }
0x123e   :  { %v3552_v56 = vmul.f32 0.5, %v3551_v47 }
0x1240   :  { %v3553_v9 = vsub.f32 1.5, %v3552_v56 }
0x1242   :  { %v3554_v48 = vmul.f32 %v3839_v19, %v3553_v9 }
0x1244   :  { %v3558_v46 = vsel %vm3557_vm15, %v3839_v19, %v3554_v48 }
0x1245   :  { %v3560_v41 = vmul.f32 %v3558_v46, %v3526_v23 }
0x1247   :  { %v3565_v22 = vmul.f32 %v3756_v62, %v3560_v41 }
0x1249   :  { %v3570_v43 = vadd.f32 %v3757_v55, %v3565_v22 }
0x124b   :  { %3572 = vst.msk [vmem:[#allocation7 + $0x8] sm:$0xff] %vm92_vm0, %v3570_v43 }
0x124c   :  { %3585 = dma.vmem_to_hbm [thread:$0]  %s3578_s17, 256, %s3580_s13, [#allocation4], %s5344_s8, %s5344_s8, %s3924_s22  }
0x124d   :  { %3920 = dma.done.wait [#allocation4], 256  }
0x124e   :  { %3921 = vsyncadd [#allocation4], 4294967040 }
0x124f   :  { %3590 = vsyncpa [#allocation3], 1 }
0x1250   :  { %3591 = vsyncpa [#allocation6], 1 }
0x1251   :  { %3592 = vsyncpa [#allocation4], 1 }

</bundles_post_ra>
